<compile_context>
chip_gen: v5e
topology: v5e:2x2
jax: 0.10.0
libtpu: 0.0.40
codegen_flags: <defaults>
</compile_context>

<pallas_src>
import numpy as np
import jax
import jax.numpy as jnp
from jax import lax
from jax.experimental import pallas as pl
from jax.experimental.pallas import tpu as pltpu


# ----------------------------------------------------------------------------
# The fused kernel (one grid step = one batch tile, everything stays in VMEM)
# ----------------------------------------------------------------------------
def _lenet_kernel(x_ref, w1k_ref, b1_ref, w2k_ref, b2_ref,
                  wf1_ref, bf1_ref, wf2_ref, bf2_ref, wf3_ref, bf3_ref,
                  out_ref, a1_ref, p1_ref, a2_ref, p2_ref):
    f32 = jnp.float32
    BT = x_ref.shape[1]                              # batch tile (sublane dim)

    def conv_tap(src_ref, ki, h_out, w_ref):
        # Leading-dim window (free in the H-major layout) -> one MXU matmul.
        lhs = src_ref[ki:ki + h_out].reshape(h_out * BT, src_ref.shape[-1])
        res = jnp.dot(lhs, w_ref[ki], preferred_element_type=f32)
        return res.reshape(h_out, BT, w_ref.shape[-1])

    # ---- conv1 (1->6, 5x5 valid): planes h1 in [0,24), lanes w1*6 + c -------
    a1_ref[...] = conv_tap(x_ref, 0, 24, w1k_ref) + b1_ref[...]
    for ki in range(1, 5):
        a1_ref[...] += conv_tap(x_ref, ki, 24, w1k_ref)

    # ---- ReLU + 2x2 max-pool (H via leading-dim planes, W via lane shift) ---
    for hp in range(12):
        v = jnp.maximum(jnp.maximum(a1_ref[2 * hp], a1_ref[2 * hp + 1]), 0.0)
        vs = jnp.concatenate([v[:, 6:], v[:, :6]], axis=1)   # lane rotate by C1
        p1_ref[hp] = jnp.maximum(v, vs)           # pooled value at even-w1 lanes

    # ---- conv2 (6->16, 5x5 valid): planes h2 in [0,8), lanes w2*16 + d ------
    a2_ref[...] = conv_tap(p1_ref, 0, 8, w2k_ref) + b2_ref[...]
    for ki in range(1, 5):
        a2_ref[...] += conv_tap(p1_ref, ki, 8, w2k_ref)

    # ---- ReLU + 2x2 max-pool -------------------------------------------------
    for hp in range(4):
        v = jnp.maximum(jnp.maximum(a2_ref[2 * hp], a2_ref[2 * hp + 1]), 0.0)
        vs = jnp.concatenate([v[:, 16:], v[:, :16]], axis=1)
        p2_ref[hp] = jnp.maximum(v, vs)           # pooled value at even-w2 lanes

    # ---- fc1 (256->120) as ONE (BT,512)x(512,128) matmul ----------------------
    # p2 planes are 128-lane wide, so this concat is pure 128-aligned placement.
    lhs = jnp.concatenate([p2_ref[0], p2_ref[1], p2_ref[2], p2_ref[3]], axis=1)
    h = jnp.maximum(jnp.dot(lhs, wf1_ref[...], preferred_element_type=f32)
                    + bf1_ref[...], 0.0)

    # ---- fc2 (120->84) + ReLU, fc3 (84->10), lane-dense 128-wide output -------
    h = jnp.maximum(jnp.dot(h, wf2_ref[...], preferred_element_type=f32)
                    + bf2_ref[...], 0.0)
    out_ref[...] = (jnp.dot(h, wf3_ref[...], preferred_element_type=f32)
                    + bf3_ref[...])


# ----------------------------------------------------------------------------
# Parameter init (PyTorch-style uniform fan-in) and one-time weight packing
# ----------------------------------------------------------------------------
def init_params(key):
    def uni(k, shape, fan_in):
        bound = 1.0 / np.sqrt(fan_in)
        return jax.random.uniform(k, shape, jnp.float32, -bound, bound)

    keys = jax.random.split(key, 10)
    return {
        "conv1_w": uni(keys[0], (6, 1, 5, 5), 25),
        "conv1_b": uni(keys[1], (6,), 25),
        "conv2_w": uni(keys[2], (16, 6, 5, 5), 150),
        "conv2_b": uni(keys[3], (16,), 150),
        "fc1_w":   uni(keys[4], (120, 256), 256),
        "fc1_b":   uni(keys[5], (120,), 256),
        "fc2_w":   uni(keys[6], (84, 120), 120),
        "fc2_b":   uni(keys[7], (84,), 120),
        "fc3_w":   uni(keys[8], (10, 84), 84),
        "fc3_b":   uni(keys[9], (10,), 84),
    }


def pack_params(p):
    """One-time host-side packing into banded / lane-padded MXU matrices."""
    c1w = np.asarray(p["conv1_w"], np.float32)   # (6,1,5,5)
    c1b = np.asarray(p["conv1_b"], np.float32)
    c2w = np.asarray(p["conv2_w"], np.float32)   # (16,6,5,5)
    c2b = np.asarray(p["conv2_b"], np.float32)
    f1w = np.asarray(p["fc1_w"], np.float32)     # (120,256)
    f1b = np.asarray(p["fc1_b"], np.float32)
    f2w = np.asarray(p["fc2_w"], np.float32)     # (84,120)
    f2b = np.asarray(p["fc2_b"], np.float32)
    f3w = np.asarray(p["fc3_w"], np.float32)     # (10,84)
    f3b = np.asarray(p["fc3_b"], np.float32)

    # conv1 banded weights: w1k[ki, w, w1*6 + c] = conv1_w[c, 0, ki, w - w1]
    w1k = np.zeros((5, 28, 144), np.float32)
    for ki in range(5):
        for kj in range(5):
            for w1 in range(24):
                w1k[ki, w1 + kj, w1 * 6:(w1 + 1) * 6] = c1w[:, 0, ki, kj]
    b1 = np.tile(c1b, 24).reshape(1, 144)

    # conv2 banded weights over the pooled layout (valid input lane = 12*wp + c)
    w2k = np.zeros((5, 144, 128), np.float32)
    for ki in range(5):
        for kj in range(5):
            for w2 in range(8):
                wp = w2 + kj
                w2k[ki, 12 * wp:12 * wp + 6, w2 * 16:(w2 + 1) * 16] = \
                    c2w[:, :, ki, kj].T
    b2 = np.tile(c2b, 8).reshape(1, 128)

    # fc1 as one (512,128): fc1 input lane = h4*128 + 32*w4 + d,
    # torch flatten index f = d*16 + h4*4 + w4. Zero rows mask odd-w2 lanes.
    wf1 = np.zeros((512, 128), np.float32)
    for h4 in range(4):
        for w4 in range(4):
            cols = np.arange(16) * 16 + h4 * 4 + w4
            row0 = h4 * 128 + 32 * w4
            wf1[row0:row0 + 16, :120] = f1w[:, cols].T
    bf1 = np.zeros((1, 128), np.float32)
    bf1[0, :120] = f1b

    wf2 = np.zeros((128, 128), np.float32)
    wf2[:120, :84] = f2w.T
    bf2 = np.zeros((1, 128), np.float32)
    bf2[0, :84] = f2b

    wf3 = np.zeros((128, 128), np.float32)
    wf3[:84, :10] = f3w.T
    bf3 = np.zeros((1, 128), np.float32)
    bf3[0, :10] = f3b

    packed = dict(w1k=w1k, b1=b1, w2k=w2k, b2=b2, wf1=wf1, bf1=bf1,
                  wf2=wf2, bf2=bf2, wf3=wf3, bf3=bf3)
    return {k: jnp.asarray(v) for k, v in packed.items()}


# ----------------------------------------------------------------------------
# Forward pass: one pallas_call, grid over batch tiles
# ----------------------------------------------------------------------------
def _round_up(n, m):
    return ((n + m - 1) // m) * m


def net_forward(x, packed, *, batch_tile=128):
    """x: (N, 1, 28, 28) float32 -> logits (N, 10)."""
    N = x.shape[0]
    # H-major input layout: (H=28, batch, W=28) so conv-tap windows are
    # leading-dim slices inside the kernel.
    xs = jnp.transpose(x.reshape(N, 28, 28).astype(jnp.float32), (1, 0, 2))

    # Big batch tile (amortize per-step overhead, feed the MXU with M>=128),
    # but never pad a tiny batch up to 128, and keep >= 2 grid steps when
    # possible so v7x's second TensorCore gets work via the "parallel" axis.
    bt = max(8, _round_up(min(int(batch_tile),
                              _round_up(max(1, (N + 1) // 2), 8)), 8))
    n_tiles = (N + bt - 1) // bt
    npad = n_tiles * bt
    if npad != N:
        xs = jnp.pad(xs, ((0, 0), (0, npad - N), (0, 0)))

    out = pl.pallas_call(
        _lenet_kernel,
        out_shape=jax.ShapeDtypeStruct((npad, 128), jnp.float32),
        grid=(n_tiles,),
        in_specs=[
            pl.BlockSpec((28, bt, 28), lambda i: (0, i, 0)),   # x (H-major)
            pl.BlockSpec((5, 28, 144), lambda i: (0, 0, 0)),   # w1k
            pl.BlockSpec((1, 144), lambda i: (0, 0)),          # b1
            pl.BlockSpec((5, 144, 128), lambda i: (0, 0, 0)),  # w2k
            pl.BlockSpec((1, 128), lambda i: (0, 0)),          # b2
            pl.BlockSpec((512, 128), lambda i: (0, 0)),        # wf1
            pl.BlockSpec((1, 128), lambda i: (0, 0)),          # bf1
            pl.BlockSpec((128, 128), lambda i: (0, 0)),        # wf2
            pl.BlockSpec((1, 128), lambda i: (0, 0)),          # bf2
            pl.BlockSpec((128, 128), lambda i: (0, 0)),        # wf3
            pl.BlockSpec((1, 128), lambda i: (0, 0)),          # bf3
        ],
        out_specs=pl.BlockSpec((bt, 128), lambda i: (i, 0)),
        scratch_shapes=[
            pltpu.VMEM((24, bt, 144), jnp.float32),   # conv1 pre-ReLU (H-major)
            pltpu.VMEM((12, bt, 144), jnp.float32),   # pool1
            pltpu.VMEM((8, bt, 128), jnp.float32),    # conv2 pre-ReLU
            pltpu.VMEM((4, bt, 128), jnp.float32),    # pool2
        ],
        compiler_params=pltpu.CompilerParams(
            dimension_semantics=("parallel",),
            # Comfortably holds bt<=256 footprints on every generation
            # (v5e default scoped VMEM is only 16 MiB; v7x physical is 64 MiB).
            vmem_limit_bytes=48 * 1024 * 1024,
        ),
    )(xs, packed["w1k"], packed["b1"], packed["w2k"], packed["b2"],
      packed["wf1"], packed["bf1"], packed["wf2"], packed["bf2"],
      packed["wf3"], packed["bf3"])
    return out[:N, :10]


# ----------------------------------------------------------------------------
# Pure-JAX reference of the same Net (for a correctness check)
# ----------------------------------------------------------------------------
def net_reference(x, p):
    dn = ("NCHW", "OIHW", "NCHW")
    hi = lax.Precision.HIGHEST
    y = lax.conv_general_dilated(x, p["conv1_w"], (1, 1), "VALID",
                                 dimension_numbers=dn, precision=hi)
    y = jax.nn.relu(y + p["conv1_b"].reshape(1, -1, 1, 1))
    y = lax.reduce_window(y, -jnp.inf, lax.max, (1, 1, 2, 2), (1, 1, 2, 2), "VALID")
    y = lax.conv_general_dilated(y, p["conv2_w"], (1, 1), "VALID",
                                 dimension_numbers=dn, precision=hi)
    y = jax.nn.relu(y + p["conv2_b"].reshape(1, -1, 1, 1))
    y = lax.reduce_window(y, -jnp.inf, lax.max, (1, 1, 2, 2), (1, 1, 2, 2), "VALID")
    y = y.reshape(y.shape[0], -1)                    # torch .view(-1, 16*4*4)
    y = jax.nn.relu(jnp.matmul(y, p["fc1_w"].T, precision=hi) + p["fc1_b"])
    y = jax.nn.relu(jnp.matmul(y, p["fc2_w"].T, precision=hi) + p["fc2_b"])
    return jnp.matmul(y, p["fc3_w"].T, precision=hi) + p["fc3_b"]


if __name__ == "__main__":
    key = jax.random.PRNGKey(0)
    k_params, k_x = jax.random.split(key)
    params = init_params(k_params)
    packed = pack_params(params)                     # one-time weight packing
    x = jax.random.normal(k_x, (2, 1, 28, 28), dtype=jnp.float32)

    fwd = jax.jit(net_forward)
    out = jax.block_until_ready(fwd(x, packed))
    assert out.shape == (2, 10), out.shape

    ref = jax.block_until_ready(net_reference(x, params))
    max_err = float(jnp.max(jnp.abs(out - ref)))
    assert max_err < 2e-3, f"max |pallas - reference| = {max_err}"
    print("KERNEL_OK")
</pallas_src>

<mosaic_0001>
module attributes {stable_mosaic.version = 11 : i64} {
  func.func @_lenet_kernel(%arg0: i32, %arg1: memref<28x8x28xf32, #tpu.memory_space<vmem>>, %arg2: memref<5x28x144xf32, #tpu.memory_space<vmem>>, %arg3: memref<1x144xf32, #tpu.memory_space<vmem>>, %arg4: memref<5x144x128xf32, #tpu.memory_space<vmem>>, %arg5: memref<1x128xf32, #tpu.memory_space<vmem>>, %arg6: memref<512x128xf32, #tpu.memory_space<vmem>>, %arg7: memref<1x128xf32, #tpu.memory_space<vmem>>, %arg8: memref<128x128xf32, #tpu.memory_space<vmem>>, %arg9: memref<1x128xf32, #tpu.memory_space<vmem>>, %arg10: memref<128x128xf32, #tpu.memory_space<vmem>>, %arg11: memref<1x128xf32, #tpu.memory_space<vmem>>, %arg12: memref<8x128xf32, #tpu.memory_space<vmem>>, %arg13: memref<24x8x144xf32, #tpu.memory_space<vmem>>, %arg14: memref<12x8x144xf32, #tpu.memory_space<vmem>>, %arg15: memref<8x8x128xf32, #tpu.memory_space<vmem>>, %arg16: memref<4x8x128xf32, #tpu.memory_space<vmem>>) attributes {dimension_semantics = [#tpu.dimension_semantics<parallel>], iteration_bounds = array<i64: 1>, scalar_prefetch = 0 : i64, scratch_operands = 4 : i64, tpu.core_type = #tpu.core_type<tc>, window_params = [{transform_indices = @transform_0, window_bounds = array<i64: 28, 8, 28>}, {pipeline_mode = #tpu.pipeline_mode<synchronous>, transform_indices = @transform_1, window_bounds = array<i64: 5, 28, 144>}, {pipeline_mode = #tpu.pipeline_mode<synchronous>, transform_indices = @transform_2, window_bounds = array<i64: 1, 144>}, {pipeline_mode = #tpu.pipeline_mode<synchronous>, transform_indices = @transform_3, window_bounds = array<i64: 5, 144, 128>}, {pipeline_mode = #tpu.pipeline_mode<synchronous>, transform_indices = @transform_4, window_bounds = array<i64: 1, 128>}, {pipeline_mode = #tpu.pipeline_mode<synchronous>, transform_indices = @transform_5, window_bounds = array<i64: 512, 128>}, {pipeline_mode = #tpu.pipeline_mode<synchronous>, transform_indices = @transform_6, window_bounds = array<i64: 1, 128>}, {pipeline_mode = #tpu.pipeline_mode<synchronous>, transform_indices = @transform_7, window_bounds = array<i64: 128, 128>}, {pipeline_mode = #tpu.pipeline_mode<synchronous>, transform_indices = @transform_8, window_bounds = array<i64: 1, 128>}, {pipeline_mode = #tpu.pipeline_mode<synchronous>, transform_indices = @transform_9, window_bounds = array<i64: 128, 128>}, {pipeline_mode = #tpu.pipeline_mode<synchronous>, transform_indices = @transform_10, window_bounds = array<i64: 1, 128>}, {transform_indices = @transform_11, window_bounds = array<i64: 8, 128>}]} {
    %c0 = arith.constant 0 : index
    %c0_0 = arith.constant 0 : index
    %c0_1 = arith.constant 0 : index
    %0 = vector.load %arg1[%c0, %c0_0, %c0_1] : memref<28x8x28xf32, #tpu.memory_space<vmem>>, vector<24x8x28xf32>
    %1 = vector.shape_cast %0 : vector<24x8x28xf32> to vector<192x28xf32>
    %c0_2 = arith.constant 0 : index
    %c0_3 = arith.constant 0 : index
    %c0_4 = arith.constant 0 : index
    %2 = vector.load %arg2[%c0_2, %c0_3, %c0_4] : memref<5x28x144xf32, #tpu.memory_space<vmem>>, vector<1x28x144xf32>
    %3 = vector.shape_cast %2 : vector<1x28x144xf32> to vector<28x144xf32>
    %cst = arith.constant dense<0.000000e+00> : vector<192x144xf32>
    %4 = tpu.matmul %1, %3, %cst {dimension_numbers = #tpu.dot_dimension_numbers<[1], [0], [0], [1], [0, 0, 1, 1], [], []>} : vector<192x28xf32>, vector<28x144xf32>, vector<192x144xf32> -> vector<192x144xf32>
    %5 = vector.shape_cast %4 : vector<192x144xf32> to vector<24x8x144xf32>
    %c0_5 = arith.constant 0 : index
    %c0_6 = arith.constant 0 : index
    %6 = vector.load %arg3[%c0_5, %c0_6] : memref<1x144xf32, #tpu.memory_space<vmem>>, vector<1x144xf32>
    %7 = vector.shape_cast %6 : vector<1x144xf32> to vector<1x1x144xf32>
    %8 = vector.broadcast %7 : vector<1x1x144xf32> to vector<24x8x144xf32>
    %9 = arith.addf %5, %8 : vector<24x8x144xf32>
    %c0_7 = arith.constant 0 : index
    %c0_8 = arith.constant 0 : index
    %c0_9 = arith.constant 0 : index
    %10 = vector.load %arg13[%c0_7, %c0_8, %c0_9] : memref<24x8x144xf32, #tpu.memory_space<vmem>>, vector<24x8x144xf32>
    tpu.vector_store %arg13[%c0_7, %c0_8, %c0_9], %9 {strides = array<i32>} : memref<24x8x144xf32, #tpu.memory_space<vmem>>, vector<24x8x144xf32>,
    %c0_10 = arith.constant 0 : index
    %c0_11 = arith.constant 0 : index
    %c0_12 = arith.constant 0 : index
    %11 = vector.load %arg13[%c0_10, %c0_11, %c0_12] : memref<24x8x144xf32, #tpu.memory_space<vmem>>, vector<24x8x144xf32>
    %c1 = arith.constant 1 : index
    %c0_13 = arith.constant 0 : index
    %c0_14 = arith.constant 0 : index
    %12 = vector.load %arg1[%c1, %c0_13, %c0_14] : memref<28x8x28xf32, #tpu.memory_space<vmem>>, vector<24x8x28xf32>
    %13 = vector.shape_cast %12 : vector<24x8x28xf32> to vector<192x28xf32>
    %c1_15 = arith.constant 1 : index
    %c0_16 = arith.constant 0 : index
    %c0_17 = arith.constant 0 : index
    %14 = vector.load %arg2[%c1_15, %c0_16, %c0_17] : memref<5x28x144xf32, #tpu.memory_space<vmem>>, vector<1x28x144xf32>
    %15 = vector.shape_cast %14 : vector<1x28x144xf32> to vector<28x144xf32>
    %cst_18 = arith.constant dense<0.000000e+00> : vector<192x144xf32>
    %16 = tpu.matmul %13, %15, %cst_18 {dimension_numbers = #tpu.dot_dimension_numbers<[1], [0], [0], [1], [0, 0, 1, 1], [], []>} : vector<192x28xf32>, vector<28x144xf32>, vector<192x144xf32> -> vector<192x144xf32>
    %17 = vector.shape_cast %16 : vector<192x144xf32> to vector<24x8x144xf32>
    %18 = arith.addf %11, %17 : vector<24x8x144xf32>
    %c0_19 = arith.constant 0 : index
    %c0_20 = arith.constant 0 : index
    %c0_21 = arith.constant 0 : index
    %19 = vector.load %arg13[%c0_19, %c0_20, %c0_21] : memref<24x8x144xf32, #tpu.memory_space<vmem>>, vector<24x8x144xf32>
    tpu.vector_store %arg13[%c0_19, %c0_20, %c0_21], %18 {strides = array<i32>} : memref<24x8x144xf32, #tpu.memory_space<vmem>>, vector<24x8x144xf32>,
    %c0_22 = arith.constant 0 : index
    %c0_23 = arith.constant 0 : index
    %c0_24 = arith.constant 0 : index
    %20 = vector.load %arg13[%c0_22, %c0_23, %c0_24] : memref<24x8x144xf32, #tpu.memory_space<vmem>>, vector<24x8x144xf32>
    %c2 = arith.constant 2 : index
    %c0_25 = arith.constant 0 : index
    %c0_26 = arith.constant 0 : index
    %21 = vector.load %arg1[%c2, %c0_25, %c0_26] : memref<28x8x28xf32, #tpu.memory_space<vmem>>, vector<24x8x28xf32>
    %22 = vector.shape_cast %21 : vector<24x8x28xf32> to vector<192x28xf32>
    %c2_27 = arith.constant 2 : index
    %c0_28 = arith.constant 0 : index
    %c0_29 = arith.constant 0 : index
    %23 = vector.load %arg2[%c2_27, %c0_28, %c0_29] : memref<5x28x144xf32, #tpu.memory_space<vmem>>, vector<1x28x144xf32>
    %24 = vector.shape_cast %23 : vector<1x28x144xf32> to vector<28x144xf32>
    %cst_30 = arith.constant dense<0.000000e+00> : vector<192x144xf32>
    %25 = tpu.matmul %22, %24, %cst_30 {dimension_numbers = #tpu.dot_dimension_numbers<[1], [0], [0], [1], [0, 0, 1, 1], [], []>} : vector<192x28xf32>, vector<28x144xf32>, vector<192x144xf32> -> vector<192x144xf32>
    %26 = vector.shape_cast %25 : vector<192x144xf32> to vector<24x8x144xf32>
    %27 = arith.addf %20, %26 : vector<24x8x144xf32>
    %c0_31 = arith.constant 0 : index
    %c0_32 = arith.constant 0 : index
    %c0_33 = arith.constant 0 : index
    %28 = vector.load %arg13[%c0_31, %c0_32, %c0_33] : memref<24x8x144xf32, #tpu.memory_space<vmem>>, vector<24x8x144xf32>
    tpu.vector_store %arg13[%c0_31, %c0_32, %c0_33], %27 {strides = array<i32>} : memref<24x8x144xf32, #tpu.memory_space<vmem>>, vector<24x8x144xf32>,
    %c0_34 = arith.constant 0 : index
    %c0_35 = arith.constant 0 : index
    %c0_36 = arith.constant 0 : index
    %29 = vector.load %arg13[%c0_34, %c0_35, %c0_36] : memref<24x8x144xf32, #tpu.memory_space<vmem>>, vector<24x8x144xf32>
    %c3 = arith.constant 3 : index
    %c0_37 = arith.constant 0 : index
    %c0_38 = arith.constant 0 : index
    %30 = vector.load %arg1[%c3, %c0_37, %c0_38] : memref<28x8x28xf32, #tpu.memory_space<vmem>>, vector<24x8x28xf32>
    %31 = vector.shape_cast %30 : vector<24x8x28xf32> to vector<192x28xf32>
    %c3_39 = arith.constant 3 : index
    %c0_40 = arith.constant 0 : index
    %c0_41 = arith.constant 0 : index
    %32 = vector.load %arg2[%c3_39, %c0_40, %c0_41] : memref<5x28x144xf32, #tpu.memory_space<vmem>>, vector<1x28x144xf32>
    %33 = vector.shape_cast %32 : vector<1x28x144xf32> to vector<28x144xf32>
    %cst_42 = arith.constant dense<0.000000e+00> : vector<192x144xf32>
    %34 = tpu.matmul %31, %33, %cst_42 {dimension_numbers = #tpu.dot_dimension_numbers<[1], [0], [0], [1], [0, 0, 1, 1], [], []>} : vector<192x28xf32>, vector<28x144xf32>, vector<192x144xf32> -> vector<192x144xf32>
    %35 = vector.shape_cast %34 : vector<192x144xf32> to vector<24x8x144xf32>
    %36 = arith.addf %29, %35 : vector<24x8x144xf32>
    %c0_43 = arith.constant 0 : index
    %c0_44 = arith.constant 0 : index
    %c0_45 = arith.constant 0 : index
    %37 = vector.load %arg13[%c0_43, %c0_44, %c0_45] : memref<24x8x144xf32, #tpu.memory_space<vmem>>, vector<24x8x144xf32>
    tpu.vector_store %arg13[%c0_43, %c0_44, %c0_45], %36 {strides = array<i32>} : memref<24x8x144xf32, #tpu.memory_space<vmem>>, vector<24x8x144xf32>,
    %c0_46 = arith.constant 0 : index
    %c0_47 = arith.constant 0 : index
    %c0_48 = arith.constant 0 : index
    %38 = vector.load %arg13[%c0_46, %c0_47, %c0_48] : memref<24x8x144xf32, #tpu.memory_space<vmem>>, vector<24x8x144xf32>
    %c4 = arith.constant 4 : index
    %c0_49 = arith.constant 0 : index
    %c0_50 = arith.constant 0 : index
    %39 = vector.load %arg1[%c4, %c0_49, %c0_50] : memref<28x8x28xf32, #tpu.memory_space<vmem>>, vector<24x8x28xf32>
    %40 = vector.shape_cast %39 : vector<24x8x28xf32> to vector<192x28xf32>
    %c4_51 = arith.constant 4 : index
    %c0_52 = arith.constant 0 : index
    %c0_53 = arith.constant 0 : index
    %41 = vector.load %arg2[%c4_51, %c0_52, %c0_53] : memref<5x28x144xf32, #tpu.memory_space<vmem>>, vector<1x28x144xf32>
    %42 = vector.shape_cast %41 : vector<1x28x144xf32> to vector<28x144xf32>
    %cst_54 = arith.constant dense<0.000000e+00> : vector<192x144xf32>
    %43 = tpu.matmul %40, %42, %cst_54 {dimension_numbers = #tpu.dot_dimension_numbers<[1], [0], [0], [1], [0, 0, 1, 1], [], []>} : vector<192x28xf32>, vector<28x144xf32>, vector<192x144xf32> -> vector<192x144xf32>
    %44 = vector.shape_cast %43 : vector<192x144xf32> to vector<24x8x144xf32>
    %45 = arith.addf %38, %44 : vector<24x8x144xf32>
    %c0_55 = arith.constant 0 : index
    %c0_56 = arith.constant 0 : index
    %c0_57 = arith.constant 0 : index
    %46 = vector.load %arg13[%c0_55, %c0_56, %c0_57] : memref<24x8x144xf32, #tpu.memory_space<vmem>>, vector<24x8x144xf32>
    tpu.vector_store %arg13[%c0_55, %c0_56, %c0_57], %45 {strides = array<i32>} : memref<24x8x144xf32, #tpu.memory_space<vmem>>, vector<24x8x144xf32>,
    %c0_58 = arith.constant 0 : index
    %c0_59 = arith.constant 0 : index
    %c0_60 = arith.constant 0 : index
    %47 = vector.load %arg13[%c0_58, %c0_59, %c0_60] : memref<24x8x144xf32, #tpu.memory_space<vmem>>, vector<1x8x144xf32>
    %48 = vector.shape_cast %47 : vector<1x8x144xf32> to vector<8x144xf32>
    %c1_61 = arith.constant 1 : index
    %c0_62 = arith.constant 0 : index
    %c0_63 = arith.constant 0 : index
    %49 = vector.load %arg13[%c1_61, %c0_62, %c0_63] : memref<24x8x144xf32, #tpu.memory_space<vmem>>, vector<1x8x144xf32>
    %50 = vector.shape_cast %49 : vector<1x8x144xf32> to vector<8x144xf32>
    %51 = arith.maximumf %48, %50 : vector<8x144xf32>
    %cst_64 = arith.constant 0.000000e+00 : f32
    %52 = vector.broadcast %cst_64 : f32 to vector<8x144xf32>
    %53 = arith.maximumf %51, %52 : vector<8x144xf32>
    %54 = vector.extract_strided_slice %53 {offsets = [0, 6], sizes = [8, 138], strides = [1, 1]} : vector<8x144xf32> to vector<8x138xf32>
    %55 = vector.extract_strided_slice %53 {offsets = [0, 0], sizes = [8, 6], strides = [1, 1]} : vector<8x144xf32> to vector<8x6xf32>
    %56 = tpu.concatenate %54, %55 in 1 : vector<8x138xf32>, vector<8x6xf32> -> vector<8x144xf32>
    %57 = arith.maximumf %53, %56 : vector<8x144xf32>
    %c0_65 = arith.constant 0 : index
    %c0_66 = arith.constant 0 : index
    %c0_67 = arith.constant 0 : index
    %58 = vector.load %arg14[%c0_65, %c0_66, %c0_67] : memref<12x8x144xf32, #tpu.memory_space<vmem>>, vector<1x8x144xf32>
    %59 = vector.shape_cast %58 : vector<1x8x144xf32> to vector<8x144xf32>
    %60 = vector.shape_cast %57 : vector<8x144xf32> to vector<1x8x144xf32>
    tpu.vector_store %arg14[%c0_65, %c0_66, %c0_67], %60 {strides = array<i32>} : memref<12x8x144xf32, #tpu.memory_space<vmem>>, vector<1x8x144xf32>,
    %c2_68 = arith.constant 2 : index
    %c0_69 = arith.constant 0 : index
    %c0_70 = arith.constant 0 : index
    %61 = vector.load %arg13[%c2_68, %c0_69, %c0_70] : memref<24x8x144xf32, #tpu.memory_space<vmem>>, vector<1x8x144xf32>
    %62 = vector.shape_cast %61 : vector<1x8x144xf32> to vector<8x144xf32>
    %c3_71 = arith.constant 3 : index
    %c0_72 = arith.constant 0 : index
    %c0_73 = arith.constant 0 : index
    %63 = vector.load %arg13[%c3_71, %c0_72, %c0_73] : memref<24x8x144xf32, #tpu.memory_space<vmem>>, vector<1x8x144xf32>
    %64 = vector.shape_cast %63 : vector<1x8x144xf32> to vector<8x144xf32>
    %65 = arith.maximumf %62, %64 : vector<8x144xf32>
    %cst_74 = arith.constant 0.000000e+00 : f32
    %66 = vector.broadcast %cst_74 : f32 to vector<8x144xf32>
    %67 = arith.maximumf %65, %66 : vector<8x144xf32>
    %68 = vector.extract_strided_slice %67 {offsets = [0, 6], sizes = [8, 138], strides = [1, 1]} : vector<8x144xf32> to vector<8x138xf32>
    %69 = vector.extract_strided_slice %67 {offsets = [0, 0], sizes = [8, 6], strides = [1, 1]} : vector<8x144xf32> to vector<8x6xf32>
    %70 = tpu.concatenate %68, %69 in 1 : vector<8x138xf32>, vector<8x6xf32> -> vector<8x144xf32>
    %71 = arith.maximumf %67, %70 : vector<8x144xf32>
    %c1_75 = arith.constant 1 : index
    %c0_76 = arith.constant 0 : index
    %c0_77 = arith.constant 0 : index
    %72 = vector.load %arg14[%c1_75, %c0_76, %c0_77] : memref<12x8x144xf32, #tpu.memory_space<vmem>>, vector<1x8x144xf32>
    %73 = vector.shape_cast %72 : vector<1x8x144xf32> to vector<8x144xf32>
    %74 = vector.shape_cast %71 : vector<8x144xf32> to vector<1x8x144xf32>
    tpu.vector_store %arg14[%c1_75, %c0_76, %c0_77], %74 {strides = array<i32>} : memref<12x8x144xf32, #tpu.memory_space<vmem>>, vector<1x8x144xf32>,
    %c4_78 = arith.constant 4 : index
    %c0_79 = arith.constant 0 : index
    %c0_80 = arith.constant 0 : index
    %75 = vector.load %arg13[%c4_78, %c0_79, %c0_80] : memref<24x8x144xf32, #tpu.memory_space<vmem>>, vector<1x8x144xf32>
    %76 = vector.shape_cast %75 : vector<1x8x144xf32> to vector<8x144xf32>
    %c5 = arith.constant 5 : index
    %c0_81 = arith.constant 0 : index
    %c0_82 = arith.constant 0 : index
    %77 = vector.load %arg13[%c5, %c0_81, %c0_82] : memref<24x8x144xf32, #tpu.memory_space<vmem>>, vector<1x8x144xf32>
    %78 = vector.shape_cast %77 : vector<1x8x144xf32> to vector<8x144xf32>
    %79 = arith.maximumf %76, %78 : vector<8x144xf32>
    %cst_83 = arith.constant 0.000000e+00 : f32
    %80 = vector.broadcast %cst_83 : f32 to vector<8x144xf32>
    %81 = arith.maximumf %79, %80 : vector<8x144xf32>
    %82 = vector.extract_strided_slice %81 {offsets = [0, 6], sizes = [8, 138], strides = [1, 1]} : vector<8x144xf32> to vector<8x138xf32>
    %83 = vector.extract_strided_slice %81 {offsets = [0, 0], sizes = [8, 6], strides = [1, 1]} : vector<8x144xf32> to vector<8x6xf32>
    %84 = tpu.concatenate %82, %83 in 1 : vector<8x138xf32>, vector<8x6xf32> -> vector<8x144xf32>
    %85 = arith.maximumf %81, %84 : vector<8x144xf32>
    %c2_84 = arith.constant 2 : index
    %c0_85 = arith.constant 0 : index
    %c0_86 = arith.constant 0 : index
    %86 = vector.load %arg14[%c2_84, %c0_85, %c0_86] : memref<12x8x144xf32, #tpu.memory_space<vmem>>, vector<1x8x144xf32>
    %87 = vector.shape_cast %86 : vector<1x8x144xf32> to vector<8x144xf32>
    %88 = vector.shape_cast %85 : vector<8x144xf32> to vector<1x8x144xf32>
    tpu.vector_store %arg14[%c2_84, %c0_85, %c0_86], %88 {strides = array<i32>} : memref<12x8x144xf32, #tpu.memory_space<vmem>>, vector<1x8x144xf32>,
    %c6 = arith.constant 6 : index
    %c0_87 = arith.constant 0 : index
    %c0_88 = arith.constant 0 : index
    %89 = vector.load %arg13[%c6, %c0_87, %c0_88] : memref<24x8x144xf32, #tpu.memory_space<vmem>>, vector<1x8x144xf32>
    %90 = vector.shape_cast %89 : vector<1x8x144xf32> to vector<8x144xf32>
    %c7 = arith.constant 7 : index
    %c0_89 = arith.constant 0 : index
    %c0_90 = arith.constant 0 : index
    %91 = vector.load %arg13[%c7, %c0_89, %c0_90] : memref<24x8x144xf32, #tpu.memory_space<vmem>>, vector<1x8x144xf32>
    %92 = vector.shape_cast %91 : vector<1x8x144xf32> to vector<8x144xf32>
    %93 = arith.maximumf %90, %92 : vector<8x144xf32>
    %cst_91 = arith.constant 0.000000e+00 : f32
    %94 = vector.broadcast %cst_91 : f32 to vector<8x144xf32>
    %95 = arith.maximumf %93, %94 : vector<8x144xf32>
    %96 = vector.extract_strided_slice %95 {offsets = [0, 6], sizes = [8, 138], strides = [1, 1]} : vector<8x144xf32> to vector<8x138xf32>
    %97 = vector.extract_strided_slice %95 {offsets = [0, 0], sizes = [8, 6], strides = [1, 1]} : vector<8x144xf32> to vector<8x6xf32>
    %98 = tpu.concatenate %96, %97 in 1 : vector<8x138xf32>, vector<8x6xf32> -> vector<8x144xf32>
    %99 = arith.maximumf %95, %98 : vector<8x144xf32>
    %c3_92 = arith.constant 3 : index
    %c0_93 = arith.constant 0 : index
    %c0_94 = arith.constant 0 : index
    %100 = vector.load %arg14[%c3_92, %c0_93, %c0_94] : memref<12x8x144xf32, #tpu.memory_space<vmem>>, vector<1x8x144xf32>
    %101 = vector.shape_cast %100 : vector<1x8x144xf32> to vector<8x144xf32>
    %102 = vector.shape_cast %99 : vector<8x144xf32> to vector<1x8x144xf32>
    tpu.vector_store %arg14[%c3_92, %c0_93, %c0_94], %102 {strides = array<i32>} : memref<12x8x144xf32, #tpu.memory_space<vmem>>, vector<1x8x144xf32>,
    %c8 = arith.constant 8 : index
    %c0_95 = arith.constant 0 : index
    %c0_96 = arith.constant 0 : index
    %103 = vector.load %arg13[%c8, %c0_95, %c0_96] : memref<24x8x144xf32, #tpu.memory_space<vmem>>, vector<1x8x144xf32>
    %104 = vector.shape_cast %103 : vector<1x8x144xf32> to vector<8x144xf32>
    %c9 = arith.constant 9 : index
    %c0_97 = arith.constant 0 : index
    %c0_98 = arith.constant 0 : index
    %105 = vector.load %arg13[%c9, %c0_97, %c0_98] : memref<24x8x144xf32, #tpu.memory_space<vmem>>, vector<1x8x144xf32>
    %106 = vector.shape_cast %105 : vector<1x8x144xf32> to vector<8x144xf32>
    %107 = arith.maximumf %104, %106 : vector<8x144xf32>
    %cst_99 = arith.constant 0.000000e+00 : f32
    %108 = vector.broadcast %cst_99 : f32 to vector<8x144xf32>
    %109 = arith.maximumf %107, %108 : vector<8x144xf32>
    %110 = vector.extract_strided_slice %109 {offsets = [0, 6], sizes = [8, 138], strides = [1, 1]} : vector<8x144xf32> to vector<8x138xf32>
    %111 = vector.extract_strided_slice %109 {offsets = [0, 0], sizes = [8, 6], strides = [1, 1]} : vector<8x144xf32> to vector<8x6xf32>
    %112 = tpu.concatenate %110, %111 in 1 : vector<8x138xf32>, vector<8x6xf32> -> vector<8x144xf32>
    %113 = arith.maximumf %109, %112 : vector<8x144xf32>
    %c4_100 = arith.constant 4 : index
    %c0_101 = arith.constant 0 : index
    %c0_102 = arith.constant 0 : index
    %114 = vector.load %arg14[%c4_100, %c0_101, %c0_102] : memref<12x8x144xf32, #tpu.memory_space<vmem>>, vector<1x8x144xf32>
    %115 = vector.shape_cast %114 : vector<1x8x144xf32> to vector<8x144xf32>
    %116 = vector.shape_cast %113 : vector<8x144xf32> to vector<1x8x144xf32>
    tpu.vector_store %arg14[%c4_100, %c0_101, %c0_102], %116 {strides = array<i32>} : memref<12x8x144xf32, #tpu.memory_space<vmem>>, vector<1x8x144xf32>,
    %c10 = arith.constant 10 : index
    %c0_103 = arith.constant 0 : index
    %c0_104 = arith.constant 0 : index
    %117 = vector.load %arg13[%c10, %c0_103, %c0_104] : memref<24x8x144xf32, #tpu.memory_space<vmem>>, vector<1x8x144xf32>
    %118 = vector.shape_cast %117 : vector<1x8x144xf32> to vector<8x144xf32>
    %c11 = arith.constant 11 : index
    %c0_105 = arith.constant 0 : index
    %c0_106 = arith.constant 0 : index
    %119 = vector.load %arg13[%c11, %c0_105, %c0_106] : memref<24x8x144xf32, #tpu.memory_space<vmem>>, vector<1x8x144xf32>
    %120 = vector.shape_cast %119 : vector<1x8x144xf32> to vector<8x144xf32>
    %121 = arith.maximumf %118, %120 : vector<8x144xf32>
    %cst_107 = arith.constant 0.000000e+00 : f32
    %122 = vector.broadcast %cst_107 : f32 to vector<8x144xf32>
    %123 = arith.maximumf %121, %122 : vector<8x144xf32>
    %124 = vector.extract_strided_slice %123 {offsets = [0, 6], sizes = [8, 138], strides = [1, 1]} : vector<8x144xf32> to vector<8x138xf32>
    %125 = vector.extract_strided_slice %123 {offsets = [0, 0], sizes = [8, 6], strides = [1, 1]} : vector<8x144xf32> to vector<8x6xf32>
    %126 = tpu.concatenate %124, %125 in 1 : vector<8x138xf32>, vector<8x6xf32> -> vector<8x144xf32>
    %127 = arith.maximumf %123, %126 : vector<8x144xf32>
    %c5_108 = arith.constant 5 : index
    %c0_109 = arith.constant 0 : index
    %c0_110 = arith.constant 0 : index
    %128 = vector.load %arg14[%c5_108, %c0_109, %c0_110] : memref<12x8x144xf32, #tpu.memory_space<vmem>>, vector<1x8x144xf32>
    %129 = vector.shape_cast %128 : vector<1x8x144xf32> to vector<8x144xf32>
    %130 = vector.shape_cast %127 : vector<8x144xf32> to vector<1x8x144xf32>
    tpu.vector_store %arg14[%c5_108, %c0_109, %c0_110], %130 {strides = array<i32>} : memref<12x8x144xf32, #tpu.memory_space<vmem>>, vector<1x8x144xf32>,
    %c12 = arith.constant 12 : index
    %c0_111 = arith.constant 0 : index
    %c0_112 = arith.constant 0 : index
    %131 = vector.load %arg13[%c12, %c0_111, %c0_112] : memref<24x8x144xf32, #tpu.memory_space<vmem>>, vector<1x8x144xf32>
    %132 = vector.shape_cast %131 : vector<1x8x144xf32> to vector<8x144xf32>
    %c13 = arith.constant 13 : index
    %c0_113 = arith.constant 0 : index
    %c0_114 = arith.constant 0 : index
    %133 = vector.load %arg13[%c13, %c0_113, %c0_114] : memref<24x8x144xf32, #tpu.memory_space<vmem>>, vector<1x8x144xf32>
    %134 = vector.shape_cast %133 : vector<1x8x144xf32> to vector<8x144xf32>
    %135 = arith.maximumf %132, %134 : vector<8x144xf32>
    %cst_115 = arith.constant 0.000000e+00 : f32
    %136 = vector.broadcast %cst_115 : f32 to vector<8x144xf32>
    %137 = arith.maximumf %135, %136 : vector<8x144xf32>
    %138 = vector.extract_strided_slice %137 {offsets = [0, 6], sizes = [8, 138], strides = [1, 1]} : vector<8x144xf32> to vector<8x138xf32>
    %139 = vector.extract_strided_slice %137 {offsets = [0, 0], sizes = [8, 6], strides = [1, 1]} : vector<8x144xf32> to vector<8x6xf32>
    %140 = tpu.concatenate %138, %139 in 1 : vector<8x138xf32>, vector<8x6xf32> -> vector<8x144xf32>
    %141 = arith.maximumf %137, %140 : vector<8x144xf32>
    %c6_116 = arith.constant 6 : index
    %c0_117 = arith.constant 0 : index
    %c0_118 = arith.constant 0 : index
    %142 = vector.load %arg14[%c6_116, %c0_117, %c0_118] : memref<12x8x144xf32, #tpu.memory_space<vmem>>, vector<1x8x144xf32>
    %143 = vector.shape_cast %142 : vector<1x8x144xf32> to vector<8x144xf32>
    %144 = vector.shape_cast %141 : vector<8x144xf32> to vector<1x8x144xf32>
    tpu.vector_store %arg14[%c6_116, %c0_117, %c0_118], %144 {strides = array<i32>} : memref<12x8x144xf32, #tpu.memory_space<vmem>>, vector<1x8x144xf32>,
    %c14 = arith.constant 14 : index
    %c0_119 = arith.constant 0 : index
    %c0_120 = arith.constant 0 : index
    %145 = vector.load %arg13[%c14, %c0_119, %c0_120] : memref<24x8x144xf32, #tpu.memory_space<vmem>>, vector<1x8x144xf32>
    %146 = vector.shape_cast %145 : vector<1x8x144xf32> to vector<8x144xf32>
    %c15 = arith.constant 15 : index
    %c0_121 = arith.constant 0 : index
    %c0_122 = arith.constant 0 : index
    %147 = vector.load %arg13[%c15, %c0_121, %c0_122] : memref<24x8x144xf32, #tpu.memory_space<vmem>>, vector<1x8x144xf32>
    %148 = vector.shape_cast %147 : vector<1x8x144xf32> to vector<8x144xf32>
    %149 = arith.maximumf %146, %148 : vector<8x144xf32>
    %cst_123 = arith.constant 0.000000e+00 : f32
    %150 = vector.broadcast %cst_123 : f32 to vector<8x144xf32>
    %151 = arith.maximumf %149, %150 : vector<8x144xf32>
    %152 = vector.extract_strided_slice %151 {offsets = [0, 6], sizes = [8, 138], strides = [1, 1]} : vector<8x144xf32> to vector<8x138xf32>
    %153 = vector.extract_strided_slice %151 {offsets = [0, 0], sizes = [8, 6], strides = [1, 1]} : vector<8x144xf32> to vector<8x6xf32>
    %154 = tpu.concatenate %152, %153 in 1 : vector<8x138xf32>, vector<8x6xf32> -> vector<8x144xf32>
    %155 = arith.maximumf %151, %154 : vector<8x144xf32>
    %c7_124 = arith.constant 7 : index
    %c0_125 = arith.constant 0 : index
    %c0_126 = arith.constant 0 : index
    %156 = vector.load %arg14[%c7_124, %c0_125, %c0_126] : memref<12x8x144xf32, #tpu.memory_space<vmem>>, vector<1x8x144xf32>
    %157 = vector.shape_cast %156 : vector<1x8x144xf32> to vector<8x144xf32>
    %158 = vector.shape_cast %155 : vector<8x144xf32> to vector<1x8x144xf32>
    tpu.vector_store %arg14[%c7_124, %c0_125, %c0_126], %158 {strides = array<i32>} : memref<12x8x144xf32, #tpu.memory_space<vmem>>, vector<1x8x144xf32>,
    %c16 = arith.constant 16 : index
    %c0_127 = arith.constant 0 : index
    %c0_128 = arith.constant 0 : index
    %159 = vector.load %arg13[%c16, %c0_127, %c0_128] : memref<24x8x144xf32, #tpu.memory_space<vmem>>, vector<1x8x144xf32>
    %160 = vector.shape_cast %159 : vector<1x8x144xf32> to vector<8x144xf32>
    %c17 = arith.constant 17 : index
    %c0_129 = arith.constant 0 : index
    %c0_130 = arith.constant 0 : index
    %161 = vector.load %arg13[%c17, %c0_129, %c0_130] : memref<24x8x144xf32, #tpu.memory_space<vmem>>, vector<1x8x144xf32>
    %162 = vector.shape_cast %161 : vector<1x8x144xf32> to vector<8x144xf32>
    %163 = arith.maximumf %160, %162 : vector<8x144xf32>
    %cst_131 = arith.constant 0.000000e+00 : f32
    %164 = vector.broadcast %cst_131 : f32 to vector<8x144xf32>
    %165 = arith.maximumf %163, %164 : vector<8x144xf32>
    %166 = vector.extract_strided_slice %165 {offsets = [0, 6], sizes = [8, 138], strides = [1, 1]} : vector<8x144xf32> to vector<8x138xf32>
    %167 = vector.extract_strided_slice %165 {offsets = [0, 0], sizes = [8, 6], strides = [1, 1]} : vector<8x144xf32> to vector<8x6xf32>
    %168 = tpu.concatenate %166, %167 in 1 : vector<8x138xf32>, vector<8x6xf32> -> vector<8x144xf32>
    %169 = arith.maximumf %165, %168 : vector<8x144xf32>
    %c8_132 = arith.constant 8 : index
    %c0_133 = arith.constant 0 : index
    %c0_134 = arith.constant 0 : index
    %170 = vector.load %arg14[%c8_132, %c0_133, %c0_134] : memref<12x8x144xf32, #tpu.memory_space<vmem>>, vector<1x8x144xf32>
    %171 = vector.shape_cast %170 : vector<1x8x144xf32> to vector<8x144xf32>
    %172 = vector.shape_cast %169 : vector<8x144xf32> to vector<1x8x144xf32>
    tpu.vector_store %arg14[%c8_132, %c0_133, %c0_134], %172 {strides = array<i32>} : memref<12x8x144xf32, #tpu.memory_space<vmem>>, vector<1x8x144xf32>,
    %c18 = arith.constant 18 : index
    %c0_135 = arith.constant 0 : index
    %c0_136 = arith.constant 0 : index
    %173 = vector.load %arg13[%c18, %c0_135, %c0_136] : memref<24x8x144xf32, #tpu.memory_space<vmem>>, vector<1x8x144xf32>
    %174 = vector.shape_cast %173 : vector<1x8x144xf32> to vector<8x144xf32>
    %c19 = arith.constant 19 : index
    %c0_137 = arith.constant 0 : index
    %c0_138 = arith.constant 0 : index
    %175 = vector.load %arg13[%c19, %c0_137, %c0_138] : memref<24x8x144xf32, #tpu.memory_space<vmem>>, vector<1x8x144xf32>
    %176 = vector.shape_cast %175 : vector<1x8x144xf32> to vector<8x144xf32>
    %177 = arith.maximumf %174, %176 : vector<8x144xf32>
    %cst_139 = arith.constant 0.000000e+00 : f32
    %178 = vector.broadcast %cst_139 : f32 to vector<8x144xf32>
    %179 = arith.maximumf %177, %178 : vector<8x144xf32>
    %180 = vector.extract_strided_slice %179 {offsets = [0, 6], sizes = [8, 138], strides = [1, 1]} : vector<8x144xf32> to vector<8x138xf32>
    %181 = vector.extract_strided_slice %179 {offsets = [0, 0], sizes = [8, 6], strides = [1, 1]} : vector<8x144xf32> to vector<8x6xf32>
    %182 = tpu.concatenate %180, %181 in 1 : vector<8x138xf32>, vector<8x6xf32> -> vector<8x144xf32>
    %183 = arith.maximumf %179, %182 : vector<8x144xf32>
    %c9_140 = arith.constant 9 : index
    %c0_141 = arith.constant 0 : index
    %c0_142 = arith.constant 0 : index
    %184 = vector.load %arg14[%c9_140, %c0_141, %c0_142] : memref<12x8x144xf32, #tpu.memory_space<vmem>>, vector<1x8x144xf32>
    %185 = vector.shape_cast %184 : vector<1x8x144xf32> to vector<8x144xf32>
    %186 = vector.shape_cast %183 : vector<8x144xf32> to vector<1x8x144xf32>
    tpu.vector_store %arg14[%c9_140, %c0_141, %c0_142], %186 {strides = array<i32>} : memref<12x8x144xf32, #tpu.memory_space<vmem>>, vector<1x8x144xf32>,
    %c20 = arith.constant 20 : index
    %c0_143 = arith.constant 0 : index
    %c0_144 = arith.constant 0 : index
    %187 = vector.load %arg13[%c20, %c0_143, %c0_144] : memref<24x8x144xf32, #tpu.memory_space<vmem>>, vector<1x8x144xf32>
    %188 = vector.shape_cast %187 : vector<1x8x144xf32> to vector<8x144xf32>
    %c21 = arith.constant 21 : index
    %c0_145 = arith.constant 0 : index
    %c0_146 = arith.constant 0 : index
    %189 = vector.load %arg13[%c21, %c0_145, %c0_146] : memref<24x8x144xf32, #tpu.memory_space<vmem>>, vector<1x8x144xf32>
    %190 = vector.shape_cast %189 : vector<1x8x144xf32> to vector<8x144xf32>
    %191 = arith.maximumf %188, %190 : vector<8x144xf32>
    %cst_147 = arith.constant 0.000000e+00 : f32
    %192 = vector.broadcast %cst_147 : f32 to vector<8x144xf32>
    %193 = arith.maximumf %191, %192 : vector<8x144xf32>
    %194 = vector.extract_strided_slice %193 {offsets = [0, 6], sizes = [8, 138], strides = [1, 1]} : vector<8x144xf32> to vector<8x138xf32>
    %195 = vector.extract_strided_slice %193 {offsets = [0, 0], sizes = [8, 6], strides = [1, 1]} : vector<8x144xf32> to vector<8x6xf32>
    %196 = tpu.concatenate %194, %195 in 1 : vector<8x138xf32>, vector<8x6xf32> -> vector<8x144xf32>
    %197 = arith.maximumf %193, %196 : vector<8x144xf32>
    %c10_148 = arith.constant 10 : index
    %c0_149 = arith.constant 0 : index
    %c0_150 = arith.constant 0 : index
    %198 = vector.load %arg14[%c10_148, %c0_149, %c0_150] : memref<12x8x144xf32, #tpu.memory_space<vmem>>, vector<1x8x144xf32>
    %199 = vector.shape_cast %198 : vector<1x8x144xf32> to vector<8x144xf32>
    %200 = vector.shape_cast %197 : vector<8x144xf32> to vector<1x8x144xf32>
    tpu.vector_store %arg14[%c10_148, %c0_149, %c0_150], %200 {strides = array<i32>} : memref<12x8x144xf32, #tpu.memory_space<vmem>>, vector<1x8x144xf32>,
    %c22 = arith.constant 22 : index
    %c0_151 = arith.constant 0 : index
    %c0_152 = arith.constant 0 : index
    %201 = vector.load %arg13[%c22, %c0_151, %c0_152] : memref<24x8x144xf32, #tpu.memory_space<vmem>>, vector<1x8x144xf32>
    %202 = vector.shape_cast %201 : vector<1x8x144xf32> to vector<8x144xf32>
    %c23 = arith.constant 23 : index
    %c0_153 = arith.constant 0 : index
    %c0_154 = arith.constant 0 : index
    %203 = vector.load %arg13[%c23, %c0_153, %c0_154] : memref<24x8x144xf32, #tpu.memory_space<vmem>>, vector<1x8x144xf32>
    %204 = vector.shape_cast %203 : vector<1x8x144xf32> to vector<8x144xf32>
    %205 = arith.maximumf %202, %204 : vector<8x144xf32>
    %cst_155 = arith.constant 0.000000e+00 : f32
    %206 = vector.broadcast %cst_155 : f32 to vector<8x144xf32>
    %207 = arith.maximumf %205, %206 : vector<8x144xf32>
    %208 = vector.extract_strided_slice %207 {offsets = [0, 6], sizes = [8, 138], strides = [1, 1]} : vector<8x144xf32> to vector<8x138xf32>
    %209 = vector.extract_strided_slice %207 {offsets = [0, 0], sizes = [8, 6], strides = [1, 1]} : vector<8x144xf32> to vector<8x6xf32>
    %210 = tpu.concatenate %208, %209 in 1 : vector<8x138xf32>, vector<8x6xf32> -> vector<8x144xf32>
    %211 = arith.maximumf %207, %210 : vector<8x144xf32>
    %c11_156 = arith.constant 11 : index
    %c0_157 = arith.constant 0 : index
    %c0_158 = arith.constant 0 : index
    %212 = vector.load %arg14[%c11_156, %c0_157, %c0_158] : memref<12x8x144xf32, #tpu.memory_space<vmem>>, vector<1x8x144xf32>
    %213 = vector.shape_cast %212 : vector<1x8x144xf32> to vector<8x144xf32>
    %214 = vector.shape_cast %211 : vector<8x144xf32> to vector<1x8x144xf32>
    tpu.vector_store %arg14[%c11_156, %c0_157, %c0_158], %214 {strides = array<i32>} : memref<12x8x144xf32, #tpu.memory_space<vmem>>, vector<1x8x144xf32>,
    %c0_159 = arith.constant 0 : index
    %c0_160 = arith.constant 0 : index
    %c0_161 = arith.constant 0 : index
    %215 = vector.load %arg14[%c0_159, %c0_160, %c0_161] : memref<12x8x144xf32, #tpu.memory_space<vmem>>, vector<8x8x144xf32>
    %216 = vector.shape_cast %215 : vector<8x8x144xf32> to vector<64x144xf32>
    %c0_162 = arith.constant 0 : index
    %c0_163 = arith.constant 0 : index
    %c0_164 = arith.constant 0 : index
    %217 = vector.load %arg4[%c0_162, %c0_163, %c0_164] : memref<5x144x128xf32, #tpu.memory_space<vmem>>, vector<1x144x128xf32>
    %218 = vector.shape_cast %217 : vector<1x144x128xf32> to vector<144x128xf32>
    %cst_165 = arith.constant dense<0.000000e+00> : vector<64x128xf32>
    %219 = tpu.matmul %216, %218, %cst_165 {dimension_numbers = #tpu.dot_dimension_numbers<[1], [0], [0], [1], [0, 0, 1, 1], [], []>} : vector<64x144xf32>, vector<144x128xf32>, vector<64x128xf32> -> vector<64x128xf32>
    %220 = vector.shape_cast %219 : vector<64x128xf32> to vector<8x8x128xf32>
    %c0_166 = arith.constant 0 : index
    %c0_167 = arith.constant 0 : index
    %221 = vector.load %arg5[%c0_166, %c0_167] : memref<1x128xf32, #tpu.memory_space<vmem>>, vector<1x128xf32>
    %222 = vector.shape_cast %221 : vector<1x128xf32> to vector<1x1x128xf32>
    %223 = vector.broadcast %222 : vector<1x1x128xf32> to vector<8x8x128xf32>
    %224 = arith.addf %220, %223 : vector<8x8x128xf32>
    %c0_168 = arith.constant 0 : index
    %c0_169 = arith.constant 0 : index
    %c0_170 = arith.constant 0 : index
    %225 = vector.load %arg15[%c0_168, %c0_169, %c0_170] : memref<8x8x128xf32, #tpu.memory_space<vmem>>, vector<8x8x128xf32>
    tpu.vector_store %arg15[%c0_168, %c0_169, %c0_170], %224 {strides = array<i32>} : memref<8x8x128xf32, #tpu.memory_space<vmem>>, vector<8x8x128xf32>,
    %c0_171 = arith.constant 0 : index
    %c0_172 = arith.constant 0 : index
    %c0_173 = arith.constant 0 : index
    %226 = vector.load %arg15[%c0_171, %c0_172, %c0_173] : memref<8x8x128xf32, #tpu.memory_space<vmem>>, vector<8x8x128xf32>
    %c1_174 = arith.constant 1 : index
    %c0_175 = arith.constant 0 : index
    %c0_176 = arith.constant 0 : index
    %227 = vector.load %arg14[%c1_174, %c0_175, %c0_176] : memref<12x8x144xf32, #tpu.memory_space<vmem>>, vector<8x8x144xf32>
    %228 = vector.shape_cast %227 : vector<8x8x144xf32> to vector<64x144xf32>
    %c1_177 = arith.constant 1 : index
    %c0_178 = arith.constant 0 : index
    %c0_179 = arith.constant 0 : index
    %229 = vector.load %arg4[%c1_177, %c0_178, %c0_179] : memref<5x144x128xf32, #tpu.memory_space<vmem>>, vector<1x144x128xf32>
    %230 = vector.shape_cast %229 : vector<1x144x128xf32> to vector<144x128xf32>
    %cst_180 = arith.constant dense<0.000000e+00> : vector<64x128xf32>
    %231 = tpu.matmul %228, %230, %cst_180 {dimension_numbers = #tpu.dot_dimension_numbers<[1], [0], [0], [1], [0, 0, 1, 1], [], []>} : vector<64x144xf32>, vector<144x128xf32>, vector<64x128xf32> -> vector<64x128xf32>
    %232 = vector.shape_cast %231 : vector<64x128xf32> to vector<8x8x128xf32>
    %233 = arith.addf %226, %232 : vector<8x8x128xf32>
    %c0_181 = arith.constant 0 : index
    %c0_182 = arith.constant 0 : index
    %c0_183 = arith.constant 0 : index
    %234 = vector.load %arg15[%c0_181, %c0_182, %c0_183] : memref<8x8x128xf32, #tpu.memory_space<vmem>>, vector<8x8x128xf32>
    tpu.vector_store %arg15[%c0_181, %c0_182, %c0_183], %233 {strides = array<i32>} : memref<8x8x128xf32, #tpu.memory_space<vmem>>, vector<8x8x128xf32>,
    %c0_184 = arith.constant 0 : index
    %c0_185 = arith.constant 0 : index
    %c0_186 = arith.constant 0 : index
    %235 = vector.load %arg15[%c0_184, %c0_185, %c0_186] : memref<8x8x128xf32, #tpu.memory_space<vmem>>, vector<8x8x128xf32>
    %c2_187 = arith.constant 2 : index
    %c0_188 = arith.constant 0 : index
    %c0_189 = arith.constant 0 : index
    %236 = vector.load %arg14[%c2_187, %c0_188, %c0_189] : memref<12x8x144xf32, #tpu.memory_space<vmem>>, vector<8x8x144xf32>
    %237 = vector.shape_cast %236 : vector<8x8x144xf32> to vector<64x144xf32>
    %c2_190 = arith.constant 2 : index
    %c0_191 = arith.constant 0 : index
    %c0_192 = arith.constant 0 : index
    %238 = vector.load %arg4[%c2_190, %c0_191, %c0_192] : memref<5x144x128xf32, #tpu.memory_space<vmem>>, vector<1x144x128xf32>
    %239 = vector.shape_cast %238 : vector<1x144x128xf32> to vector<144x128xf32>
    %cst_193 = arith.constant dense<0.000000e+00> : vector<64x128xf32>
    %240 = tpu.matmul %237, %239, %cst_193 {dimension_numbers = #tpu.dot_dimension_numbers<[1], [0], [0], [1], [0, 0, 1, 1], [], []>} : vector<64x144xf32>, vector<144x128xf32>, vector<64x128xf32> -> vector<64x128xf32>
    %241 = vector.shape_cast %240 : vector<64x128xf32> to vector<8x8x128xf32>
    %242 = arith.addf %235, %241 : vector<8x8x128xf32>
    %c0_194 = arith.constant 0 : index
    %c0_195 = arith.constant 0 : index
    %c0_196 = arith.constant 0 : index
    %243 = vector.load %arg15[%c0_194, %c0_195, %c0_196] : memref<8x8x128xf32, #tpu.memory_space<vmem>>, vector<8x8x128xf32>
    tpu.vector_store %arg15[%c0_194, %c0_195, %c0_196], %242 {strides = array<i32>} : memref<8x8x128xf32, #tpu.memory_space<vmem>>, vector<8x8x128xf32>,
    %c0_197 = arith.constant 0 : index
    %c0_198 = arith.constant 0 : index
    %c0_199 = arith.constant 0 : index
    %244 = vector.load %arg15[%c0_197, %c0_198, %c0_199] : memref<8x8x128xf32, #tpu.memory_space<vmem>>, vector<8x8x128xf32>
    %c3_200 = arith.constant 3 : index
    %c0_201 = arith.constant 0 : index
    %c0_202 = arith.constant 0 : index
    %245 = vector.load %arg14[%c3_200, %c0_201, %c0_202] : memref<12x8x144xf32, #tpu.memory_space<vmem>>, vector<8x8x144xf32>
    %246 = vector.shape_cast %245 : vector<8x8x144xf32> to vector<64x144xf32>
    %c3_203 = arith.constant 3 : index
    %c0_204 = arith.constant 0 : index
    %c0_205 = arith.constant 0 : index
    %247 = vector.load %arg4[%c3_203, %c0_204, %c0_205] : memref<5x144x128xf32, #tpu.memory_space<vmem>>, vector<1x144x128xf32>
    %248 = vector.shape_cast %247 : vector<1x144x128xf32> to vector<144x128xf32>
    %cst_206 = arith.constant dense<0.000000e+00> : vector<64x128xf32>
    %249 = tpu.matmul %246, %248, %cst_206 {dimension_numbers = #tpu.dot_dimension_numbers<[1], [0], [0], [1], [0, 0, 1, 1], [], []>} : vector<64x144xf32>, vector<144x128xf32>, vector<64x128xf32> -> vector<64x128xf32>
    %250 = vector.shape_cast %249 : vector<64x128xf32> to vector<8x8x128xf32>
    %251 = arith.addf %244, %250 : vector<8x8x128xf32>
    %c0_207 = arith.constant 0 : index
    %c0_208 = arith.constant 0 : index
    %c0_209 = arith.constant 0 : index
    %252 = vector.load %arg15[%c0_207, %c0_208, %c0_209] : memref<8x8x128xf32, #tpu.memory_space<vmem>>, vector<8x8x128xf32>
    tpu.vector_store %arg15[%c0_207, %c0_208, %c0_209], %251 {strides = array<i32>} : memref<8x8x128xf32, #tpu.memory_space<vmem>>, vector<8x8x128xf32>,
    %c0_210 = arith.constant 0 : index
    %c0_211 = arith.constant 0 : index
    %c0_212 = arith.constant 0 : index
    %253 = vector.load %arg15[%c0_210, %c0_211, %c0_212] : memref<8x8x128xf32, #tpu.memory_space<vmem>>, vector<8x8x128xf32>
    %c4_213 = arith.constant 4 : index
    %c0_214 = arith.constant 0 : index
    %c0_215 = arith.constant 0 : index
    %254 = vector.load %arg14[%c4_213, %c0_214, %c0_215] : memref<12x8x144xf32, #tpu.memory_space<vmem>>, vector<8x8x144xf32>
    %255 = vector.shape_cast %254 : vector<8x8x144xf32> to vector<64x144xf32>
    %c4_216 = arith.constant 4 : index
    %c0_217 = arith.constant 0 : index
    %c0_218 = arith.constant 0 : index
    %256 = vector.load %arg4[%c4_216, %c0_217, %c0_218] : memref<5x144x128xf32, #tpu.memory_space<vmem>>, vector<1x144x128xf32>
    %257 = vector.shape_cast %256 : vector<1x144x128xf32> to vector<144x128xf32>
    %cst_219 = arith.constant dense<0.000000e+00> : vector<64x128xf32>
    %258 = tpu.matmul %255, %257, %cst_219 {dimension_numbers = #tpu.dot_dimension_numbers<[1], [0], [0], [1], [0, 0, 1, 1], [], []>} : vector<64x144xf32>, vector<144x128xf32>, vector<64x128xf32> -> vector<64x128xf32>
    %259 = vector.shape_cast %258 : vector<64x128xf32> to vector<8x8x128xf32>
    %260 = arith.addf %253, %259 : vector<8x8x128xf32>
    %c0_220 = arith.constant 0 : index
    %c0_221 = arith.constant 0 : index
    %c0_222 = arith.constant 0 : index
    %261 = vector.load %arg15[%c0_220, %c0_221, %c0_222] : memref<8x8x128xf32, #tpu.memory_space<vmem>>, vector<8x8x128xf32>
    tpu.vector_store %arg15[%c0_220, %c0_221, %c0_222], %260 {strides = array<i32>} : memref<8x8x128xf32, #tpu.memory_space<vmem>>, vector<8x8x128xf32>,
    %c0_223 = arith.constant 0 : index
    %c0_224 = arith.constant 0 : index
    %c0_225 = arith.constant 0 : index
    %262 = vector.load %arg15[%c0_223, %c0_224, %c0_225] : memref<8x8x128xf32, #tpu.memory_space<vmem>>, vector<1x8x128xf32>
    %263 = vector.shape_cast %262 : vector<1x8x128xf32> to vector<8x128xf32>
    %c1_226 = arith.constant 1 : index
    %c0_227 = arith.constant 0 : index
    %c0_228 = arith.constant 0 : index
    %264 = vector.load %arg15[%c1_226, %c0_227, %c0_228] : memref<8x8x128xf32, #tpu.memory_space<vmem>>, vector<1x8x128xf32>
    %265 = vector.shape_cast %264 : vector<1x8x128xf32> to vector<8x128xf32>
    %266 = arith.maximumf %263, %265 : vector<8x128xf32>
    %cst_229 = arith.constant 0.000000e+00 : f32
    %267 = vector.broadcast %cst_229 : f32 to vector<8x128xf32>
    %268 = arith.maximumf %266, %267 : vector<8x128xf32>
    %269 = vector.extract_strided_slice %268 {offsets = [0, 16], sizes = [8, 112], strides = [1, 1]} : vector<8x128xf32> to vector<8x112xf32>
    %270 = vector.extract_strided_slice %268 {offsets = [0, 0], sizes = [8, 16], strides = [1, 1]} : vector<8x128xf32> to vector<8x16xf32>
    %271 = tpu.concatenate %269, %270 in 1 : vector<8x112xf32>, vector<8x16xf32> -> vector<8x128xf32>
    %272 = arith.maximumf %268, %271 : vector<8x128xf32>
    %c0_230 = arith.constant 0 : index
    %c0_231 = arith.constant 0 : index
    %c0_232 = arith.constant 0 : index
    %273 = vector.load %arg16[%c0_230, %c0_231, %c0_232] : memref<4x8x128xf32, #tpu.memory_space<vmem>>, vector<1x8x128xf32>
    %274 = vector.shape_cast %273 : vector<1x8x128xf32> to vector<8x128xf32>
    %275 = vector.shape_cast %272 : vector<8x128xf32> to vector<1x8x128xf32>
    tpu.vector_store %arg16[%c0_230, %c0_231, %c0_232], %275 {strides = array<i32>} : memref<4x8x128xf32, #tpu.memory_space<vmem>>, vector<1x8x128xf32>,
    %c2_233 = arith.constant 2 : index
    %c0_234 = arith.constant 0 : index
    %c0_235 = arith.constant 0 : index
    %276 = vector.load %arg15[%c2_233, %c0_234, %c0_235] : memref<8x8x128xf32, #tpu.memory_space<vmem>>, vector<1x8x128xf32>
    %277 = vector.shape_cast %276 : vector<1x8x128xf32> to vector<8x128xf32>
    %c3_236 = arith.constant 3 : index
    %c0_237 = arith.constant 0 : index
    %c0_238 = arith.constant 0 : index
    %278 = vector.load %arg15[%c3_236, %c0_237, %c0_238] : memref<8x8x128xf32, #tpu.memory_space<vmem>>, vector<1x8x128xf32>
    %279 = vector.shape_cast %278 : vector<1x8x128xf32> to vector<8x128xf32>
    %280 = arith.maximumf %277, %279 : vector<8x128xf32>
    %cst_239 = arith.constant 0.000000e+00 : f32
    %281 = vector.broadcast %cst_239 : f32 to vector<8x128xf32>
    %282 = arith.maximumf %280, %281 : vector<8x128xf32>
    %283 = vector.extract_strided_slice %282 {offsets = [0, 16], sizes = [8, 112], strides = [1, 1]} : vector<8x128xf32> to vector<8x112xf32>
    %284 = vector.extract_strided_slice %282 {offsets = [0, 0], sizes = [8, 16], strides = [1, 1]} : vector<8x128xf32> to vector<8x16xf32>
    %285 = tpu.concatenate %283, %284 in 1 : vector<8x112xf32>, vector<8x16xf32> -> vector<8x128xf32>
    %286 = arith.maximumf %282, %285 : vector<8x128xf32>
    %c1_240 = arith.constant 1 : index
    %c0_241 = arith.constant 0 : index
    %c0_242 = arith.constant 0 : index
    %287 = vector.load %arg16[%c1_240, %c0_241, %c0_242] : memref<4x8x128xf32, #tpu.memory_space<vmem>>, vector<1x8x128xf32>
    %288 = vector.shape_cast %287 : vector<1x8x128xf32> to vector<8x128xf32>
    %289 = vector.shape_cast %286 : vector<8x128xf32> to vector<1x8x128xf32>
    tpu.vector_store %arg16[%c1_240, %c0_241, %c0_242], %289 {strides = array<i32>} : memref<4x8x128xf32, #tpu.memory_space<vmem>>, vector<1x8x128xf32>,
    %c4_243 = arith.constant 4 : index
    %c0_244 = arith.constant 0 : index
    %c0_245 = arith.constant 0 : index
    %290 = vector.load %arg15[%c4_243, %c0_244, %c0_245] : memref<8x8x128xf32, #tpu.memory_space<vmem>>, vector<1x8x128xf32>
    %291 = vector.shape_cast %290 : vector<1x8x128xf32> to vector<8x128xf32>
    %c5_246 = arith.constant 5 : index
    %c0_247 = arith.constant 0 : index
    %c0_248 = arith.constant 0 : index
    %292 = vector.load %arg15[%c5_246, %c0_247, %c0_248] : memref<8x8x128xf32, #tpu.memory_space<vmem>>, vector<1x8x128xf32>
    %293 = vector.shape_cast %292 : vector<1x8x128xf32> to vector<8x128xf32>
    %294 = arith.maximumf %291, %293 : vector<8x128xf32>
    %cst_249 = arith.constant 0.000000e+00 : f32
    %295 = vector.broadcast %cst_249 : f32 to vector<8x128xf32>
    %296 = arith.maximumf %294, %295 : vector<8x128xf32>
    %297 = vector.extract_strided_slice %296 {offsets = [0, 16], sizes = [8, 112], strides = [1, 1]} : vector<8x128xf32> to vector<8x112xf32>
    %298 = vector.extract_strided_slice %296 {offsets = [0, 0], sizes = [8, 16], strides = [1, 1]} : vector<8x128xf32> to vector<8x16xf32>
    %299 = tpu.concatenate %297, %298 in 1 : vector<8x112xf32>, vector<8x16xf32> -> vector<8x128xf32>
    %300 = arith.maximumf %296, %299 : vector<8x128xf32>
    %c2_250 = arith.constant 2 : index
    %c0_251 = arith.constant 0 : index
    %c0_252 = arith.constant 0 : index
    %301 = vector.load %arg16[%c2_250, %c0_251, %c0_252] : memref<4x8x128xf32, #tpu.memory_space<vmem>>, vector<1x8x128xf32>
    %302 = vector.shape_cast %301 : vector<1x8x128xf32> to vector<8x128xf32>
    %303 = vector.shape_cast %300 : vector<8x128xf32> to vector<1x8x128xf32>
    tpu.vector_store %arg16[%c2_250, %c0_251, %c0_252], %303 {strides = array<i32>} : memref<4x8x128xf32, #tpu.memory_space<vmem>>, vector<1x8x128xf32>,
    %c6_253 = arith.constant 6 : index
    %c0_254 = arith.constant 0 : index
    %c0_255 = arith.constant 0 : index
    %304 = vector.load %arg15[%c6_253, %c0_254, %c0_255] : memref<8x8x128xf32, #tpu.memory_space<vmem>>, vector<1x8x128xf32>
    %305 = vector.shape_cast %304 : vector<1x8x128xf32> to vector<8x128xf32>
    %c7_256 = arith.constant 7 : index
    %c0_257 = arith.constant 0 : index
    %c0_258 = arith.constant 0 : index
    %306 = vector.load %arg15[%c7_256, %c0_257, %c0_258] : memref<8x8x128xf32, #tpu.memory_space<vmem>>, vector<1x8x128xf32>
    %307 = vector.shape_cast %306 : vector<1x8x128xf32> to vector<8x128xf32>
    %308 = arith.maximumf %305, %307 : vector<8x128xf32>
    %cst_259 = arith.constant 0.000000e+00 : f32
    %309 = vector.broadcast %cst_259 : f32 to vector<8x128xf32>
    %310 = arith.maximumf %308, %309 : vector<8x128xf32>
    %311 = vector.extract_strided_slice %310 {offsets = [0, 16], sizes = [8, 112], strides = [1, 1]} : vector<8x128xf32> to vector<8x112xf32>
    %312 = vector.extract_strided_slice %310 {offsets = [0, 0], sizes = [8, 16], strides = [1, 1]} : vector<8x128xf32> to vector<8x16xf32>
    %313 = tpu.concatenate %311, %312 in 1 : vector<8x112xf32>, vector<8x16xf32> -> vector<8x128xf32>
    %314 = arith.maximumf %310, %313 : vector<8x128xf32>
    %c3_260 = arith.constant 3 : index
    %c0_261 = arith.constant 0 : index
    %c0_262 = arith.constant 0 : index
    %315 = vector.load %arg16[%c3_260, %c0_261, %c0_262] : memref<4x8x128xf32, #tpu.memory_space<vmem>>, vector<1x8x128xf32>
    %316 = vector.shape_cast %315 : vector<1x8x128xf32> to vector<8x128xf32>
    %317 = vector.shape_cast %314 : vector<8x128xf32> to vector<1x8x128xf32>
    tpu.vector_store %arg16[%c3_260, %c0_261, %c0_262], %317 {strides = array<i32>} : memref<4x8x128xf32, #tpu.memory_space<vmem>>, vector<1x8x128xf32>,
    %c0_263 = arith.constant 0 : index
    %c0_264 = arith.constant 0 : index
    %c0_265 = arith.constant 0 : index
    %318 = vector.load %arg16[%c0_263, %c0_264, %c0_265] : memref<4x8x128xf32, #tpu.memory_space<vmem>>, vector<1x8x128xf32>
    %319 = vector.shape_cast %318 : vector<1x8x128xf32> to vector<8x128xf32>
    %c1_266 = arith.constant 1 : index
    %c0_267 = arith.constant 0 : index
    %c0_268 = arith.constant 0 : index
    %320 = vector.load %arg16[%c1_266, %c0_267, %c0_268] : memref<4x8x128xf32, #tpu.memory_space<vmem>>, vector<1x8x128xf32>
    %321 = vector.shape_cast %320 : vector<1x8x128xf32> to vector<8x128xf32>
    %c2_269 = arith.constant 2 : index
    %c0_270 = arith.constant 0 : index
    %c0_271 = arith.constant 0 : index
    %322 = vector.load %arg16[%c2_269, %c0_270, %c0_271] : memref<4x8x128xf32, #tpu.memory_space<vmem>>, vector<1x8x128xf32>
    %323 = vector.shape_cast %322 : vector<1x8x128xf32> to vector<8x128xf32>
    %c3_272 = arith.constant 3 : index
    %c0_273 = arith.constant 0 : index
    %c0_274 = arith.constant 0 : index
    %324 = vector.load %arg16[%c3_272, %c0_273, %c0_274] : memref<4x8x128xf32, #tpu.memory_space<vmem>>, vector<1x8x128xf32>
    %325 = vector.shape_cast %324 : vector<1x8x128xf32> to vector<8x128xf32>
    %326 = tpu.concatenate %319, %321, %323, %325 in 1 : vector<8x128xf32>, vector<8x128xf32>, vector<8x128xf32>, vector<8x128xf32> -> vector<8x512xf32>
    %c0_275 = arith.constant 0 : index
    %c0_276 = arith.constant 0 : index
    %327 = vector.load %arg6[%c0_275, %c0_276] : memref<512x128xf32, #tpu.memory_space<vmem>>, vector<512x128xf32>
    %cst_277 = arith.constant dense<0.000000e+00> : vector<8x128xf32>
    %328 = tpu.matmul %326, %327, %cst_277 {dimension_numbers = #tpu.dot_dimension_numbers<[1], [0], [0], [1], [0, 0, 1, 1], [], []>} : vector<8x512xf32>, vector<512x128xf32>, vector<8x128xf32> -> vector<8x128xf32>
    %c0_278 = arith.constant 0 : index
    %c0_279 = arith.constant 0 : index
    %329 = vector.load %arg7[%c0_278, %c0_279] : memref<1x128xf32, #tpu.memory_space<vmem>>, vector<1x128xf32>
    %330 = vector.broadcast %329 : vector<1x128xf32> to vector<8x128xf32>
    %331 = arith.addf %328, %330 : vector<8x128xf32>
    %cst_280 = arith.constant 0.000000e+00 : f32
    %332 = vector.broadcast %cst_280 : f32 to vector<8x128xf32>
    %333 = arith.maximumf %331, %332 : vector<8x128xf32>
    %c0_281 = arith.constant 0 : index
    %c0_282 = arith.constant 0 : index
    %334 = vector.load %arg8[%c0_281, %c0_282] : memref<128x128xf32, #tpu.memory_space<vmem>>, vector<128x128xf32>
    %cst_283 = arith.constant dense<0.000000e+00> : vector<8x128xf32>
    %335 = tpu.matmul %333, %334, %cst_283 {dimension_numbers = #tpu.dot_dimension_numbers<[1], [0], [0], [1], [0, 0, 1, 1], [], []>} : vector<8x128xf32>, vector<128x128xf32>, vector<8x128xf32> -> vector<8x128xf32>
    %c0_284 = arith.constant 0 : index
    %c0_285 = arith.constant 0 : index
    %336 = vector.load %arg9[%c0_284, %c0_285] : memref<1x128xf32, #tpu.memory_space<vmem>>, vector<1x128xf32>
    %337 = vector.broadcast %336 : vector<1x128xf32> to vector<8x128xf32>
    %338 = arith.addf %335, %337 : vector<8x128xf32>
    %cst_286 = arith.constant 0.000000e+00 : f32
    %339 = vector.broadcast %cst_286 : f32 to vector<8x128xf32>
    %340 = arith.maximumf %338, %339 : vector<8x128xf32>
    %c0_287 = arith.constant 0 : index
    %c0_288 = arith.constant 0 : index
    %341 = vector.load %arg10[%c0_287, %c0_288] : memref<128x128xf32, #tpu.memory_space<vmem>>, vector<128x128xf32>
    %cst_289 = arith.constant dense<0.000000e+00> : vector<8x128xf32>
    %342 = tpu.matmul %340, %341, %cst_289 {dimension_numbers = #tpu.dot_dimension_numbers<[1], [0], [0], [1], [0, 0, 1, 1], [], []>} : vector<8x128xf32>, vector<128x128xf32>, vector<8x128xf32> -> vector<8x128xf32>
    %c0_290 = arith.constant 0 : index
    %c0_291 = arith.constant 0 : index
    %343 = vector.load %arg11[%c0_290, %c0_291] : memref<1x128xf32, #tpu.memory_space<vmem>>, vector<1x128xf32>
    %344 = vector.broadcast %343 : vector<1x128xf32> to vector<8x128xf32>
    %345 = arith.addf %342, %344 : vector<8x128xf32>
    %c0_292 = arith.constant 0 : index
    %c0_293 = arith.constant 0 : index
    %346 = vector.load %arg12[%c0_292, %c0_293] : memref<8x128xf32, #tpu.memory_space<vmem>>, vector<8x128xf32>
    tpu.vector_store %arg12[%c0_292, %c0_293], %345 {strides = array<i32>} : memref<8x128xf32, #tpu.memory_space<vmem>>, vector<8x128xf32>,
    return
  }
  func.func @transform_0(%arg0: i32) -> (i32, i32, i32) {
    %c0_i32 = arith.constant 0 : i32
    %c0_i32_0 = arith.constant 0 : i32
    %c0_i32_1 = arith.constant 0 : i32
    return %c0_i32, %arg0, %c0_i32_0 : i32, i32, i32
  }
  func.func @transform_1(%arg0: i32) -> (i32, i32, i32) {
    %c0_i32 = arith.constant 0 : i32
    %c0_i32_0 = arith.constant 0 : i32
    %c0_i32_1 = arith.constant 0 : i32
    %c0_i32_2 = arith.constant 0 : i32
    return %c0_i32, %c0_i32_0, %c0_i32_1 : i32, i32, i32
  }
  func.func @transform_2(%arg0: i32) -> (i32, i32) {
    %c0_i32 = arith.constant 0 : i32
    %c0_i32_0 = arith.constant 0 : i32
    %c0_i32_1 = arith.constant 0 : i32
    return %c0_i32, %c0_i32_0 : i32, i32
  }
  func.func @transform_3(%arg0: i32) -> (i32, i32, i32) {
    %c0_i32 = arith.constant 0 : i32
    %c0_i32_0 = arith.constant 0 : i32
    %c0_i32_1 = arith.constant 0 : i32
    %c0_i32_2 = arith.constant 0 : i32
    return %c0_i32, %c0_i32_0, %c0_i32_1 : i32, i32, i32
  }
  func.func @transform_4(%arg0: i32) -> (i32, i32) {
    %c0_i32 = arith.constant 0 : i32
    %c0_i32_0 = arith.constant 0 : i32
    %c0_i32_1 = arith.constant 0 : i32
    return %c0_i32, %c0_i32_0 : i32, i32
  }
  func.func @transform_5(%arg0: i32) -> (i32, i32) {
    %c0_i32 = arith.constant 0 : i32
    %c0_i32_0 = arith.constant 0 : i32
    %c0_i32_1 = arith.constant 0 : i32
    return %c0_i32, %c0_i32_0 : i32, i32
  }
  func.func @transform_6(%arg0: i32) -> (i32, i32) {
    %c0_i32 = arith.constant 0 : i32
    %c0_i32_0 = arith.constant 0 : i32
    %c0_i32_1 = arith.constant 0 : i32
    return %c0_i32, %c0_i32_0 : i32, i32
  }
  func.func @transform_7(%arg0: i32) -> (i32, i32) {
    %c0_i32 = arith.constant 0 : i32
    %c0_i32_0 = arith.constant 0 : i32
    %c0_i32_1 = arith.constant 0 : i32
    return %c0_i32, %c0_i32_0 : i32, i32
  }
  func.func @transform_8(%arg0: i32) -> (i32, i32) {
    %c0_i32 = arith.constant 0 : i32
    %c0_i32_0 = arith.constant 0 : i32
    %c0_i32_1 = arith.constant 0 : i32
    return %c0_i32, %c0_i32_0 : i32, i32
  }
  func.func @transform_9(%arg0: i32) -> (i32, i32) {
    %c0_i32 = arith.constant 0 : i32
    %c0_i32_0 = arith.constant 0 : i32
    %c0_i32_1 = arith.constant 0 : i32
    return %c0_i32, %c0_i32_0 : i32, i32
  }
  func.func @transform_10(%arg0: i32) -> (i32, i32) {
    %c0_i32 = arith.constant 0 : i32
    %c0_i32_0 = arith.constant 0 : i32
    %c0_i32_1 = arith.constant 0 : i32
    return %c0_i32, %c0_i32_0 : i32, i32
  }
  func.func @transform_11(%arg0: i32) -> (i32, i32) {
    %c0_i32 = arith.constant 0 : i32
    %c0_i32_0 = arith.constant 0 : i32
    return %arg0, %c0_i32 : i32, i32
  }
}

</mosaic_0001>

<bundles_post_ra>
// kernel: net_forward.1
= control target key start
LH: loop header
LB: loop body
LE: loop exit
PB: predicated region body
PF: predicated region fallthrough
CT: control target
= control target key end

     0   :  { %16 = vsyncpa [#allocation7], 0  ;;  %s5957_s0 = inlined_call_operand.vmem [shape: f32[28,8,28], index: 0, kind: input, shape index: {}]   ;;  %s5958_s1 = inlined_call_operand.vmem [shape: f32[5,28,144], index: 1, kind: input, shape index: {}]   ;;  %s5959_s2 = inlined_call_operand.vmem [shape: f32[1,144], index: 2, kind: input, shape index: {}]   ;;  %s5960_s3 = inlined_call_operand.hbm [shape: f32[5,144,128], index: 3, kind: input, shape index: {}]   ;;  %s5961_s4 = inlined_call_operand.vmem [shape: f32[1,128], index: 4, kind: input, shape index: {}]   ;;  %s5962_s5 = inlined_call_operand.hbm [shape: f32[512,128], index: 5, kind: input, shape index: {}]   ;;  %s5963_s6 = inlined_call_operand.vmem [shape: f32[1,128], index: 6, kind: input, shape index: {}]   ;;  %s5964_s7 = inlined_call_operand.hbm [shape: f32[128,128], index: 7, kind: input, shape index: {}]   ;;  %s5965_s8 = inlined_call_operand.vmem [shape: f32[1,128], index: 8, kind: input, shape index: {}]   ;;  %s5966_s9 = inlined_call_operand.hbm [shape: f32[128,128], index: 9, kind: input, shape index: {}]   ;;  %s5967_s10 = inlined_call_operand.vmem [shape: f32[1,128], index: 10, kind: input, shape index: {}]   ;;  %s5968_s11 = inlined_call_operand.vmem [shape: f32[8,128], index: 11, kind: output, shape index: {}]  }
   0x1   :  { %17 = vsyncpa [#allocation9], 0 }
   0x2   :  { %18 = vsyncpa [#allocation12], 0  ;;  %s44_s19 = sshll.u32 %s5962_s5, 4  ;;  %s4229_s20 = smov [#allocation8]   ;;  %s45_s19 = int_to_ptr.hbm [resolvable:$true] %s44_s19 }
   0x3   :  { %s46_s21 = sshll.u32 %s4229_s20, 4  ;;  %s29_s24 = sshll.u32 %s5960_s3, 4  ;;  %s47_s21 = int_to_ptr.vmem [resolvable:$true] %s46_s21  ;;  %s30_s24 = int_to_ptr.hbm [resolvable:$true] %s29_s24 }
   0x4   :  { %s4230_s25 = smov 128   ;;  %s4231_s26 = smov 8  }
   0x5   :  { %52 = dma.hbm_to_vmem [thread:$0]  %s45_s19, 8192, %s47_s21, [#allocation9], %s4230_s25, %s4230_s25, %s4231_s26  }
   0x6   :  { %s4232_s27 = smov [#allocation6]   ;;  %s59_s12 = sshll.u32 %s5964_s7, 4  ;;  %s60_s12 = int_to_ptr.hbm [resolvable:$true] %s59_s12 }
   0x7   :  { %s31_s28 = sshll.u32 %s4232_s27, 4  ;;  %s74_s14 = sshll.u32 %s5966_s9, 4  ;;  %s32_s28 = int_to_ptr.vmem [resolvable:$true] %s31_s28  ;;  %s75_s14 = int_to_ptr.hbm [resolvable:$true] %s74_s14 }
   0x8   :  { %37 = dma.hbm_to_vmem [thread:$0]  %s30_s24, 11520, %s32_s28, [#allocation7], %s4230_s25, %s4230_s25, %s4231_s26  }
   0x9   :  { %s4233_s15 = smov [#allocation10]   ;;  %s4234_s3 = smov [#allocation11]  }
   0xa   :  { %s61_s16 = sshll.u32 %s4233_s15, 4  ;;  %s76_s17 = sshll.u32 %s4234_s3, 4  ;;  %s62_s16 = int_to_ptr.vmem [resolvable:$true] %s61_s16  ;;  %s77_s17 = int_to_ptr.vmem [resolvable:$true] %s76_s17 }
   0xb   :  { %67 = dma.hbm_to_vmem [thread:$0]  %s60_s12, 2048, %s62_s16, [#allocation9], %s4230_s25, %s4230_s25, %s4231_s26  }
   0xc   :  { %82 = dma.hbm_to_vmem [thread:$0]  %s75_s14, 2048, %s77_s17, [#allocation12], %s4230_s25, %s4230_s25, %s4231_s26  }
   0xd   :  { %4223 = dma.done.wait [#allocation7], 11520  }
   0xe   :  { %4224 = vsyncadd [#allocation7], 4294955776 }
   0xf   :  { %4225 = dma.done.wait [#allocation9], 10240  }
  0x10   :  { %4226 = vsyncadd [#allocation9], 4294957056 }
  0x11   :  { %4227 = dma.done.wait [#allocation12], 2048  }
  0x12   :  { %4228 = vsyncadd [#allocation12], 4294965248  ;;  %vm206_vm0 = vcmask 1043456   ;;  %v131_v0 = vld [vmem:[%s5958_s1 + $0x30] sm:$0xf]  ;;  %v129_v2 = vld [vmem:[%s5958_s1 + $0x20] sm:$0xff] }
  0x13   :  { %v132_v1 = vld [vmem:[%s5958_s1 + $0x38] sm:$0xf]  ;;  %3678 = vmatpush.msk.msra.mxu0 %vm206_vm0, %v131_v0  ;;  %4096 = vmatpush.msk.msra.mxu2 %vm206_vm0, %v131_v0  ;;  %v130_v3 = vld [vmem:[%s5958_s1 + $0x28] sm:$0xff]  ;;  %v127_v4 = vld [vmem:[%s5958_s1 + $0x10] sm:$0xff]  ;;  %vm133_vm1 = vcmask 228352   ;;  %vm446_vm2 = vcmask 130048  }
  0x14   :  { %3703 = vmatpush.msk.msra.mxu1 %vm206_vm0, %v132_v1  ;;  %4100 = vmatpush.msk.msra.mxu3 %vm206_vm0, %v132_v1  ;;  %v128_v5 = vld [vmem:[%s5958_s1 + $0x18] sm:$0xff]  ;;  %v125_v6 = vld [vmem:[%s5958_s1] sm:$0xff]  ;;  %v126_v7 = vld [vmem:[%s5958_s1 + $0x8] sm:$0xff]  ;;  %s4235_s25 = smov 10   ;;  %s4236_s26 = smov 122   ;;  %vm2252_vm3 = vcmask 80896  }
  0x15   :  { %226 = vmatpush.msra.mxu0 %v129_v2  ;;  %4097 = vmatpush.msra.mxu2 %v129_v2  ;;  %v101_v8 = vld [vmem:[%s5957_s0] sm:$0xff]  ;;  %v4344_v9 = vld [vmem:[%s5957_s0 + $0xb0] sm:$0xff]  ;;  %v3841_v11 = vld [vmem:[%s5958_s1 + $0xb8] sm:$0xf]  ;;  %vm2245_vm4 = vcmask 998400  }
  0x16   :  { %315 = vmatpush.msra.mxu1 %v130_v3  ;;  %4101 = vmatpush.msra.mxu3 %v130_v3  ;;  %v3840_v10 = vld [vmem:[%s5958_s1 + $0xb0] sm:$0xf]  ;;  %v3759_v13 = vld [vmem:[%s5958_s1 + $0x78] sm:$0xf]  ;;  %v3756_v14 = vld [vmem:[%s5958_s1 + $0x60] sm:$0xff] }
  0x17   :  { %227 = vmatpush.msra.mxu0 %v127_v4  ;;  %4098 = vmatpush.msra.mxu2 %v127_v4  ;;  %v3758_v12 = vld [vmem:[%s5958_s1 + $0x70] sm:$0xf]  ;;  %v3757_v15 = vld [vmem:[%s5958_s1 + $0x68] sm:$0xff]  ;;  %v3755_v17 = vld [vmem:[%s5958_s1 + $0x58] sm:$0xff] }
  0x18   :  { %316 = vmatpush.msra.mxu1 %v128_v5  ;;  %4102 = vmatpush.msra.mxu3 %v128_v5  ;;  %v3754_v16 = vld [vmem:[%s5958_s1 + $0x50] sm:$0xff]  ;;  %v102_v18 = vld [vmem:[%s5957_s0 + $0x8] sm:$0xff]  ;;  %v4386_v19 = vld [vmem:[%s5957_s0 + $0xb8] sm:$0xff] }
  0x19   :  { %228 = vmatpush.msra.mxu0 %v125_v6  ;;  %4099 = vmatpush.msra.mxu2 %v125_v6  ;;  %v3752_v20 = vld [vmem:[%s5958_s1 + $0x40] sm:$0xff]  ;;  %v3753_v21 = vld [vmem:[%s5958_s1 + $0x48] sm:$0xff]  ;;  %v4409_v24 = vld [vmem:[%s5957_s0 + $0x10] sm:$0xff] }
  0x1a   :  { %317 = vmatpush.msra.mxu1 %v126_v7  ;;  %4103 = vmatpush.msra.mxu3 %v126_v7  ;;  %v3838_v22 = vld [vmem:[%s5958_s1 + $0xa0] sm:$0xff]  ;;  %v3839_v23 = vld [vmem:[%s5958_s1 + $0xa8] sm:$0xff]  ;;  %v4420_v25 = vld [vmem:[%s5957_s0 + $0x18] sm:$0xff] }
  0x1b   :  { %3679 = vmatmul.msk.f32.vlgmr.msra.gmra.mxu0 %vm133_vm1, %v101_v8  ;;  %3701 = vmatmul.msk.f32.vlgmr.msra.gmra.mxu2 %vm133_vm1, %v4344_v9  ;;  %v4433_v26 = vld [vmem:[%s5957_s0 + $0x20] sm:$0xff]  ;;  %v4446_v27 = vld [vmem:[%s5957_s0 + $0x28] sm:$0xff]  ;;  %v4459_v28 = vld [vmem:[%s5957_s0 + $0x30] sm:$0xff] }
  0x1c   :  { %3704 = vmatmul.msk.f32.vlgmr.msra.gmra.mxu1 %vm133_vm1, %v101_v8  ;;  %3726 = vmatmul.msk.f32.vlgmr.msra.gmra.mxu3 %vm133_vm1, %v4344_v9  ;;  %v4472_v29 = vld [vmem:[%s5957_s0 + $0x38] sm:$0xff]  ;;  %v3836_v30 = vld [vmem:[%s5958_s1 + $0x90] sm:$0xff]  ;;  %v4491_v32 = vld [vmem:[%s5957_s0 + $0x40] sm:$0xff] }
  0x1d   :  { %3842 = vmatpush.msk.msrb.mxu0 %vm206_vm0, %v3840_v10  ;;  %3867 = vmatpush.msk.msrb.mxu1 %vm206_vm0, %v3841_v11  ;;  %v3837_v31 = vld [vmem:[%s5958_s1 + $0x98] sm:$0xff]  ;;  %v4504_v33 = vld [vmem:[%s5957_s0 + $0x48] sm:$0xff]  ;;  %v4517_v34 = vld [vmem:[%s5957_s0 + $0x50] sm:$0xff] }
  0x1e   :  { %3760 = vmatpush.msk.msrb.mxu2 %vm206_vm0, %v3758_v12  ;;  %3785 = vmatpush.msk.msrb.mxu3 %vm206_vm0, %v3759_v13  ;;  %v4530_v35 = vld [vmem:[%s5957_s0 + $0x58] sm:$0xff]  ;;  %v4543_v36 = vld [vmem:[%s5957_s0 + $0x60] sm:$0xff]  ;;  %v4556_v37 = vld [vmem:[%s5957_s0 + $0x68] sm:$0xff] }
  0x1f   :  { %1101 = vmatpush.msrb.mxu0 %v3838_v22  ;;  %1190 = vmatpush.msrb.mxu1 %v3839_v23  ;;  %v3834_v38 = vld [vmem:[%s5958_s1 + $0x80] sm:$0xff]  ;;  %v3835_v39 = vld [vmem:[%s5958_s1 + $0x88] sm:$0xff]  ;;  %v4575_v40 = vld [vmem:[%s5957_s0 + $0x70] sm:$0xff] }
  0x20   :  { %667 = vmatpush.msrb.mxu2 %v3756_v14  ;;  %756 = vmatpush.msrb.mxu3 %v3757_v15  ;;  %v4588_v41 = vld [vmem:[%s5957_s0 + $0x78] sm:$0xff]  ;;  %v391_v42 = vld [vmem:[%s5959_s2] sm:$0x3]  ;;  %v3922_v48 = vld [vmem:[%s5958_s1 + $0xf0] sm:$0xf] }
  0x21   :  { %1102 = vmatpush.msrb.mxu0 %v3836_v30  ;;  %1191 = vmatpush.msrb.mxu1 %v3837_v31  ;;  %v4601_v43 = vperm.slane %v391_v42, 1  ;;  %v4608_v45 = vld [vmem:[%s5957_s0 + $0x80] sm:$0xff]  ;;  %v3923_v49 = vld [vmem:[%s5958_s1 + $0xf8] sm:$0xf]  ;;  %v4626_v50 = vperm.slane %v391_v42, 0  ;;  %v4637_v56 = vld [vmem:[%s5957_s0 + $0x88] sm:$0xff] }
  0x22   :  { %668 = vmatpush.msrb.mxu2 %v3754_v16  ;;  %757 = vmatpush.msrb.mxu3 %v3755_v17  ;;  %v4657_v0 = vld [vmem:[%s5957_s0 + $0x90] sm:$0xff]  ;;  %v4005_v4 = vld [vmem:[%s5958_s1 + $0x138] sm:$0xf]  ;;  %v4701_v17 = vld [vmem:[%s5957_s0 + $0xa0] sm:$0xff] }
  0x23   :  { %3680 = vmatmul.msk.f32.gmra.mxu0 %vm133_vm1, %v102_v18  ;;  %3702 = vmatmul.msk.f32.gmra.mxu2 %vm133_vm1, %v4386_v19  ;;  %v4004_v3 = vld [vmem:[%s5958_s1 + $0x130] sm:$0xf]  ;;  %v4683_v10 = vld [vmem:[%s5957_s0 + $0x98] sm:$0xff] }
  0x24   :  { %3705 = vmatmul.msk.f32.gmra.mxu1 %vm133_vm1, %v102_v18  ;;  %3727 = vmatmul.msk.f32.gmra.mxu3 %vm133_vm1, %v4386_v19 }
  0x25   :  { %669 = vmatpush.msrb.mxu2 %v3752_v20  ;;  %758 = vmatpush.msrb.mxu3 %v3753_v21 }
  0x26   :  { %1103 = vmatpush.msrb.mxu0 %v3834_v38  ;;  %1192 = vmatpush.msrb.mxu1 %v3835_v39  ;;  %v4721_v38 = vld [vmem:[%s5957_s0 + $0xa8] sm:$0xff] }
  0x27   :  { %3924 = vmatpush.msk.msra.mxu2 %vm206_vm0, %v3922_v48  ;;  %3949 = vmatpush.msk.msra.mxu3 %vm206_vm0, %v3923_v49 }
  0x28   :  { %4006 = vmatpush.msk.msra.mxu0 %vm206_vm0, %v4004_v3  ;;  %4031 = vmatpush.msk.msra.mxu1 %vm206_vm0, %v4005_v4 }
  0x2b   :  { %3681 = vmatmul.msk.f32.gmra.mxu0 %vm133_vm1, %v4409_v24  ;;  %3761 = vmatmul.msk.f32.vlgmr.msrb.gmra.mxu2 %vm133_vm1, %v102_v18 }
  0x2c   :  { %3706 = vmatmul.msk.f32.gmra.mxu1 %vm133_vm1, %v4409_v24  ;;  %3786 = vmatmul.msk.f32.vlgmr.msrb.gmra.mxu3 %vm133_vm1, %v102_v18 }
  0x33   :  { %3682 = vmatmul.msk.f32.gmra.mxu0 %vm133_vm1, %v4420_v25  ;;  %3762 = vmatmul.msk.f32.gmra.mxu2 %vm133_vm1, %v4409_v24 }
  0x34   :  { %3707 = vmatmul.msk.f32.gmra.mxu1 %vm133_vm1, %v4420_v25  ;;  %3787 = vmatmul.msk.f32.gmra.mxu3 %vm133_vm1, %v4409_v24 }
  0x3b   :  { %3683 = vmatmul.msk.f32.gmra.mxu0 %vm133_vm1, %v4433_v26  ;;  %3763 = vmatmul.msk.f32.gmra.mxu2 %vm133_vm1, %v4420_v25 }
  0x3c   :  { %3708 = vmatmul.msk.f32.gmra.mxu1 %vm133_vm1, %v4433_v26  ;;  %3788 = vmatmul.msk.f32.gmra.mxu3 %vm133_vm1, %v4420_v25 }
  0x43   :  { %3684 = vmatmul.msk.f32.gmra.mxu0 %vm133_vm1, %v4446_v27  ;;  %3764 = vmatmul.msk.f32.gmra.mxu2 %vm133_vm1, %v4433_v26 }
  0x44   :  { %3709 = vmatmul.msk.f32.gmra.mxu1 %vm133_vm1, %v4446_v27  ;;  %3789 = vmatmul.msk.f32.gmra.mxu3 %vm133_vm1, %v4433_v26 }
  0x4b   :  { %3685 = vmatmul.msk.f32.gmra.mxu0 %vm133_vm1, %v4459_v28  ;;  %3765 = vmatmul.msk.f32.gmra.mxu2 %vm133_vm1, %v4446_v27 }
  0x4c   :  { %3710 = vmatmul.msk.f32.gmra.mxu1 %vm133_vm1, %v4459_v28  ;;  %3790 = vmatmul.msk.f32.gmra.mxu3 %vm133_vm1, %v4446_v27 }
  0x53   :  { %3686 = vmatmul.msk.f32.gmra.mxu0 %vm133_vm1, %v4472_v29  ;;  %3766 = vmatmul.msk.f32.gmra.mxu2 %vm133_vm1, %v4459_v28 }
  0x54   :  { %3711 = vmatmul.msk.f32.gmra.mxu1 %vm133_vm1, %v4472_v29  ;;  %3791 = vmatmul.msk.f32.gmra.mxu3 %vm133_vm1, %v4459_v28 }
  0x5b   :  { %3687 = vmatmul.msk.f32.gmra.mxu0 %vm133_vm1, %v4491_v32  ;;  %3767 = vmatmul.msk.f32.gmra.mxu2 %vm133_vm1, %v4472_v29 }
  0x5c   :  { %3712 = vmatmul.msk.f32.gmra.mxu1 %vm133_vm1, %v4491_v32  ;;  %3792 = vmatmul.msk.f32.gmra.mxu3 %vm133_vm1, %v4472_v29 }
  0x63   :  { %3688 = vmatmul.msk.f32.gmra.mxu0 %vm133_vm1, %v4504_v33  ;;  %3768 = vmatmul.msk.f32.gmra.mxu2 %vm133_vm1, %v4491_v32 }
  0x64   :  { %3713 = vmatmul.msk.f32.gmra.mxu1 %vm133_vm1, %v4504_v33  ;;  %3793 = vmatmul.msk.f32.gmra.mxu3 %vm133_vm1, %v4491_v32 }
  0x6b   :  { %3689 = vmatmul.msk.f32.gmra.mxu0 %vm133_vm1, %v4517_v34  ;;  %3769 = vmatmul.msk.f32.gmra.mxu2 %vm133_vm1, %v4504_v33 }
  0x6c   :  { %3714 = vmatmul.msk.f32.gmra.mxu1 %vm133_vm1, %v4517_v34  ;;  %3794 = vmatmul.msk.f32.gmra.mxu3 %vm133_vm1, %v4504_v33 }
  0x73   :  { %3690 = vmatmul.msk.f32.gmra.mxu0 %vm133_vm1, %v4530_v35  ;;  %3770 = vmatmul.msk.f32.gmra.mxu2 %vm133_vm1, %v4517_v34 }
  0x74   :  { %3715 = vmatmul.msk.f32.gmra.mxu1 %vm133_vm1, %v4530_v35  ;;  %3795 = vmatmul.msk.f32.gmra.mxu3 %vm133_vm1, %v4517_v34 }
  0x7b   :  { %3691 = vmatmul.msk.f32.gmra.mxu0 %vm133_vm1, %v4543_v36  ;;  %3771 = vmatmul.msk.f32.gmra.mxu2 %vm133_vm1, %v4530_v35 }
  0x7c   :  { %3716 = vmatmul.msk.f32.gmra.mxu1 %vm133_vm1, %v4543_v36  ;;  %3796 = vmatmul.msk.f32.gmra.mxu3 %vm133_vm1, %v4530_v35 }
  0x83   :  { %3692 = vmatmul.msk.f32.gmra.mxu0 %vm133_vm1, %v4556_v37  ;;  %3772 = vmatmul.msk.f32.gmra.mxu2 %vm133_vm1, %v4543_v36 }
  0x84   :  { %3717 = vmatmul.msk.f32.gmra.mxu1 %vm133_vm1, %v4556_v37  ;;  %3797 = vmatmul.msk.f32.gmra.mxu3 %vm133_vm1, %v4543_v36 }
  0x8b   :  { %3693 = vmatmul.msk.f32.gmra.mxu0 %vm133_vm1, %v4575_v40  ;;  %3773 = vmatmul.msk.f32.gmra.mxu2 %vm133_vm1, %v4556_v37 }
  0x8c   :  { %3718 = vmatmul.msk.f32.gmra.mxu1 %vm133_vm1, %v4575_v40  ;;  %3798 = vmatmul.msk.f32.gmra.mxu3 %vm133_vm1, %v4556_v37 }
  0x93   :  { %3694 = vmatmul.msk.f32.gmra.mxu0 %vm133_vm1, %v4588_v41  ;;  %3774 = vmatmul.msk.f32.gmra.mxu2 %vm133_vm1, %v4575_v40 }
  0x94   :  { %3719 = vmatmul.msk.f32.gmra.mxu1 %vm133_vm1, %v4588_v41  ;;  %3799 = vmatmul.msk.f32.gmra.mxu3 %vm133_vm1, %v4575_v40 }
  0x98   :  { %v4603_v44 = vpop.f32.mrf.mxu0 }
  0x99   :  { %v319_v46 = vpop.f32.mrf.mxu1 }
  0x9a   :  { %v398_v47 = vadd.f32 %v4601_v43, %v319_v46  ;;  %v3920_v46 = vld [vmem:[%s5958_s1 + $0xe0] sm:$0xff] }
  0x9b   :  { %3695 = vmatmul.msk.f32.gmra.mxu0 %vm133_vm1, %v4608_v45  ;;  %3775 = vmatmul.msk.f32.gmra.mxu2 %vm133_vm1, %v4588_v41 }
  0x9c   :  { %447 = vst.msk [vmem:[#allocation2 + $0x8] sm:$0xff] %vm446_vm2, %v398_v47  ;;  %3720 = vmatmul.msk.f32.gmra.mxu1 %vm133_vm1, %v4608_v45  ;;  %3800 = vmatmul.msk.f32.gmra.mxu3 %vm133_vm1, %v4588_v41  ;;  %v3921_v47 = vld [vmem:[%s5958_s1 + $0xe8] sm:$0xff] }
  0x9d   :  { %1535 = vmatpush.msra.mxu2 %v3920_v46  ;;  %1624 = vmatpush.msra.mxu3 %v3921_v47 }
  0x9e   :  { %v296_v51 = vpop.f32.mrf.mxu2 }
  0x9f   :  { %v441_v52 = vadd.f32 %v4626_v50, %v296_v51  ;;  %v385_v53 = vpop.f32.mrf.mxu3 }
  0xa0   :  { %v442_v54 = vadd.f32 %v4601_v43, %v385_v53  ;;  %v4632_v55 = vpop.f32.mrf.mxu0 }
  0xa1   :  { %490 = vst [vmem:[#allocation2 + $0x160] sm:$0xff] %v441_v52  ;;  %v322_v57 = vpop.f32.mrf.mxu1 }
  0xa2   :  { %491 = vst.msk [vmem:[#allocation2 + $0x168] sm:$0xff] %vm446_vm2, %v442_v54  ;;  %v400_v58 = vadd.f32 %v4601_v43, %v322_v57  ;;  %v3918_v54 = vld [vmem:[%s5958_s1 + $0xd0] sm:$0xff]  ;;  %v3919_v57 = vld [vmem:[%s5958_s1 + $0xd8] sm:$0xff] }
  0xa3   :  { %3696 = vmatmul.msk.f32.gmra.mxu0 %vm133_vm1, %v4637_v56  ;;  %3776 = vmatmul.msk.f32.gmra.mxu2 %vm133_vm1, %v4608_v45  ;;  %v495_v5 = vld [vmem:[#allocation2 + $0x8] sm:$0xff] }
  0xa4   :  { %449 = vst.msk [vmem:[#allocation2 + $0x18] sm:$0xff] %vm446_vm2, %v400_v58  ;;  %3721 = vmatmul.msk.f32.gmra.mxu1 %vm133_vm1, %v4637_v56  ;;  %3801 = vmatmul.msk.f32.gmra.mxu3 %vm133_vm1, %v4608_v45 }
  0xa5   :  { %1536 = vmatpush.msra.mxu2 %v3918_v54  ;;  %1625 = vmatpush.msra.mxu3 %v3919_v57 }
  0xa6   :  { %v299_v59 = vpop.f32.mrf.mxu2 }
  0xa7   :  { %v443_v60 = vadd.f32 %v4626_v50, %v299_v59  ;;  %v388_v61 = vpop.f32.mrf.mxu3 }
  0xa8   :  { %v444_v62 = vadd.f32 %v4601_v43, %v388_v61  ;;  %v4652_v63 = vpop.f32.mrf.mxu0  ;;  %v3917_v61 = vld [vmem:[%s5958_s1 + $0xc8] sm:$0xff] }
  0xa9   :  { %492 = vst [vmem:[#allocation2 + $0x170] sm:$0xff] %v443_v60  ;;  %v325_v1 = vpop.f32.mrf.mxu1  ;;  %v3916_v60 = vld [vmem:[%s5958_s1 + $0xc0] sm:$0xff]  ;;  %1626 = vmatpush.msra.mxu3 %v3917_v61 }
  0xaa   :  { %493 = vst.msk [vmem:[#allocation2 + $0x178] sm:$0xff] %vm446_vm2, %v444_v62  ;;  %v402_v2 = vadd.f32 %v4601_v43, %v325_v1  ;;  %1537 = vmatpush.msra.mxu2 %v3916_v60 }
  0xab   :  { %3697 = vmatmul.msk.f32.gmra.mxu0 %vm133_vm1, %v4657_v0  ;;  %3777 = vmatmul.msk.f32.gmra.mxu2 %vm133_vm1, %v4637_v56  ;;  %v497_v13 = vld [vmem:[#allocation2 + $0x18] sm:$0xff] }
  0xac   :  { %451 = vst.msk [vmem:[#allocation2 + $0x28] sm:$0xff] %vm446_vm2, %v402_v2  ;;  %3722 = vmatmul.msk.f32.gmra.mxu1 %vm133_vm1, %v4657_v0  ;;  %3802 = vmatmul.msk.f32.gmra.mxu3 %vm133_vm1, %v4637_v56 }
  0xae   :  { %v4714_v21 = vpop.f32.mrf.mxu2 }
  0xaf   :  { %v760_v6 = vpop.f32.mrf.mxu3 }
  0xb0   :  { %v833_v7 = vadd.f32 %v760_v6, %v495_v5  ;;  %v4678_v8 = vpop.f32.mrf.mxu0 }
  0xb1   :  { %v328_v11 = vpop.f32.mrf.mxu1 }
  0xb2   :  { %881 = vst.msk [vmem:[#allocation2 + $0x8] sm:$0xff] %vm446_vm2, %v833_v7  ;;  %v404_v12 = vadd.f32 %v4601_v43, %v328_v11 }
  0xb3   :  { %3698 = vmatmul.msk.f32.gmra.mxu0 %vm133_vm1, %v4683_v10  ;;  %3778 = vmatmul.msk.f32.gmra.mxu2 %vm133_vm1, %v4657_v0  ;;  %v499_v22 = vld [vmem:[#allocation2 + $0x28] sm:$0xff] }
  0xb4   :  { %453 = vst.msk [vmem:[#allocation2 + $0x38] sm:$0xff] %vm446_vm2, %v404_v12  ;;  %3723 = vmatmul.msk.f32.gmra.mxu1 %vm133_vm1, %v4683_v10  ;;  %3803 = vmatmul.msk.f32.gmra.mxu3 %vm133_vm1, %v4657_v0 }
  0xb6   :  { %v4740_v48 = vpop.f32.mrf.mxu2 }
  0xb7   :  { %v763_v14 = vpop.f32.mrf.mxu3 }
  0xb8   :  { %v835_v15 = vadd.f32 %v763_v14, %v497_v13  ;;  %v4696_v16 = vpop.f32.mrf.mxu0 }
  0xb9   :  { %v331_v18 = vpop.f32.mrf.mxu1 }
  0xba   :  { %883 = vst.msk [vmem:[#allocation2 + $0x18] sm:$0xff] %vm446_vm2, %v835_v15  ;;  %v406_v20 = vadd.f32 %v4601_v43, %v331_v18  ;;  %v4003_v18 = vld [vmem:[%s5958_s1 + $0x128] sm:$0xff] }
  0xbb   :  { %3699 = vmatmul.msk.f32.gmra.mxu0 %vm133_vm1, %v4701_v17  ;;  %3779 = vmatmul.msk.f32.gmra.mxu2 %vm133_vm1, %v4683_v10  ;;  %v501_v49 = vld [vmem:[#allocation2 + $0x38] sm:$0xff] }
  0xbc   :  { %455 = vst.msk [vmem:[#allocation2 + $0x48] sm:$0xff] %vm446_vm2, %v406_v20  ;;  %3724 = vmatmul.msk.f32.gmra.mxu1 %vm133_vm1, %v4701_v17  ;;  %3804 = vmatmul.msk.f32.gmra.mxu3 %vm133_vm1, %v4683_v10 }
  0xbd   :  { %2058 = vmatpush.msra.mxu1 %v4003_v18 }
  0xbe   :  { %v4769_v4 = vpop.f32.mrf.mxu2 }
  0xbf   :  { %v766_v23 = vpop.f32.mrf.mxu3 }
  0xc0   :  { %v837_v30 = vadd.f32 %v766_v23, %v499_v22  ;;  %v4716_v31 = vpop.f32.mrf.mxu0 }
  0xc1   :  { %v334_v39 = vpop.f32.mrf.mxu1 }
  0xc2   :  { %885 = vst.msk [vmem:[#allocation2 + $0x28] sm:$0xff] %vm446_vm2, %v837_v30  ;;  %v408_v42 = vadd.f32 %v4601_v43, %v334_v39 }
  0xc3   :  { %3700 = vmatmul.msk.f32.gmra.mxu0 %vm133_vm1, %v4721_v38  ;;  %3780 = vmatmul.msk.f32.gmra.mxu2 %vm133_vm1, %v4701_v17  ;;  %v503_v62 = vld [vmem:[#allocation2 + $0x48] sm:$0xff] }
  0xc4   :  { %457 = vst.msk [vmem:[#allocation2 + $0x58] sm:$0xff] %vm446_vm2, %v408_v42  ;;  %3725 = vmatmul.msk.f32.gmra.mxu1 %vm133_vm1, %v4721_v38  ;;  %3805 = vmatmul.msk.f32.gmra.mxu3 %vm133_vm1, %v4701_v17 }
  0xc6   :  { %v4786_v15 = vpop.f32.mrf.mxu2 }
  0xc7   :  { %v769_v51 = vpop.f32.mrf.mxu3 }
  0xc8   :  { %v839_v52 = vadd.f32 %v769_v51, %v501_v49  ;;  %v4742_v53 = vpop.f32.mrf.mxu0 }
  0xc9   :  { %v337_v58 = vpop.f32.mrf.mxu1 }
  0xca   :  { %887 = vst.msk [vmem:[#allocation2 + $0x38] sm:$0xff] %vm446_vm2, %v839_v52  ;;  %v410_v59 = vadd.f32 %v4601_v43, %v337_v58 }
  0xcb   :  { %3781 = vmatmul.msk.f32.gmra.mxu2 %vm133_vm1, %v4721_v38  ;;  %3843 = vmatmul.msk.f32.vlgmr.msrb.gmra.mxu0 %vm133_vm1, %v4409_v24 }
  0xcc   :  { %459 = vst.msk [vmem:[#allocation2 + $0x68] sm:$0xff] %vm446_vm2, %v410_v59  ;;  %3806 = vmatmul.msk.f32.gmra.mxu3 %vm133_vm1, %v4721_v38  ;;  %3868 = vmatmul.msk.f32.vlgmr.msrb.gmra.mxu1 %vm133_vm1, %v4409_v24  ;;  %v505_v24 = vld [vmem:[#allocation2 + $0x58] sm:$0xff] }
  0xce   :  { %v4821_v46 = vpop.f32.mrf.mxu2 }
  0xcf   :  { %v772_v1 = vpop.f32.mrf.mxu3 }
  0xd0   :  { %v841_v2 = vadd.f32 %v772_v1, %v503_v62  ;;  %v4767_v3 = vpop.f32.mrf.mxu0 }
  0xd1   :  { %v340_v5 = vpop.f32.mrf.mxu1 }
  0xd2   :  { %889 = vst.msk [vmem:[#allocation2 + $0x48] sm:$0xff] %vm446_vm2, %v841_v2  ;;  %v412_v6 = vadd.f32 %v4601_v43, %v340_v5 }
  0xd3   :  { %3782 = vmatmul.msk.f32.gmra.mxu2 %vm133_vm1, %v4344_v9  ;;  %3844 = vmatmul.msk.f32.gmra.mxu0 %vm133_vm1, %v4420_v25  ;;  %v507_v20 = vld [vmem:[#allocation2 + $0x68] sm:$0xff] }
  0xd4   :  { %461 = vst.msk [vmem:[#allocation2 + $0x78] sm:$0xff] %vm446_vm2, %v412_v6  ;;  %3807 = vmatmul.msk.f32.gmra.mxu3 %vm133_vm1, %v4344_v9  ;;  %3869 = vmatmul.msk.f32.gmra.mxu1 %vm133_vm1, %v4420_v25  ;;  %v4002_v9 = vld [vmem:[%s5958_s1 + $0x120] sm:$0xff] }
  0xd5   :  { %1969 = vmatpush.msra.mxu0 %v4002_v9 }
  0xd6   :  { %v4836_v58 = vpop.f32.mrf.mxu2 }
  0xd7   :  { %v775_v7 = vpop.f32.mrf.mxu3 }
  0xd8   :  { %v843_v11 = vadd.f32 %v775_v7, %v505_v24  ;;  %v4782_v12 = vpop.f32.mrf.mxu0 }
  0xd9   :  { %v343_v13 = vpop.f32.mrf.mxu1 }
  0xda   :  { %891 = vst.msk [vmem:[#allocation2 + $0x58] sm:$0xff] %vm446_vm2, %v843_v11  ;;  %v414_v14 = vadd.f32 %v4601_v43, %v343_v13 }
  0xdb   :  { %3783 = vmatmul.msk.f32.gmra.mxu2 %vm133_vm1, %v4386_v19  ;;  %3845 = vmatmul.msk.f32.gmra.mxu0 %vm133_vm1, %v4433_v26  ;;  %v509_v47 = vld [vmem:[#allocation2 + $0x78] sm:$0xff] }
  0xdc   :  { %463 = vst.msk [vmem:[#allocation2 + $0x88] sm:$0xff] %vm446_vm2, %v414_v14  ;;  %3808 = vmatmul.msk.f32.gmra.mxu3 %vm133_vm1, %v4386_v19  ;;  %3870 = vmatmul.msk.f32.gmra.mxu1 %vm133_vm1, %v4433_v26  ;;  %v4808_v19 = vld [vmem:[%s5957_s0 + $0xc0] sm:$0xff] }
  0xde   :  { %v4853_v7 = vpop.f32.mrf.mxu2 }
  0xdf   :  { %v778_v22 = vpop.f32.mrf.mxu3 }
  0xe0   :  { %v845_v23 = vadd.f32 %v778_v22, %v507_v20  ;;  %v4803_v30 = vpop.f32.mrf.mxu0 }
  0xe1   :  { %v346_v39 = vpop.f32.mrf.mxu1 }
  0xe2   :  { %893 = vst.msk [vmem:[#allocation2 + $0x68] sm:$0xff] %vm446_vm2, %v845_v23  ;;  %v416_v42 = vadd.f32 %v4601_v43, %v346_v39 }
  0xe3   :  { %3784 = vmatmul.msk.f32.gmra.mxu2 %vm133_vm1, %v4808_v19  ;;  %3846 = vmatmul.msk.f32.gmra.mxu0 %vm133_vm1, %v4446_v27  ;;  %v511_v59 = vld [vmem:[#allocation2 + $0x88] sm:$0xff] }
  0xe4   :  { %465 = vst.msk [vmem:[#allocation2 + $0x98] sm:$0xff] %vm446_vm2, %v416_v42  ;;  %3809 = vmatmul.msk.f32.gmra.mxu3 %vm133_vm1, %v4808_v19  ;;  %3871 = vmatmul.msk.f32.gmra.mxu1 %vm133_vm1, %v4446_v27 }
  0xe6   :  { %v4870_v23 = vpop.f32.mrf.mxu2 }
  0xe7   :  { %v781_v49 = vpop.f32.mrf.mxu3 }
  0xe8   :  { %v847_v51 = vadd.f32 %v781_v49, %v509_v47  ;;  %v4823_v52 = vpop.f32.mrf.mxu0 }
  0xe9   :  { %v349_v54 = vpop.f32.mrf.mxu1 }
  0xea   :  { %895 = vst.msk [vmem:[#allocation2 + $0x78] sm:$0xff] %vm446_vm2, %v847_v51  ;;  %v418_v57 = vadd.f32 %v4601_v43, %v349_v54  ;;  %v4001_v54 = vld [vmem:[%s5958_s1 + $0x118] sm:$0xff] }
  0xeb   :  { %3847 = vmatmul.msk.f32.gmra.mxu0 %vm133_vm1, %v4459_v28  ;;  %3925 = vmatmul.msk.f32.vlgmr.msra.gmra.mxu2 %vm133_vm1, %v4420_v25 }
  0xec   :  { %467 = vst.msk [vmem:[#allocation2 + $0xa8] sm:$0xff] %vm446_vm2, %v418_v57  ;;  %3872 = vmatmul.msk.f32.gmra.mxu1 %vm133_vm1, %v4459_v28  ;;  %3950 = vmatmul.msk.f32.vlgmr.msra.gmra.mxu3 %vm133_vm1, %v4420_v25  ;;  %v513_v25 = vld [vmem:[#allocation2 + $0x98] sm:$0xff] }
  0xed   :  { %2059 = vmatpush.msra.mxu1 %v4001_v54 }
  0xee   :  { %v4900_v57 = vpop.f32.mrf.mxu2 }
  0xef   :  { %v784_v60 = vpop.f32.mrf.mxu3 }
  0xf0   :  { %v849_v61 = vadd.f32 %v784_v60, %v511_v59  ;;  %v4838_v62 = vpop.f32.mrf.mxu0 }
  0xf1   :  { %v352_v1 = vpop.f32.mrf.mxu1 }
  0xf2   :  { %897 = vst.msk [vmem:[#allocation2 + $0x88] sm:$0xff] %vm446_vm2, %v849_v61  ;;  %v420_v2 = vadd.f32 %v4601_v43, %v352_v1 }
  0xf3   :  { %3848 = vmatmul.msk.f32.gmra.mxu0 %vm133_vm1, %v4472_v29  ;;  %3926 = vmatmul.msk.f32.gmra.mxu2 %vm133_vm1, %v4433_v26 }
  0xf4   :  { %469 = vst.msk [vmem:[#allocation2 + $0xb8] sm:$0xff] %vm446_vm2, %v420_v2  ;;  %3873 = vmatmul.msk.f32.gmra.mxu1 %vm133_vm1, %v4472_v29  ;;  %3951 = vmatmul.msk.f32.gmra.mxu3 %vm133_vm1, %v4433_v26  ;;  %v515_v26 = vld [vmem:[#allocation2 + $0xa8] sm:$0xff] }
  0xf7   :  { %v787_v5 = vpop.f32.mrf.mxu3 }
  0xf8   :  { %v851_v6 = vadd.f32 %v787_v5, %v513_v25  ;;  %v4851_v24 = vpop.f32.mrf.mxu0  ;;  %v4915_v25 = vpop.f32.mrf.mxu2 }
  0xf9   :  { %v355_v11 = vpop.f32.mrf.mxu1 }
  0xfa   :  { %899 = vst.msk [vmem:[#allocation2 + $0x98] sm:$0xff] %vm446_vm2, %v851_v6  ;;  %v422_v13 = vadd.f32 %v4601_v43, %v355_v11 }
  0xfb   :  { %3849 = vmatmul.msk.f32.gmra.mxu0 %vm133_vm1, %v4491_v32  ;;  %3927 = vmatmul.msk.f32.gmra.mxu2 %vm133_vm1, %v4446_v27 }
  0xfc   :  { %471 = vst.msk [vmem:[#allocation2 + $0xc8] sm:$0xff] %vm446_vm2, %v422_v13  ;;  %3874 = vmatmul.msk.f32.gmra.mxu1 %vm133_vm1, %v4491_v32  ;;  %3952 = vmatmul.msk.f32.gmra.mxu3 %vm133_vm1, %v4446_v27  ;;  %v517_v27 = vld [vmem:[#allocation2 + $0xb8] sm:$0xff] }
  0xff   :  { %v790_v14 = vpop.f32.mrf.mxu3 }
 0x100   :  { %v853_v9 = vadd.f32 %v790_v14, %v515_v26  ;;  %v4866_v18 = vpop.f32.mrf.mxu0 }
 0x101   :  { %v358_v20 = vpop.f32.mrf.mxu1 }
 0x102   :  { %901 = vst.msk [vmem:[#allocation2 + $0xa8] sm:$0xff] %vm446_vm2, %v853_v9  ;;  %v424_v22 = vadd.f32 %v4601_v43, %v358_v20 }
 0x103   :  { %3850 = vmatmul.msk.f32.gmra.mxu0 %vm133_vm1, %v4504_v33  ;;  %3928 = vmatmul.msk.f32.gmra.mxu2 %vm133_vm1, %v4459_v28  ;;  %v519_v59 = vld [vmem:[#allocation2 + $0xc8] sm:$0xff] }
 0x104   :  { %473 = vst.msk [vmem:[#allocation2 + $0xd8] sm:$0xff] %vm446_vm2, %v424_v22  ;;  %3875 = vmatmul.msk.f32.gmra.mxu1 %vm133_vm1, %v4504_v33  ;;  %3953 = vmatmul.msk.f32.gmra.mxu3 %vm133_vm1, %v4459_v28  ;;  %v4000_v28 = vld [vmem:[%s5958_s1 + $0x110] sm:$0xff] }
 0x105   :  { %1970 = vmatpush.msra.mxu0 %v4000_v28 }
 0x107   :  { %v793_v39 = vpop.f32.mrf.mxu3 }
 0x108   :  { %v855_v42 = vadd.f32 %v793_v39, %v517_v27  ;;  %v4881_v47 = vpop.f32.mrf.mxu0  ;;  %v4932_v27 = vpop.f32.mrf.mxu2 }
 0x109   :  { %5969 = vst [vmem:[#allocation16_spill] sm:$0xff] %v4881_v47  ;;  %v361_v49 = vpop.f32.mrf.mxu1 }
 0x10a   :  { %903 = vst.msk [vmem:[#allocation2 + $0xb8] sm:$0xff] %vm446_vm2, %v855_v42  ;;  %v426_v51 = vadd.f32 %v4601_v43, %v361_v49 }
 0x10b   :  { %3851 = vmatmul.msk.f32.gmra.mxu0 %vm133_vm1, %v4517_v34  ;;  %3929 = vmatmul.msk.f32.gmra.mxu2 %vm133_vm1, %v4472_v29  ;;  %v521_v5 = vld [vmem:[#allocation2 + $0xd8] sm:$0xff] }
 0x10c   :  { %475 = vst.msk [vmem:[#allocation2 + $0xe8] sm:$0xff] %vm446_vm2, %v426_v51  ;;  %3876 = vmatmul.msk.f32.gmra.mxu1 %vm133_vm1, %v4517_v34  ;;  %3954 = vmatmul.msk.f32.gmra.mxu3 %vm133_vm1, %v4472_v29 }
 0x10f   :  { %v796_v60 = vpop.f32.mrf.mxu3 }
 0x110   :  { %v857_v61 = vadd.f32 %v796_v60, %v519_v59  ;;  %v4902_v1 = vpop.f32.mrf.mxu0  ;;  %v4949_v60 = vpop.f32.mrf.mxu2 }
 0x111   :  { %5970 = vst [vmem:[#allocation17_spill] sm:$0xff] %v4902_v1  ;;  %v364_v2 = vpop.f32.mrf.mxu1 }
 0x112   :  { %905 = vst.msk [vmem:[#allocation2 + $0xc8] sm:$0xff] %vm446_vm2, %v857_v61  ;;  %v428_v29 = vadd.f32 %v4601_v43, %v364_v2 }
 0x113   :  { %3852 = vmatmul.msk.f32.gmra.mxu0 %vm133_vm1, %v4530_v35  ;;  %3930 = vmatmul.msk.f32.gmra.mxu2 %vm133_vm1, %v4491_v32 }
 0x114   :  { %477 = vst.msk [vmem:[#allocation2 + $0xf8] sm:$0xff] %vm446_vm2, %v428_v29  ;;  %3877 = vmatmul.msk.f32.gmra.mxu1 %vm133_vm1, %v4530_v35  ;;  %3955 = vmatmul.msk.f32.gmra.mxu3 %vm133_vm1, %v4491_v32  ;;  %v523_v32 = vld [vmem:[#allocation2 + $0xe8] sm:$0xff] }
 0x117   :  { %v799_v6 = vpop.f32.mrf.mxu3 }
 0x118   :  { %v859_v11 = vadd.f32 %v799_v6, %v521_v5  ;;  %v4917_v13 = vpop.f32.mrf.mxu0 }
 0x119   :  { %5971 = vst [vmem:[#allocation18_spill] sm:$0xff] %v4917_v13  ;;  %v367_v26 = vpop.f32.mrf.mxu1 }
 0x11a   :  { %907 = vst.msk [vmem:[#allocation2 + $0xd8] sm:$0xff] %vm446_vm2, %v859_v11  ;;  %v430_v14 = vadd.f32 %v4601_v43, %v367_v26 }
 0x11b   :  { %3853 = vmatmul.msk.f32.gmra.mxu0 %vm133_vm1, %v4543_v36  ;;  %3931 = vmatmul.msk.f32.gmra.mxu2 %vm133_vm1, %v4504_v33 }
 0x11c   :  { %479 = vst.msk [vmem:[#allocation2 + $0x108] sm:$0xff] %vm446_vm2, %v430_v14  ;;  %3878 = vmatmul.msk.f32.gmra.mxu1 %vm133_vm1, %v4543_v36  ;;  %3956 = vmatmul.msk.f32.gmra.mxu3 %vm133_vm1, %v4504_v33  ;;  %v525_v33 = vld [vmem:[#allocation2 + $0xf8] sm:$0xff] }
 0x11f   :  { %v802_v9 = vpop.f32.mrf.mxu3 }
 0x120   :  { %v861_v20 = vadd.f32 %v802_v9, %v523_v32  ;;  %v4930_v22 = vpop.f32.mrf.mxu0 }
 0x121   :  { %5972 = vst [vmem:[#allocation19_spill] sm:$0xff] %v4930_v22  ;;  %v370_v39 = vpop.f32.mrf.mxu1 }
 0x122   :  { %909 = vst.msk [vmem:[#allocation2 + $0xe8] sm:$0xff] %vm446_vm2, %v861_v20  ;;  %v432_v42 = vadd.f32 %v4601_v43, %v370_v39  ;;  %v3999_v39 = vld [vmem:[%s5958_s1 + $0x108] sm:$0xff] }
 0x123   :  { %3854 = vmatmul.msk.f32.gmra.mxu0 %vm133_vm1, %v4556_v37  ;;  %3932 = vmatmul.msk.f32.gmra.mxu2 %vm133_vm1, %v4517_v34 }
 0x124   :  { %481 = vst.msk [vmem:[#allocation2 + $0x118] sm:$0xff] %vm446_vm2, %v432_v42  ;;  %3879 = vmatmul.msk.f32.gmra.mxu1 %vm133_vm1, %v4556_v37  ;;  %3957 = vmatmul.msk.f32.gmra.mxu3 %vm133_vm1, %v4517_v34  ;;  %v527_v34 = vld [vmem:[#allocation2 + $0x108] sm:$0xff] }
 0x125   :  { %2060 = vmatpush.msra.mxu1 %v3999_v39 }
 0x127   :  { %v805_v49 = vpop.f32.mrf.mxu3 }
 0x128   :  { %v863_v51 = vadd.f32 %v805_v49, %v525_v33  ;;  %v4945_v28 = vpop.f32.mrf.mxu0 }
 0x129   :  { %5973 = vst [vmem:[#allocation20_spill] sm:$0xff] %v4945_v28  ;;  %v373_v54 = vpop.f32.mrf.mxu1  ;;  %v3979_v28 = vld [vmem:[%s5957_s0 + $0x48] sm:$0xff] }
 0x12a   :  { %911 = vst.msk [vmem:[#allocation2 + $0xf8] sm:$0xff] %vm446_vm2, %v863_v51  ;;  %v434_v59 = vadd.f32 %v4601_v43, %v373_v54 }
 0x12b   :  { %3855 = vmatmul.msk.f32.gmra.mxu0 %vm133_vm1, %v4575_v40  ;;  %3933 = vmatmul.msk.f32.gmra.mxu2 %vm133_vm1, %v4530_v35  ;;  %v529_v11 = vld [vmem:[#allocation2 + $0x118] sm:$0xff] }
 0x12c   :  { %483 = vst.msk [vmem:[#allocation2 + $0x128] sm:$0xff] %vm446_vm2, %v434_v59  ;;  %3880 = vmatmul.msk.f32.gmra.mxu1 %vm133_vm1, %v4575_v40  ;;  %3958 = vmatmul.msk.f32.gmra.mxu3 %vm133_vm1, %v4530_v35  ;;  %v4973_v35 = vpop.f32.mrf.mxu2 }
 0x12f   :  { %v808_v61 = vpop.f32.mrf.mxu3 }
 0x130   :  { %v865_v2 = vadd.f32 %v808_v61, %v527_v34  ;;  %v4960_v29 = vpop.f32.mrf.mxu0 }
 0x131   :  { %5974 = vst [vmem:[#allocation21_spill] sm:$0xff] %v4960_v29  ;;  %v376_v5 = vpop.f32.mrf.mxu1 }
 0x132   :  { %913 = vst.msk [vmem:[#allocation2 + $0x108] sm:$0xff] %vm446_vm2, %v865_v2  ;;  %v436_v6 = vadd.f32 %v4601_v43, %v376_v5 }
 0x133   :  { %3856 = vmatmul.msk.f32.gmra.mxu0 %vm133_vm1, %v4588_v41  ;;  %3934 = vmatmul.msk.f32.gmra.mxu2 %vm133_vm1, %v4543_v36  ;;  %v531_v33 = vld [vmem:[#allocation2 + $0x128] sm:$0xff] }
 0x134   :  { %485 = vst.msk [vmem:[#allocation2 + $0x138] sm:$0xff] %vm446_vm2, %v436_v6  ;;  %3881 = vmatmul.msk.f32.gmra.mxu1 %vm133_vm1, %v4588_v41  ;;  %3959 = vmatmul.msk.f32.gmra.mxu3 %vm133_vm1, %v4543_v36  ;;  %v3998_v36 = vld [vmem:[%s5958_s1 + $0x100] sm:$0xff]  ;;  %v4994_v42 = vpop.f32.mrf.mxu2  ;;  %v929_v6 = vld [vmem:[#allocation2 + $0x8] sm:$0xff] }
 0x135   :  { %1971 = vmatpush.msra.mxu0 %v3998_v36  ;;  %v931_v36 = vld [vmem:[#allocation2 + $0x18] sm:$0xff] }
 0x137   :  { %v811_v26 = vpop.f32.mrf.mxu3 }
 0x138   :  { %v867_v14 = vadd.f32 %v811_v26, %v529_v11  ;;  %v4975_v32 = vpop.f32.mrf.mxu0 }
 0x139   :  { %5975 = vst [vmem:[#allocation22_spill] sm:$0xff] %v4975_v32  ;;  %v379_v9 = vpop.f32.mrf.mxu1 }
 0x13a   :  { %915 = vst.msk [vmem:[#allocation2 + $0x118] sm:$0xff] %vm446_vm2, %v867_v14  ;;  %v438_v20 = vadd.f32 %v4601_v43, %v379_v9 }
 0x13b   :  { %3857 = vmatmul.msk.f32.gmra.mxu0 %vm133_vm1, %v4608_v45  ;;  %3935 = vmatmul.msk.f32.gmra.mxu2 %vm133_vm1, %v4556_v37  ;;  %v533_v34 = vld [vmem:[#allocation2 + $0x138] sm:$0xff] }
 0x13c   :  { %487 = vst.msk [vmem:[#allocation2 + $0x148] sm:$0xff] %vm446_vm2, %v438_v20  ;;  %3882 = vmatmul.msk.f32.gmra.mxu1 %vm133_vm1, %v4608_v45  ;;  %3960 = vmatmul.msk.f32.gmra.mxu3 %vm133_vm1, %v4556_v37 }
 0x13f   :  { %v814_v49 = vpop.f32.mrf.mxu3 }
 0x140   :  { %v869_v51 = vadd.f32 %v814_v49, %v531_v33  ;;  %v4996_v54 = vpop.f32.mrf.mxu0 }
 0x141   :  { %5976 = vst [vmem:[#allocation23_spill] sm:$0xff] %v4996_v54  ;;  %v382_v59 = vpop.f32.mrf.mxu1 }
 0x142   :  { %917 = vst.msk [vmem:[#allocation2 + $0x128] sm:$0xff] %vm446_vm2, %v869_v51  ;;  %v440_v37 = vadd.f32 %v4601_v43, %v382_v59  ;;  %v5011_v43 = vpop.f32.mrf.mxu2 }
 0x143   :  { %3858 = vmatmul.msk.f32.gmra.mxu0 %vm133_vm1, %v4637_v56  ;;  %3936 = vmatmul.msk.f32.gmra.mxu2 %vm133_vm1, %v4575_v40  ;;  %5977 = vst [vmem:[#allocation24_spill] sm:$0xff] %v5011_v43 }
 0x144   :  { %489 = vst.msk [vmem:[#allocation2 + $0x158] sm:$0xff] %vm446_vm2, %v440_v37  ;;  %3883 = vmatmul.msk.f32.gmra.mxu1 %vm133_vm1, %v4637_v56  ;;  %3961 = vmatmul.msk.f32.gmra.mxu3 %vm133_vm1, %v4575_v40  ;;  %v535_v40 = vld [vmem:[#allocation2 + $0x148] sm:$0xff] }
 0x147   :  { %v817_v61 = vpop.f32.mrf.mxu3 }
 0x148   :  { %v871_v2 = vadd.f32 %v817_v61, %v533_v34  ;;  %v5009_v5 = vpop.f32.mrf.mxu0  ;;  %v933_v34 = vld [vmem:[#allocation2 + $0x28] sm:$0xff] }
 0x149   :  { %v1194_v11 = vpop.f32.mrf.mxu1 }
 0x14a   :  { %919 = vst.msk [vmem:[#allocation2 + $0x138] sm:$0xff] %vm446_vm2, %v871_v2  ;;  %v1267_v26 = vadd.f32 %v1194_v11, %v929_v6  ;;  %v5026_v49 = vpop.f32.mrf.mxu2  ;;  %v539_v6 = vld [vmem:[#allocation2 + $0x168] sm:$0xff] }
 0x14b   :  { %3859 = vmatmul.msk.f32.gmra.mxu0 %vm133_vm1, %v4657_v0  ;;  %3937 = vmatmul.msk.f32.gmra.mxu2 %vm133_vm1, %v4588_v41  ;;  %5978 = vst [vmem:[#allocation25_spill] sm:$0xff] %v5026_v49 }
 0x14c   :  { %1315 = vst.msk [vmem:[#allocation2 + $0x8] sm:$0xff] %vm446_vm2, %v1267_v26  ;;  %3884 = vmatmul.msk.f32.gmra.mxu1 %vm133_vm1, %v4657_v0  ;;  %3962 = vmatmul.msk.f32.gmra.mxu3 %vm133_vm1, %v4588_v41  ;;  %v537_v41 = vld [vmem:[#allocation2 + $0x158] sm:$0xff] }
 0x14f   :  { %v820_v14 = vpop.f32.mrf.mxu3 }
 0x150   :  { %v873_v9 = vadd.f32 %v820_v14, %v535_v40  ;;  %v5023_v20 = vpop.f32.mrf.mxu0  ;;  %v935_v14 = vld [vmem:[#allocation2 + $0x38] sm:$0xff] }
 0x151   :  { %v1197_v39 = vpop.f32.mrf.mxu1 }
 0x152   :  { %921 = vst.msk [vmem:[#allocation2 + $0x148] sm:$0xff] %vm446_vm2, %v873_v9  ;;  %v1269_v33 = vadd.f32 %v1197_v39, %v931_v36  ;;  %v541_v39 = vld [vmem:[#allocation2 + $0x178] sm:$0xff] }
 0x153   :  { %3860 = vmatmul.msk.f32.gmra.mxu0 %vm133_vm1, %v4683_v10  ;;  %3938 = vmatmul.msk.f32.gmra.mxu2 %vm133_vm1, %v4608_v45 }
 0x154   :  { %1317 = vst.msk [vmem:[#allocation2 + $0x18] sm:$0xff] %vm446_vm2, %v1269_v33  ;;  %3885 = vmatmul.msk.f32.gmra.mxu1 %vm133_vm1, %v4683_v10  ;;  %3963 = vmatmul.msk.f32.gmra.mxu3 %vm133_vm1, %v4608_v45  ;;  %v5049_v45 = vpop.f32.mrf.mxu2 }
 0x155   :  { %5979 = vst [vmem:[#allocation26_spill] sm:$0xff] %v5049_v45 }
 0x157   :  { %v823_v51 = vpop.f32.mrf.mxu3 }
 0x158   :  { %v875_v59 = vadd.f32 %v823_v51, %v537_v41  ;;  %v5037_v37 = vpop.f32.mrf.mxu0 }
 0x159   :  { %v1200_v61 = vpop.f32.mrf.mxu1  ;;  %v969_v1 = vld [vmem:[#allocation2 + $0x148] sm:$0xff] }
 0x15a   :  { %923 = vst.msk [vmem:[#allocation2 + $0x158] sm:$0xff] %vm446_vm2, %v875_v59  ;;  %v1271_v2 = vadd.f32 %v1200_v61, %v933_v34  ;;  %v5070_v59 = vld [vmem:[%s5957_s0 + $0xb0] sm:$0xff]  ;;  %v937_v34 = vld [vmem:[#allocation2 + $0x48] sm:$0xff] }
 0x15b   :  { %3861 = vmatmul.msk.f32.gmra.mxu0 %vm133_vm1, %v4701_v17  ;;  %3939 = vmatmul.msk.f32.gmra.mxu2 %vm133_vm1, %v4637_v56 }
 0x15c   :  { %1319 = vst.msk [vmem:[#allocation2 + $0x28] sm:$0xff] %vm446_vm2, %v1271_v2  ;;  %3886 = vmatmul.msk.f32.gmra.mxu1 %vm133_vm1, %v4701_v17  ;;  %3964 = vmatmul.msk.f32.gmra.mxu3 %vm133_vm1, %v4637_v56  ;;  %v5063_v56 = vpop.f32.mrf.mxu2 }
 0x15d   :  { %5980 = vst [vmem:[#allocation27_spill] sm:$0xff] %v5063_v56  ;;  %v955_v56 = vld [vmem:[#allocation2 + $0xd8] sm:$0xff] }
 0x15f   :  { %v826_v11 = vpop.f32.mrf.mxu3 }
 0x160   :  { %v877_v26 = vadd.f32 %v826_v11, %v539_v6  ;;  %v5051_v40 = vpop.f32.mrf.mxu0 }
 0x161   :  { %v1203_v9 = vpop.f32.mrf.mxu1 }
 0x162   :  { %925 = vst.msk [vmem:[#allocation2 + $0x168] sm:$0xff] %vm446_vm2, %v877_v26  ;;  %v1273_v36 = vadd.f32 %v1203_v9, %v935_v14  ;;  %v5087_v14 = vld [vmem:[%s5957_s0 + $0xb8] sm:$0xff] }
 0x163   :  { %3862 = vmatmul.msk.f32.gmra.mxu0 %vm133_vm1, %v4721_v38  ;;  %3940 = vmatmul.msk.f32.gmra.mxu2 %vm133_vm1, %v4657_v0 }
 0x164   :  { %1321 = vst.msk [vmem:[#allocation2 + $0x38] sm:$0xff] %vm446_vm2, %v1273_v36  ;;  %3887 = vmatmul.msk.f32.gmra.mxu1 %vm133_vm1, %v4721_v38  ;;  %3965 = vmatmul.msk.f32.gmra.mxu3 %vm133_vm1, %v4657_v0  ;;  %v1363_v0 = vld [vmem:[#allocation2 + $0x8] sm:$0xff]  ;;  %v5089_v9 = vpop.f32.mrf.mxu2  ;;  %v939_v36 = vld [vmem:[#allocation2 + $0x58] sm:$0xff] }
 0x165   :  { %5981 = vst [vmem:[#allocation28_spill] sm:$0xff] %v5089_v9 }
 0x167   :  { %v829_v33 = vpop.f32.mrf.mxu3 }
 0x168   :  { %v879_v41 = vadd.f32 %v829_v33, %v541_v39  ;;  %v5065_v51 = vpop.f32.mrf.mxu0 }
 0x169   :  { %v1206_v61 = vpop.f32.mrf.mxu1 }
 0x16a   :  { %927 = vst.msk [vmem:[#allocation2 + $0x178] sm:$0xff] %vm446_vm2, %v879_v41  ;;  %v1275_v2 = vadd.f32 %v1206_v61, %v937_v34 }
 0x16b   :  { %3863 = vmatmul.msk.f32.gmra.mxu0 %vm133_vm1, %v5070_v59  ;;  %3941 = vmatmul.msk.f32.gmra.mxu2 %vm133_vm1, %v4683_v10 }
 0x16c   :  { %1323 = vst.msk [vmem:[#allocation2 + $0x48] sm:$0xff] %vm446_vm2, %v1275_v2  ;;  %3888 = vmatmul.msk.f32.gmra.mxu1 %vm133_vm1, %v5070_v59  ;;  %3966 = vmatmul.msk.f32.gmra.mxu3 %vm133_vm1, %v4683_v10  ;;  %v1365_v10 = vld [vmem:[#allocation2 + $0x18] sm:$0xff]  ;;  %v941_v2 = vld [vmem:[#allocation2 + $0x68] sm:$0xff] }
 0x16f   :  { %v1628_v6 = vpop.f32.mrf.mxu3 }
 0x170   :  { %v1701_v11 = vadd.f32 %v1628_v6, %v1363_v0  ;;  %v5082_v26 = vpop.f32.mrf.mxu0 }
 0x171   :  { %v1209_v39 = vpop.f32.mrf.mxu1 }
 0x172   :  { %1749 = vst.msk [vmem:[#allocation2 + $0x8] sm:$0xff] %vm446_vm2, %v1701_v11  ;;  %v1277_v33 = vadd.f32 %v1209_v39, %v939_v36  ;;  %v5104_v11 = vpop.f32.mrf.mxu2 }
 0x173   :  { %3864 = vmatmul.msk.f32.gmra.mxu0 %vm133_vm1, %v5087_v14  ;;  %3942 = vmatmul.msk.f32.gmra.mxu2 %vm133_vm1, %v4701_v17  ;;  %5982 = vst [vmem:[#allocation29_spill] sm:$0xff] %v5104_v11 }
 0x174   :  { %1325 = vst.msk [vmem:[#allocation2 + $0x58] sm:$0xff] %vm446_vm2, %v1277_v33  ;;  %3889 = vmatmul.msk.f32.gmra.mxu1 %vm133_vm1, %v5087_v14  ;;  %3967 = vmatmul.msk.f32.gmra.mxu3 %vm133_vm1, %v4701_v17  ;;  %v1367_v17 = vld [vmem:[#allocation2 + $0x28] sm:$0xff] }
 0x177   :  { %v1631_v41 = vpop.f32.mrf.mxu3 }
 0x178   :  { %v1703_v34 = vadd.f32 %v1631_v41, %v1365_v10  ;;  %v5101_v61 = vpop.f32.mrf.mxu0  ;;  %v5120_v10 = vld [vmem:[%s5957_s0 + $0xc8] sm:$0xff]  ;;  %v943_v41 = vld [vmem:[#allocation2 + $0x78] sm:$0xff] }
 0x179   :  { %v1212_v0 = vpop.f32.mrf.mxu1 }
 0x17a   :  { %1751 = vst.msk [vmem:[#allocation2 + $0x18] sm:$0xff] %vm446_vm2, %v1703_v34  ;;  %v1279_v6 = vadd.f32 %v1212_v0, %v941_v2  ;;  %v1369_v0 = vld [vmem:[#allocation2 + $0x38] sm:$0xff] }
 0x17b   :  { %3865 = vmatmul.msk.f32.gmra.mxu0 %vm133_vm1, %v4808_v19  ;;  %3943 = vmatmul.msk.f32.gmra.mxu2 %vm133_vm1, %v4721_v38 }
 0x17c   :  { %1327 = vst.msk [vmem:[#allocation2 + $0x68] sm:$0xff] %vm446_vm2, %v1279_v6  ;;  %3890 = vmatmul.msk.f32.gmra.mxu1 %vm133_vm1, %v4808_v19  ;;  %3968 = vmatmul.msk.f32.gmra.mxu3 %vm133_vm1, %v4721_v38  ;;  %v5132_v38 = vpop.f32.mrf.mxu2 }
 0x17d   :  { %5983 = vst [vmem:[#allocation30_spill] sm:$0xff] %v5132_v38 }
 0x17f   :  { %v1634_v36 = vpop.f32.mrf.mxu3 }
 0x180   :  { %v1705_v39 = vadd.f32 %v1634_v36, %v1367_v17  ;;  %v5115_v33 = vpop.f32.mrf.mxu0 }
 0x181   :  { %v1215_v34 = vpop.f32.mrf.mxu1 }
 0x182   :  { %1753 = vst.msk [vmem:[#allocation2 + $0x28] sm:$0xff] %vm446_vm2, %v1705_v39  ;;  %v1281_v2 = vadd.f32 %v1215_v34, %v943_v41  ;;  %v3974_v39 = vld [vmem:[%s5957_s0 + $0x20] sm:$0xff]  ;;  %v945_v41 = vld [vmem:[#allocation2 + $0x88] sm:$0xff] }
 0x183   :  { %3866 = vmatmul.msk.f32.gmra.mxu0 %vm133_vm1, %v5120_v10  ;;  %3944 = vmatmul.msk.f32.gmra.mxu2 %vm133_vm1, %v5070_v59 }
 0x184   :  { %1329 = vst.msk [vmem:[#allocation2 + $0x78] sm:$0xff] %vm446_vm2, %v1281_v2  ;;  %3891 = vmatmul.msk.f32.gmra.mxu1 %vm133_vm1, %v5120_v10  ;;  %3969 = vmatmul.msk.f32.gmra.mxu3 %vm133_vm1, %v5070_v59 }
 0x187   :  { %v1637_v6 = vpop.f32.mrf.mxu3 }
 0x188   :  { %v1707_v17 = vadd.f32 %v1637_v6, %v1369_v0  ;;  %v5134_v36 = vpop.f32.mrf.mxu0  ;;  %v5147_v0 = vpop.f32.mrf.mxu2  ;;  %v1371_v6 = vld [vmem:[#allocation2 + $0x48] sm:$0xff] }
 0x189   :  { %v1218_v34 = vpop.f32.mrf.mxu1  ;;  %5984 = vst [vmem:[#allocation31_spill] sm:$0xff] %v5147_v0 }
 0x18a   :  { %1755 = vst.msk [vmem:[#allocation2 + $0x38] sm:$0xff] %vm446_vm2, %v1707_v17  ;;  %v1283_v2 = vadd.f32 %v1218_v34, %v945_v41  ;;  %v3975_v17 = vld [vmem:[%s5957_s0 + $0x28] sm:$0xff]  ;;  %v947_v41 = vld [vmem:[#allocation2 + $0x98] sm:$0xff] }
 0x18b   :  { %3945 = vmatmul.msk.f32.gmra.mxu2 %vm133_vm1, %v5087_v14  ;;  %4007 = vmatmul.msk.f32.vlgmr.msra.gmra.mxu0 %vm133_vm1, %v3974_v39 }
 0x18c   :  { %1331 = vst.msk [vmem:[#allocation2 + $0x88] sm:$0xff] %vm446_vm2, %v1283_v2  ;;  %3970 = vmatmul.msk.f32.gmra.mxu3 %vm133_vm1, %v5087_v14  ;;  %4032 = vmatmul.msk.f32.vlgmr.msra.gmra.mxu1 %vm133_vm1, %v3974_v39 }
 0x18f   :  { %v1640_v54 = vpop.f32.mrf.mxu3 }
 0x190   :  { %v1709_v38 = vadd.f32 %v1640_v54, %v1371_v6  ;;  %v5149_v32 = vpop.f32.mrf.mxu0  ;;  %v1373_v54 = vld [vmem:[#allocation2 + $0x58] sm:$0xff] }
 0x191   :  { %v1221_v34 = vpop.f32.mrf.mxu1 }
 0x192   :  { %1757 = vst.msk [vmem:[#allocation2 + $0x48] sm:$0xff] %vm446_vm2, %v1709_v38  ;;  %v1285_v2 = vadd.f32 %v1221_v34, %v947_v41  ;;  %v3976_v38 = vld [vmem:[%s5957_s0 + $0x30] sm:$0xff]  ;;  %v5167_v41 = vpop.f32.mrf.mxu2  ;;  %v949_v34 = vld [vmem:[#allocation2 + $0xa8] sm:$0xff] }
 0x193   :  { %3946 = vmatmul.msk.f32.gmra.mxu2 %vm133_vm1, %v4808_v19  ;;  %4008 = vmatmul.msk.f32.gmra.mxu0 %vm133_vm1, %v3975_v17  ;;  %5985 = vst [vmem:[#allocation32_spill] sm:$0xff] %v5167_v41 }
 0x194   :  { %1333 = vst.msk [vmem:[#allocation2 + $0x98] sm:$0xff] %vm446_vm2, %v1285_v2  ;;  %3971 = vmatmul.msk.f32.gmra.mxu3 %vm133_vm1, %v4808_v19  ;;  %4033 = vmatmul.msk.f32.gmra.mxu1 %vm133_vm1, %v3975_v17  ;;  %v1375_v19 = vld [vmem:[#allocation2 + $0x68] sm:$0xff] }
 0x197   :  { %v1643_v39 = vpop.f32.mrf.mxu3 }
 0x198   :  { %v1711_v6 = vadd.f32 %v1643_v39, %v1373_v54  ;;  %v5162_v0 = vpop.f32.mrf.mxu0 }
 0x199   :  { %v1224_v11 = vpop.f32.mrf.mxu1 }
 0x19a   :  { %1759 = vst.msk [vmem:[#allocation2 + $0x58] sm:$0xff] %vm446_vm2, %v1711_v6  ;;  %v1287_v2 = vadd.f32 %v1224_v11, %v949_v34  ;;  %v5182_v11 = vld [vmem:[%s5957_s0 + $0xd0] sm:$0xff]  ;;  %v3977_v6 = vld [vmem:[%s5957_s0 + $0x38] sm:$0xff] }
 0x19b   :  { %3947 = vmatmul.msk.f32.gmra.mxu2 %vm133_vm1, %v5120_v10  ;;  %4009 = vmatmul.msk.f32.gmra.mxu0 %vm133_vm1, %v3976_v38  ;;  %v951_v34 = vld [vmem:[#allocation2 + $0xb8] sm:$0xff] }
 0x19c   :  { %1335 = vst.msk [vmem:[#allocation2 + $0xa8] sm:$0xff] %vm446_vm2, %v1287_v2  ;;  %3972 = vmatmul.msk.f32.gmra.mxu3 %vm133_vm1, %v5120_v10  ;;  %4034 = vmatmul.msk.f32.gmra.mxu1 %vm133_vm1, %v3976_v38  ;;  %v5188_v38 = vpop.f32.mrf.mxu2 }
 0x19d   :  { %5986 = vst [vmem:[#allocation33_spill] sm:$0xff] %v5188_v38 }
 0x19f   :  { %v1646_v17 = vpop.f32.mrf.mxu3 }
 0x1a0   :  { %v1713_v54 = vadd.f32 %v1646_v17, %v1375_v19  ;;  %v5177_v39 = vpop.f32.mrf.mxu0  ;;  %v1377_v19 = vld [vmem:[#allocation2 + $0x78] sm:$0xff] }
 0x1a1   :  { %v1227_v2 = vpop.f32.mrf.mxu1 }
 0x1a2   :  { %1761 = vst.msk [vmem:[#allocation2 + $0x68] sm:$0xff] %vm446_vm2, %v1713_v54  ;;  %v1289_v41 = vadd.f32 %v1227_v2, %v951_v34  ;;  %v3978_v54 = vld [vmem:[%s5957_s0 + $0x40] sm:$0xff]  ;;  %v953_v34 = vld [vmem:[#allocation2 + $0xc8] sm:$0xff] }
 0x1a3   :  { %3948 = vmatmul.msk.f32.gmra.mxu2 %vm133_vm1, %v5182_v11  ;;  %4010 = vmatmul.msk.f32.gmra.mxu0 %vm133_vm1, %v3977_v6 }
 0x1a4   :  { %1337 = vst.msk [vmem:[#allocation2 + $0xb8] sm:$0xff] %vm446_vm2, %v1289_v41  ;;  %3973 = vmatmul.msk.f32.gmra.mxu3 %vm133_vm1, %v5182_v11  ;;  %4035 = vmatmul.msk.f32.gmra.mxu1 %vm133_vm1, %v3977_v6  ;;  %v1379_v41 = vld [vmem:[#allocation2 + $0x88] sm:$0xff]  ;;  %v5247_v49 = vpop.f32.mrf.mxu2 }
 0x1a7   :  { %v1649_v17 = vpop.f32.mrf.mxu3 }
 0x1a8   :  { %v1715_v29 = vadd.f32 %v1649_v17, %v1377_v19  ;;  %v5197_v9 = vpop.f32.mrf.mxu0 }
 0x1a9   :  { %v1230_v2 = vpop.f32.mrf.mxu1 }
 0x1aa   :  { %1763 = vst.msk [vmem:[#allocation2 + $0x78] sm:$0xff] %vm446_vm2, %v1715_v29  ;;  %v1291_v38 = vadd.f32 %v1230_v2, %v953_v34 }
 0x1ab   :  { %4011 = vmatmul.msk.f32.gmra.mxu0 %vm133_vm1, %v3978_v54 }
 0x1ac   :  { %1339 = vst.msk [vmem:[#allocation2 + $0xc8] sm:$0xff] %vm446_vm2, %v1291_v38  ;;  %4036 = vmatmul.msk.f32.gmra.mxu1 %vm133_vm1, %v3978_v54  ;;  %v1381_v38 = vld [vmem:[#allocation2 + $0x98] sm:$0xff] }
 0x1af   :  { %v1652_v6 = vpop.f32.mrf.mxu3 }
 0x1b0   :  { %v1717_v19 = vadd.f32 %v1652_v6, %v1379_v41  ;;  %v5206_v17 = vpop.f32.mrf.mxu0  ;;  %v3980_v41 = vld [vmem:[%s5957_s0 + $0x50] sm:$0xff]  ;;  %v957_v6 = vld [vmem:[#allocation2 + $0xe8] sm:$0xff] }
 0x1b1   :  { %v1233_v22 = vpop.f32.mrf.mxu1 }
 0x1b2   :  { %1765 = vst.msk [vmem:[#allocation2 + $0x88] sm:$0xff] %vm446_vm2, %v1717_v19  ;;  %v1293_v29 = vadd.f32 %v1233_v22, %v955_v56 }
 0x1b3   :  { %4012 = vmatmul.msk.f32.gmra.mxu0 %vm133_vm1, %v3979_v28 }
 0x1b4   :  { %1341 = vst.msk [vmem:[#allocation2 + $0xd8] sm:$0xff] %vm446_vm2, %v1293_v29  ;;  %4037 = vmatmul.msk.f32.gmra.mxu1 %vm133_vm1, %v3979_v28  ;;  %v1383_v28 = vld [vmem:[#allocation2 + $0xa8] sm:$0xff] }
 0x1b7   :  { %v1655_v54 = vpop.f32.mrf.mxu3 }
 0x1b8   :  { %v1719_v34 = vadd.f32 %v1655_v54, %v1381_v38  ;;  %v5215_v2 = vpop.f32.mrf.mxu0  ;;  %v3981_v38 = vld [vmem:[%s5957_s0 + $0x58] sm:$0xff] }
 0x1b9   :  { %5987 = vst [vmem:[#allocation34_spill] sm:$0xff] %v5215_v2  ;;  %v1236_v45 = vpop.f32.mrf.mxu1  ;;  %v959_v54 = vld [vmem:[#allocation2 + $0xf8] sm:$0xff] }
 0x1ba   :  { %1767 = vst.msk [vmem:[#allocation2 + $0x98] sm:$0xff] %vm446_vm2, %v1719_v34  ;;  %v1295_v22 = vadd.f32 %v1236_v45, %v957_v6  ;;  %v1385_v34 = vld [vmem:[#allocation2 + $0xb8] sm:$0xff] }
 0x1bb   :  { %4013 = vmatmul.msk.f32.gmra.mxu0 %vm133_vm1, %v3980_v41  ;;  %v971_v2 = vld [vmem:[#allocation2 + $0x158] sm:$0xff] }
 0x1bc   :  { %1343 = vst.msk [vmem:[#allocation2 + $0xe8] sm:$0xff] %vm446_vm2, %v1295_v22  ;;  %4038 = vmatmul.msk.f32.gmra.mxu1 %vm133_vm1, %v3980_v41 }
 0x1bf   :  { %v1658_v56 = vpop.f32.mrf.mxu3 }
 0x1c0   :  { %v1721_v19 = vadd.f32 %v1658_v56, %v1383_v28  ;;  %v5224_v29 = vpop.f32.mrf.mxu0  ;;  %v3982_v28 = vld [vmem:[%s5957_s0 + $0x60] sm:$0xff]  ;;  %v961_v56 = vld [vmem:[#allocation2 + $0x108] sm:$0xff] }
 0x1c1   :  { %5988 = vst [vmem:[#allocation35_spill] sm:$0xff] %v5224_v29  ;;  %v1239_v13 = vpop.f32.mrf.mxu1 }
 0x1c2   :  { %1769 = vst.msk [vmem:[#allocation2 + $0xa8] sm:$0xff] %vm446_vm2, %v1721_v19  ;;  %v1297_v45 = vadd.f32 %v1239_v13, %v959_v54  ;;  %v1387_v19 = vld [vmem:[#allocation2 + $0xc8] sm:$0xff] }
 0x1c3   :  { %4014 = vmatmul.msk.f32.gmra.mxu0 %vm133_vm1, %v3981_v38 }
 0x1c4   :  { %1345 = vst.msk [vmem:[#allocation2 + $0xf8] sm:$0xff] %vm446_vm2, %v1297_v45  ;;  %4039 = vmatmul.msk.f32.gmra.mxu1 %vm133_vm1, %v3981_v38 }
 0x1c7   :  { %v1661_v41 = vpop.f32.mrf.mxu3 }
 0x1c8   :  { %v1723_v6 = vadd.f32 %v1661_v41, %v1385_v34  ;;  %v5233_v22 = vpop.f32.mrf.mxu0  ;;  %v3983_v34 = vld [vmem:[%s5957_s0 + $0x68] sm:$0xff]  ;;  %v963_v41 = vld [vmem:[#allocation2 + $0x118] sm:$0xff] }
 0x1c9   :  { %5989 = vst [vmem:[#allocation36_spill] sm:$0xff] %v5233_v22  ;;  %v1242_v29 = vpop.f32.mrf.mxu1 }
 0x1ca   :  { %1771 = vst.msk [vmem:[#allocation2 + $0xb8] sm:$0xff] %vm446_vm2, %v1723_v6  ;;  %v1299_v13 = vadd.f32 %v1242_v29, %v961_v56  ;;  %v1389_v6 = vld [vmem:[#allocation2 + $0xd8] sm:$0xff] }
 0x1cb   :  { %4015 = vmatmul.msk.f32.gmra.mxu0 %vm133_vm1, %v3982_v28 }
 0x1cc   :  { %1347 = vst.msk [vmem:[#allocation2 + $0x108] sm:$0xff] %vm446_vm2, %v1299_v13  ;;  %4040 = vmatmul.msk.f32.gmra.mxu1 %vm133_vm1, %v3982_v28 }
 0x1cf   :  { %v1664_v38 = vpop.f32.mrf.mxu3 }
 0x1d0   :  { %v1725_v54 = vadd.f32 %v1664_v38, %v1387_v19  ;;  %v5242_v45 = vpop.f32.mrf.mxu0  ;;  %v3984_v19 = vld [vmem:[%s5957_s0 + $0x70] sm:$0xff]  ;;  %v965_v38 = vld [vmem:[#allocation2 + $0x128] sm:$0xff] }
 0x1d1   :  { %5990 = vst [vmem:[#allocation37_spill] sm:$0xff] %v5242_v45  ;;  %v1245_v22 = vpop.f32.mrf.mxu1 }
 0x1d2   :  { %1773 = vst.msk [vmem:[#allocation2 + $0xc8] sm:$0xff] %vm446_vm2, %v1725_v54  ;;  %v1301_v29 = vadd.f32 %v1245_v22, %v963_v41  ;;  %v5260_v54 = vpop.f32.mrf.mxu2 }
 0x1d3   :  { %4016 = vmatmul.msk.f32.gmra.mxu0 %vm133_vm1, %v3983_v34 }
 0x1d4   :  { %1349 = vst.msk [vmem:[#allocation2 + $0x118] sm:$0xff] %vm446_vm2, %v1301_v29  ;;  %4041 = vmatmul.msk.f32.gmra.mxu1 %vm133_vm1, %v3983_v34  ;;  %v1391_v34 = vld [vmem:[#allocation2 + $0xe8] sm:$0xff] }
 0x1d7   :  { %v1667_v28 = vpop.f32.mrf.mxu3 }
 0x1d8   :  { %v1727_v56 = vadd.f32 %v1667_v28, %v1389_v6  ;;  %v5253_v13 = vpop.f32.mrf.mxu0  ;;  %v3985_v28 = vld [vmem:[%s5957_s0 + $0x78] sm:$0xff] }
 0x1d9   :  { %5991 = vst [vmem:[#allocation38_spill] sm:$0xff] %v5253_v13  ;;  %v1248_v45 = vpop.f32.mrf.mxu1  ;;  %v967_v13 = vld [vmem:[#allocation2 + $0x138] sm:$0xff] }
 0x1da   :  { %1775 = vst.msk [vmem:[#allocation2 + $0xd8] sm:$0xff] %vm446_vm2, %v1727_v56  ;;  %v1303_v22 = vadd.f32 %v1248_v45, %v965_v38  ;;  %v1393_v38 = vld [vmem:[#allocation2 + $0xf8] sm:$0xff] }
 0x1db   :  { %4017 = vmatmul.msk.f32.gmra.mxu0 %vm133_vm1, %v3984_v19 }
 0x1dc   :  { %1351 = vst.msk [vmem:[#allocation2 + $0x128] sm:$0xff] %vm446_vm2, %v1303_v22  ;;  %4042 = vmatmul.msk.f32.gmra.mxu1 %vm133_vm1, %v3984_v19  ;;  %v5273_v19 = vpop.f32.mrf.mxu2 }
 0x1df   :  { %v1670_v41 = vpop.f32.mrf.mxu3 }
 0x1e0   :  { %v1729_v29 = vadd.f32 %v1670_v41, %v1391_v34  ;;  %v5264_v6 = vpop.f32.mrf.mxu0 }
 0x1e1   :  { %5992 = vst [vmem:[#allocation39_spill] sm:$0xff] %v5264_v6  ;;  %v1251_v56 = vpop.f32.mrf.mxu1  ;;  %v3986_v6 = vld [vmem:[%s5957_s0 + $0x80] sm:$0xff] }
 0x1e2   :  { %1777 = vst.msk [vmem:[#allocation2 + $0xe8] sm:$0xff] %vm446_vm2, %v1729_v29  ;;  %v1305_v45 = vadd.f32 %v1251_v56, %v967_v13 }
 0x1e3   :  { %4018 = vmatmul.msk.f32.gmra.mxu0 %vm133_vm1, %v3985_v28 }
 0x1e4   :  { %1353 = vst.msk [vmem:[#allocation2 + $0x138] sm:$0xff] %vm446_vm2, %v1305_v45  ;;  %4043 = vmatmul.msk.f32.gmra.mxu1 %vm133_vm1, %v3985_v28  ;;  %v1395_v28 = vld [vmem:[#allocation2 + $0x108] sm:$0xff]  ;;  %v5284_v45 = vpop.f32.mrf.mxu2 }
 0x1e7   :  { %v1673_v22 = vpop.f32.mrf.mxu3 }
 0x1e8   :  { %v1731_v34 = vadd.f32 %v1673_v22, %v1393_v38  ;;  %v5275_v41 = vpop.f32.mrf.mxu0 }
 0x1e9   :  { %5993 = vst [vmem:[#allocation40_spill] sm:$0xff] %v5275_v41  ;;  %v1254_v29 = vpop.f32.mrf.mxu1  ;;  %v3987_v41 = vld [vmem:[%s5957_s0 + $0x88] sm:$0xff] }
 0x1ea   :  { %1779 = vst.msk [vmem:[#allocation2 + $0xf8] sm:$0xff] %vm446_vm2, %v1731_v34  ;;  %v1307_v13 = vadd.f32 %v1254_v29, %v969_v1  ;;  %v2599_v29 = vld [vmem:[#allocation6 + $0x88] sm:$0xff] }
 0x1eb   :  { %4019 = vmatmul.msk.f32.gmra.mxu0 %vm133_vm1, %v3986_v6  ;;  %2679 = vmatpush.msrb.mxu3 %v2599_v29 }
 0x1ec   :  { %1355 = vst.msk [vmem:[#allocation2 + $0x148] sm:$0xff] %vm446_vm2, %v1307_v13  ;;  %4044 = vmatmul.msk.f32.gmra.mxu1 %vm133_vm1, %v3986_v6  ;;  %v2597_v6 = vld [vmem:[#allocation6 + $0x78] sm:$0xff]  ;;  %v5300_v43 = vpop.f32.mrf.mxu2 }
 0x1ed   :  { %2624 = vmatpush.msrb.mxu2 %v2597_v6  ;;  %v1397_v13 = vld [vmem:[#allocation2 + $0x118] sm:$0xff] }
 0x1ef   :  { %v1676_v56 = vpop.f32.mrf.mxu3 }
 0x1f0   :  { %v1733_v38 = vadd.f32 %v1676_v56, %v1395_v28  ;;  %v5286_v22 = vpop.f32.mrf.mxu0 }
 0x1f1   :  { %5994 = vst [vmem:[#allocation41_spill] sm:$0xff] %v5286_v22  ;;  %v1257_v34 = vpop.f32.mrf.mxu1 }
 0x1f2   :  { %1781 = vst.msk [vmem:[#allocation2 + $0x108] sm:$0xff] %vm446_vm2, %v1733_v38  ;;  %v1309_v1 = vadd.f32 %v1257_v34, %v971_v2  ;;  %v3988_v38 = vld [vmem:[%s5957_s0 + $0x90] sm:$0xff]  ;;  %v973_v2 = vld [vmem:[#allocation2 + $0x168] sm:$0xff] }
 0x1f3   :  { %4020 = vmatmul.msk.f32.gmra.mxu0 %vm133_vm1, %v3987_v41 }
 0x1f4   :  { %1357 = vst.msk [vmem:[#allocation2 + $0x158] sm:$0xff] %vm446_vm2, %v1309_v1  ;;  %4045 = vmatmul.msk.f32.gmra.mxu1 %vm133_vm1, %v3987_v41  ;;  %v1399_v1 = vld [vmem:[#allocation2 + $0x128] sm:$0xff] }
 0x1f7   :  { %v1679_v28 = vpop.f32.mrf.mxu3 }
 0x1f8   :  { %v1735_v56 = vadd.f32 %v1679_v28, %v1397_v13  ;;  %v5295_v22 = vpop.f32.mrf.mxu0  ;;  %v3989_v28 = vld [vmem:[%s5957_s0 + $0x98] sm:$0xff] }
 0x1f9   :  { %5995 = vst [vmem:[#allocation42_spill] sm:$0xff] %v5295_v22  ;;  %v1260_v34 = vpop.f32.mrf.mxu1  ;;  %v397_v22 = vadd.f32 %v4626_v50, %v4603_v44 }
 0x1fa   :  { %1783 = vst.msk [vmem:[#allocation2 + $0x118] sm:$0xff] %vm446_vm2, %v1735_v56  ;;  %v1311_v41 = vadd.f32 %v1260_v34, %v973_v2  ;;  %v975_v56 = vld [vmem:[#allocation2 + $0x178] sm:$0xff] }
 0x1fb   :  { %4021 = vmatmul.msk.f32.gmra.mxu0 %vm133_vm1, %v3988_v38 }
 0x1fc   :  { %1359 = vst.msk [vmem:[#allocation2 + $0x168] sm:$0xff] %vm446_vm2, %v1311_v41  ;;  %4046 = vmatmul.msk.f32.gmra.mxu1 %vm133_vm1, %v3988_v38  ;;  %v832_v41 = vadd.f32 %v4714_v21, %v397_v22  ;;  %v5316_v38 = vpop.f32.mrf.mxu2  ;;  %v3990_v21 = vld [vmem:[%s5957_s0 + $0xa0] sm:$0xff]  ;;  %v399_v22 = vadd.f32 %v4626_v50, %v4632_v55 }
 0x1ff   :  { %v1682_v6 = vpop.f32.mrf.mxu3 }
 0x200   :  { %v1737_v29 = vadd.f32 %v1682_v6, %v1399_v1  ;;  %v5306_v13 = vpop.f32.mrf.mxu0  ;;  %v2596_v1 = vld [vmem:[#allocation6 + $0x70] sm:$0xff]  ;;  %v1266_v6 = vadd.f32 %v5009_v5, %v832_v41  ;;  %v834_v41 = vadd.f32 %v4740_v48, %v399_v22  ;;  %v3991_v48 = vld [vmem:[%s5957_s0 + $0xa8] sm:$0xff]  ;;  %v1799_v22 = vld [vmem:[#allocation2 + $0x18] sm:$0xff] }
 0x201   :  { %5996 = vst [vmem:[#allocation43_spill] sm:$0xff] %v5306_v13  ;;  %v1263_v2 = vpop.f32.mrf.mxu1  ;;  %2625 = vmatpush.msrb.mxu2 %v2596_v1  ;;  %v1401_v13 = vld [vmem:[#allocation2 + $0x138] sm:$0xff]  ;;  %v1403_v1 = vld [vmem:[#allocation2 + $0x148] sm:$0xff] }
 0x202   :  { %1785 = vst.msk [vmem:[#allocation2 + $0x128] sm:$0xff] %vm446_vm2, %v1737_v29  ;;  %v1313_v34 = vadd.f32 %v1263_v2, %v975_v56  ;;  %v1700_v44 = vadd.f32 %v5247_v49, %v1266_v6  ;;  %v1268_v49 = vadd.f32 %v5023_v20, %v834_v41 }
 0x203   :  { %4022 = vmatmul.msk.f32.gmra.mxu0 %vm133_vm1, %v3989_v28 }
 0x204   :  { %1361 = vst.msk [vmem:[#allocation2 + $0x178] sm:$0xff] %vm446_vm2, %v1313_v34  ;;  %4047 = vmatmul.msk.f32.gmra.mxu1 %vm133_vm1, %v3989_v28  ;;  %v1797_v34 = vld [vmem:[#allocation2 + $0x8] sm:$0xff]  ;;  %v1702_v55 = vadd.f32 %v5260_v54, %v1268_v49 }
 0x207   :  { %v1685_v47 = vpop.f32.mrf.mxu3 }
 0x208   :  { %v1739_v29 = vadd.f32 %v1685_v47, %v1401_v13  ;;  %v1973_v56 = vpop.f32.mrf.mxu0  ;;  %v2595_v47 = vld [vmem:[#allocation6 + $0x68] sm:$0xff]  ;;  %v5333_v13 = vpop.f32.mrf.mxu2 }
 0x209   :  { %v2134_v2 = vadd.f32 %v1973_v56, %v1700_v44  ;;  %v2062_v28 = vpop.f32.mrf.mxu1  ;;  %2626 = vmatpush.msrb.mxu2 %v2595_v47  ;;  %v401_v56 = vadd.f32 %v4626_v50, %v4652_v63  ;;  %v1405_v47 = vld [vmem:[#allocation2 + $0x158] sm:$0xff] }
 0x20a   :  { %1787 = vst.msk [vmem:[#allocation2 + $0x138] sm:$0xff] %vm446_vm2, %v1739_v29  ;;  %v2135_v5 = vadd.f32 %v2062_v28, %v1797_v34 }
 0x20b   :  { %4023 = vmatmul.msk.f32.gmra.mxu0 %vm133_vm1, %v3990_v21  ;;  %v836_v28 = vadd.f32 %v4769_v4, %v401_v56 }
 0x20c   :  { %2183 = vst.msk [vmem:[#allocation2 + $0x8] sm:$0xff] %vm446_vm2, %v2135_v5  ;;  %4048 = vmatmul.msk.f32.gmra.mxu1 %vm133_vm1, %v3990_v21 }
 0x20d   :  { %v1270_v5 = vadd.f32 %v5037_v37, %v836_v28  ;;  %v403_v37 = vadd.f32 %v4626_v50, %v4678_v8  ;;  %v2594_v8 = vld [vmem:[#allocation6 + $0x60] sm:$0xff] }
 0x20e   :  { %2627 = vmatpush.msrb.mxu2 %v2594_v8 }
 0x20f   :  { %v1688_v6 = vpop.f32.mrf.mxu3  ;;  %v1704_v63 = vadd.f32 %v5273_v19, %v1270_v5 }
 0x210   :  { %v1741_v44 = vadd.f32 %v1688_v6, %v1403_v1  ;;  %v1976_v29 = vpop.f32.mrf.mxu0  ;;  %v5354_v4 = vpop.f32.mrf.mxu2  ;;  %v1801_v6 = vld [vmem:[#allocation2 + $0x28] sm:$0xff] }
 0x211   :  { %v2136_v21 = vadd.f32 %v1976_v29, %v1702_v55  ;;  %v2065_v34 = vpop.f32.mrf.mxu1  ;;  %v838_v29 = vadd.f32 %v4786_v15, %v403_v37  ;;  %v1407_v15 = vld [vmem:[#allocation2 + $0x168] sm:$0xff] }
 0x212   :  { %1789 = vst.msk [vmem:[#allocation2 + $0x148] sm:$0xff] %vm446_vm2, %v1741_v44  ;;  %v2137_v20 = vadd.f32 %v2065_v34, %v1799_v22 }
 0x213   :  { %4024 = vmatmul.msk.f32.gmra.mxu0 %vm133_vm1, %v3991_v48  ;;  %v2235_v54 = vmax.f32 %v2134_v2, %v2136_v21  ;;  %v1272_v22 = vadd.f32 %v5051_v40, %v838_v29 }
 0x214   :  { %2185 = vst.msk [vmem:[#allocation2 + $0x18] sm:$0xff] %vm446_vm2, %v2137_v20  ;;  %4049 = vmatmul.msk.f32.gmra.mxu1 %vm133_vm1, %v3991_v48  ;;  %v2231_v48 = vld [vmem:[#allocation2 + $0x8] sm:$0xff] }
 0x215   :  { %v5347_v41 = vmax.f32 %v2235_v54, 0.0  ;;  %v1706_v20 = vadd.f32 %v5284_v45, %v1272_v22 }
 0x217   :  { %v1691_v49 = vpop.f32.mrf.mxu3  ;;  %2249 = vrot.lane.b32.xlu1 %v5347_v41, %s4235_s25  ;;  %2241 = vrot.lane.b32.xlu0 %v5347_v41, %s4236_s26 }
 0x218   :  { %v1743_v2 = vadd.f32 %v1691_v49, %v1405_v47  ;;  %v1979_v55 = vpop.f32.mrf.mxu0  ;;  %v1803_v47 = vld [vmem:[#allocation2 + $0x38] sm:$0xff] }
 0x219   :  { %v2138_v1 = vadd.f32 %v1979_v55, %v1704_v63  ;;  %v2068_v19 = vpop.f32.mrf.mxu1  ;;  %v405_v63 = vadd.f32 %v4626_v50, %v4696_v16  ;;  %v2593_v16 = vld [vmem:[#allocation6 + $0x58] sm:$0xff] }
 0x21a   :  { %1791 = vst.msk [vmem:[#allocation2 + $0x158] sm:$0xff] %vm446_vm2, %v1743_v2  ;;  %v2139_v44 = vadd.f32 %v2068_v19, %v1801_v6  ;;  %v5373_v2 = vpop.f32.mrf.mxu2  ;;  %2628 = vmatpush.msrb.mxu2 %v2593_v16 }
 0x21b   :  { %4025 = vmatmul.msk.f32.gmra.mxu0 %vm133_vm1, %v5070_v59  ;;  %v2234_v56 = vld [vmem:[#allocation2 + $0x18] sm:$0xff]  ;;  %v840_v45 = vadd.f32 %v4821_v46, %v405_v63  ;;  %v409_v63 = vadd.f32 %v4626_v50, %v4742_v53 }
 0x21c   :  { %2187 = vst.msk [vmem:[#allocation2 + $0x28] sm:$0xff] %vm446_vm2, %v2139_v44  ;;  %4050 = vmatmul.msk.f32.gmra.mxu1 %vm133_vm1, %v5070_v59  ;;  %v2236_v21 = vmax.f32 %v2231_v48, %v2234_v56  ;;  %v1409_v44 = vld [vmem:[#allocation2 + $0x178] sm:$0xff]  ;;  %v3994_v48 = vld [vmem:[%s5957_s0 + $0xc0] sm:$0xff]  ;;  %v1805_v56 = vld [vmem:[#allocation2 + $0x48] sm:$0xff] }
 0x21d   :  { %v1274_v37 = vadd.f32 %v5065_v51, %v840_v45  ;;  %v844_v45 = vadd.f32 %v4853_v7, %v409_v63 }
 0x21e   :  { %v5366_v34 = vmax.f32 %v2236_v21, 0.0 }
 0x21f   :  { %v1694_v28 = vpop.f32.mrf.mxu3  ;;  %v1708_v19 = vadd.f32 %v5300_v43, %v1274_v37 }
 0x220   :  { %v1745_v54 = vadd.f32 %v1694_v28, %v1407_v15  ;;  %v1982_v5 = vpop.f32.mrf.mxu0  ;;  %2243 = vrot.lane.b32.xlu0 %v5366_v34, %s4236_s26 }
 0x221   :  { %v2140_v59 = vadd.f32 %v1982_v5, %v1706_v20  ;;  %v2071_v49 = vpop.f32.mrf.mxu1 }
 0x222   :  { %1793 = vst.msk [vmem:[#allocation2 + $0x168] sm:$0xff] %vm446_vm2, %v1745_v54  ;;  %v2141_v40 = vadd.f32 %v2071_v49, %v1803_v47  ;;  %v5396_v15 = vpop.f32.mrf.mxu2  ;;  %v1807_v47 = vld [vmem:[#allocation2 + $0x58] sm:$0xff] }
 0x223   :  { %4026 = vmatmul.msk.f32.gmra.mxu0 %vm133_vm1, %v5087_v14  ;;  %v2264_v55 = vmax.f32 %v2138_v1, %v2140_v59  ;;  %v2260_v22 = vld [vmem:[#allocation2 + $0x28] sm:$0xff] }
 0x224   :  { %2189 = vst.msk [vmem:[#allocation2 + $0x38] sm:$0xff] %vm446_vm2, %v2141_v40  ;;  %4051 = vmatmul.msk.f32.gmra.mxu1 %vm133_vm1, %v5087_v14  ;;  %v407_v14 = vadd.f32 %v4626_v50, %v4716_v31 }
 0x225   :  { %v5383_v6 = vmax.f32 %v2264_v55, 0.0  ;;  %v1278_v55 = vadd.f32 %v5101_v61, %v844_v45 }
 0x226   :  { %v842_v8 = vadd.f32 %v4836_v58, %v407_v14  ;;  %v2591_v14 = vld [vmem:[#allocation6 + $0x48] sm:$0xff] }
 0x227   :  { %v1697_v29 = vpop.f32.mrf.mxu3  ;;  %2270 = vrot.lane.b32.xlu1 %v5383_v6, %s4236_s26  ;;  %v1712_v37 = vadd.f32 %v5333_v13, %v1278_v55 }
 0x228   :  { %v1747_v46 = vadd.f32 %v1697_v29, %v1409_v44  ;;  %v1985_v1 = vpop.f32.mrf.mxu0  ;;  %v1276_v31 = vadd.f32 %v5082_v26, %v842_v8  ;;  %v1809_v44 = vld [vmem:[#allocation2 + $0x68] sm:$0xff]  ;;  %v1811_v8 = vld [vmem:[#allocation2 + $0x78] sm:$0xff] }
 0x229   :  { %v2142_v51 = vadd.f32 %v1985_v1, %v1708_v19  ;;  %v2074_v21 = vpop.f32.mrf.mxu1 }
 0x22a   :  { %1795 = vst.msk [vmem:[#allocation2 + $0x178] sm:$0xff] %vm446_vm2, %v1747_v46  ;;  %v2143_v43 = vadd.f32 %v2074_v21, %v1805_v56  ;;  %v1710_v5 = vadd.f32 %v5316_v38, %v1276_v31  ;;  %v2592_v38 = vld [vmem:[#allocation6 + $0x50] sm:$0xff]  ;;  %v5417_v53 = vpop.f32.mrf.mxu2 }
 0x22b   :  { %4027 = vmatmul.msk.f32.gmra.mxu0 %vm133_vm1, %v3994_v48  ;;  %v2263_v20 = vld [vmem:[#allocation2 + $0x38] sm:$0xff]  ;;  %2629 = vmatpush.msrb.mxu2 %v2592_v38  ;;  %v2590_v38 = vld [vmem:[#allocation6 + $0x40] sm:$0xff] }
 0x22c   :  { %2191 = vst.msk [vmem:[#allocation2 + $0x48] sm:$0xff] %vm446_vm2, %v2143_v43  ;;  %4052 = vmatmul.msk.f32.gmra.mxu1 %vm133_vm1, %v3994_v48  ;;  %v2265_v28 = vmax.f32 %v2260_v22, %v2263_v20 }
 0x22d   :  { %2630 = vmatpush.msrb.mxu2 %v2591_v14  ;;  %v419_v14 = vadd.f32 %v4626_v50, %v4838_v62 }
 0x22e   :  { %v5401_v54 = vmax.f32 %v2265_v28, 0.0 }
 0x22f   :  { %2631 = vmatpush.msrb.mxu2 %v2590_v38 }
 0x230   :  { %2272 = vrot.lane.b32.xlu2 %v5401_v54, %s4236_s26  ;;  %v1988_v58 = vpop.f32.mrf.mxu0 }
 0x231   :  { %v2144_v59 = vadd.f32 %v1988_v58, %v1710_v5  ;;  %v2077_v49 = vpop.f32.mrf.mxu1 }
 0x232   :  { %v2145_v40 = vadd.f32 %v2077_v49, %v1807_v47 }
 0x233   :  { %4028 = vmatmul.msk.f32.gmra.mxu0 %vm133_vm1, %v5120_v10  ;;  %v2292_v26 = vmax.f32 %v2142_v51, %v2144_v59  ;;  %v2288_v13 = vld [vmem:[#allocation2 + $0x48] sm:$0xff] }
 0x234   :  { %2193 = vst.msk [vmem:[#allocation2 + $0x58] sm:$0xff] %vm446_vm2, %v2145_v40  ;;  %4053 = vmatmul.msk.f32.gmra.mxu1 %vm133_vm1, %v5120_v10  ;;  %v411_v10 = vadd.f32 %v4626_v50, %v4767_v3  ;;  %v1813_v59 = vld [vmem:[#allocation2 + $0x88] sm:$0xff] }
 0x235   :  { %v5415_v16 = vmax.f32 %v2292_v26, 0.0 }
 0x236   :  { %v846_v46 = vadd.f32 %v4870_v23, %v411_v10  ;;  %v5436_v23 = vpop.f32.mrf.mxu2 }
 0x237   :  { %2298 = vrot.lane.b32.xlu0 %v5415_v16, %s4236_s26 }
 0x238   :  { %2277 = vrot.lane.b32.xlu2 %v5383_v6, %s4235_s25  ;;  %v1991_v7 = vpop.f32.mrf.mxu0  ;;  %v1280_v3 = vadd.f32 %v5115_v33, %v846_v46  ;;  %v413_v33 = vadd.f32 %v4626_v50, %v4782_v12 }
 0x239   :  { %v2146_v19 = vadd.f32 %v1991_v7, %v1712_v37  ;;  %v2080_v61 = vpop.f32.mrf.mxu1 }
 0x23a   :  { %v2147_v29 = vadd.f32 %v2080_v61, %v1809_v44  ;;  %v1714_v56 = vadd.f32 %v5354_v4, %v1280_v3  ;;  %v848_v20 = vadd.f32 %v4900_v57, %v413_v33  ;;  %v415_v57 = vadd.f32 %v4626_v50, %v4803_v30 }
 0x23b   :  { %4029 = vmatmul.msk.f32.gmra.mxu0 %vm133_vm1, %v5182_v11  ;;  %v2291_v1 = vld [vmem:[#allocation2 + $0x58] sm:$0xff] }
 0x23c   :  { %2195 = vst.msk [vmem:[#allocation2 + $0x68] sm:$0xff] %vm446_vm2, %v2147_v29  ;;  %4054 = vmatmul.msk.f32.gmra.mxu1 %vm133_vm1, %v5182_v11  ;;  %v2293_v48 = vmax.f32 %v2288_v13, %v2291_v1  ;;  %v3997_v11 = vld [vmem:[%s5957_s0 + $0xd8] sm:$0xff]  ;;  %v1282_v31 = vadd.f32 %v5134_v36, %v848_v20  ;;  %v850_v36 = vadd.f32 %v4915_v25, %v415_v57  ;;  %v2598_v1 = vld [vmem:[#allocation6 + $0x80] sm:$0xff] }
 0x23d   :  { %v417_v25 = vadd.f32 %v4626_v50, %v4823_v52  ;;  %v2589_v13 = vld [vmem:[#allocation6 + $0x38] sm:$0xff]  ;;  %2680 = vmatpush.msrb.mxu3 %v2598_v1 }
 0x23e   :  { %v5433_v51 = vmax.f32 %v2293_v48, 0.0  ;;  %v1716_v58 = vadd.f32 %v5373_v2, %v1282_v31  ;;  %v1575_v49 = vpop.f32.mrf.mxu2  ;;  %v1284_v55 = vadd.f32 %v5149_v32, %v850_v36  ;;  %2632 = vmatpush.msrb.mxu2 %v2589_v13  ;;  %v1819_v31 = vld [vmem:[#allocation2 + $0xb8] sm:$0xff] }
 0x23f   :  { %v852_v29 = vadd.f32 %v4932_v27, %v417_v25 }
 0x240   :  { %2300 = vrot.lane.b32.xlu1 %v5433_v51, %s4236_s26  ;;  %2305 = vrot.lane.b32.xlu2 %v5415_v16, %s4235_s25  ;;  %v1994_v21 = vpop.f32.mrf.mxu0  ;;  %v1718_v30 = vadd.f32 %v5396_v15, %v1284_v55 }
 0x241   :  { %v2148_v43 = vadd.f32 %v1994_v21, %v1714_v56  ;;  %v2083_v22 = vpop.f32.mrf.mxu1  ;;  %v1286_v15 = vadd.f32 %v5162_v0, %v852_v29  ;;  %v1817_v56 = vld [vmem:[#allocation2 + $0xa8] sm:$0xff] }
 0x242   :  { %v2149_v4 = vadd.f32 %v2083_v22, %v1811_v8 }
 0x243   :  { %4030 = vmatmul.msk.f32.gmra.mxu0 %vm133_vm1, %v3997_v11  ;;  %v2320_v28 = vmax.f32 %v2146_v19, %v2148_v43  ;;  %v2316_v45 = vld [vmem:[#allocation2 + $0x68] sm:$0xff]  ;;  %v1815_v19 = vld [vmem:[#allocation2 + $0x98] sm:$0xff]  ;;  %v1720_v52 = vadd.f32 %v5417_v53, %v1286_v15 }
 0x244   :  { %2197 = vst.msk [vmem:[#allocation2 + $0x78] sm:$0xff] %vm446_vm2, %v2149_v4  ;;  %4055 = vmatmul.msk.f32.gmra.mxu1 %vm133_vm1, %v3997_v11  ;;  %v854_v11 = vadd.f32 %v4949_v60, %v419_v14 }
 0x245   :  { %v5452_v5 = vmax.f32 %v2320_v28, 0.0  ;;  %v421_v28 = vadd.f32 %v4626_v50, %v4851_v24 }
 0x246   :  { %v1578_v32 = vpop.f32.mrf.mxu2  ;;  %v1288_v8 = vadd.f32 %v5177_v39, %v854_v11  ;;  %v2588_v39 = vld [vmem:[#allocation6 + $0x30] sm:$0xff] }
 0x247   :  { %2326 = vrot.lane.b32.xlu0 %v5452_v5, %s4236_s26  ;;  %v856_v57 = vadd.f32 %v4973_v35, %v421_v28  ;;  %2633 = vmatpush.msrb.mxu2 %v2588_v39  ;;  %v423_v35 = vadd.f32 %v4626_v50, %v4866_v18 }
 0x248   :  { %v1997_v12 = vpop.f32.mrf.mxu0  ;;  %2333 = vrot.lane.b32.xlu2 %v5452_v5, %s4235_s25  ;;  %v1722_v20 = vadd.f32 %v5436_v23, %v1288_v8 }
 0x249   :  { %v2150_v63 = vadd.f32 %v1997_v12, %v1716_v58  ;;  %v2086_v47 = vpop.f32.mrf.mxu1  ;;  %v858_v38 = vadd.f32 %v4994_v42, %v423_v35  ;;  %v6003_v35 = vld [vmem:[#allocation18_spill] sm:$0xff] }
 0x24a   :  { %v2151_v40 = vadd.f32 %v2086_v47, %v1813_v59  ;;  %v1290_v59 = vadd.f32 %v5197_v9, %v856_v57  ;;  %v2587_v9 = vld [vmem:[#allocation6 + $0x28] sm:$0xff] }
 0x24b   :  { %v2319_v26 = vld [vmem:[#allocation2 + $0x78] sm:$0xff]  ;;  %2634 = vmatpush.msrb.mxu2 %v2587_v9  ;;  %v1292_v25 = vadd.f32 %v5206_v17, %v858_v38  ;;  %v5998_v17 = vld [vmem:[#allocation24_spill] sm:$0xff]  ;;  %v6004_v38 = vld [vmem:[#allocation26_spill] sm:$0xff] }
 0x24c   :  { %2199 = vst.msk [vmem:[#allocation2 + $0x88] sm:$0xff] %vm446_vm2, %v2151_v40  ;;  %v2321_v2 = vmax.f32 %v2316_v45, %v2319_v26  ;;  %v1724_v47 = vadd.f32 %v1575_v49, %v1290_v59  ;;  %v1821_v45 = vld [vmem:[#allocation2 + $0xc8] sm:$0xff] }
 0x24d   :  { %v1726_v18 = vadd.f32 %v1578_v32, %v1292_v25  ;;  %v2583_v32 = vld [vmem:[#allocation6 + $0x8] sm:$0xff] }
 0x24e   :  { %v5464_v37 = vmax.f32 %v2321_v2, 0.0  ;;  %v1581_v22 = vpop.f32.mrf.mxu2 }
 0x250   :  { %2328 = vrot.lane.b32.xlu1 %v5464_v37, %s4236_s26  ;;  %v2000_v7 = vpop.f32.mrf.mxu0 }
 0x251   :  { %v2152_v10 = vadd.f32 %v2000_v7, %v1718_v30  ;;  %v2089_v44 = vpop.f32.mrf.mxu1  ;;  %v2586_v7 = vld [vmem:[#allocation6 + $0x20] sm:$0xff] }
 0x252   :  { %v2153_v61 = vadd.f32 %v2089_v44, %v1815_v19  ;;  %2635 = vmatpush.msrb.mxu2 %v2586_v7  ;;  %v2585_v44 = vld [vmem:[#allocation6 + $0x18] sm:$0xff] }
 0x253   :  { %v2348_v46 = vmax.f32 %v2150_v63, %v2152_v10  ;;  %v2344_v33 = vld [vmem:[#allocation2 + $0x88] sm:$0xff] }
 0x254   :  { %2201 = vst.msk [vmem:[#allocation2 + $0x98] sm:$0xff] %vm446_vm2, %v2153_v61  ;;  %v5997_v61 = vld [vmem:[#allocation16_spill] sm:$0xff]  ;;  %2636 = vmatpush.msrb.mxu2 %v2585_v44  ;;  %v3096_v44 = vld [vmem:[#allocation6 + $0x228] sm:$0xff] }
 0x255   :  { %v5474_v48 = vmax.f32 %v2348_v46, 0.0  ;;  %v425_v42 = vadd.f32 %v4626_v50, %v5997_v61  ;;  %v1823_v46 = vld [vmem:[#allocation2 + $0xd8] sm:$0xff]  ;;  %v6006_v61 = vld [vmem:[#allocation19_spill] sm:$0xff]  ;;  %3123 = vmatpush.msrb.mxu0 %v3096_v44  ;;  %v3089_v44 = vld [vmem:[#allocation6 + $0x1f0] sm:$0xff] }
 0x256   :  { %v1584_v24 = vpop.f32.mrf.mxu2 }
 0x257   :  { %2361 = vrot.lane.b32.xlu2 %v5474_v48, %s4235_s25  ;;  %2354 = vrot.lane.b32.xlu0 %v5474_v48, %s4236_s26 }
 0x258   :  { %v2003_v27 = vpop.f32.mrf.mxu0 }
 0x259   :  { %v2154_v3 = vadd.f32 %v2003_v27, %v1720_v52  ;;  %v2092_v21 = vpop.f32.mrf.mxu1  ;;  %v2584_v52 = vld [vmem:[#allocation6 + $0x10] sm:$0xff]  ;;  %v860_v27 = vadd.f32 %v5998_v17, %v425_v42  ;;  %v431_v42 = vadd.f32 %v4626_v50, %v6006_v61 }
 0x25a   :  { %v2155_v0 = vadd.f32 %v2092_v21, %v1817_v56  ;;  %2637 = vmatpush.msrb.mxu2 %v2584_v52 }
 0x25b   :  { %v2347_v43 = vld [vmem:[#allocation2 + $0x98] sm:$0xff] }
 0x25c   :  { %2203 = vst.msk [vmem:[#allocation2 + $0xa8] sm:$0xff] %vm446_vm2, %v2155_v0  ;;  %v2349_v53 = vmax.f32 %v2344_v33, %v2347_v43  ;;  %2638 = vmatpush.msrb.mxu2 %v2583_v32  ;;  %v2582_v0 = vld [vmem:[#allocation6] sm:$0xff]  ;;  %v6000_v43 = vld [vmem:[#allocation17_spill] sm:$0xff] }
 0x25e   :  { %v5486_v4 = vmax.f32 %v2349_v53, 0.0  ;;  %v1587_v1 = vpop.f32.mrf.mxu2  ;;  %2639 = vmatpush.msrb.mxu2 %v2582_v0  ;;  %v427_v53 = vadd.f32 %v4626_v50, %v6000_v43  ;;  %v3094_v0 = vld [vmem:[#allocation6 + $0x218] sm:$0xff] }
 0x260   :  { %2356 = vrot.lane.b32.xlu1 %v5486_v4, %s4236_s26  ;;  %v2006_v62 = vpop.f32.mrf.mxu0 }
 0x261   :  { %v2156_v60 = vadd.f32 %v2006_v62, %v1722_v20  ;;  %v2095_v58 = vpop.f32.mrf.mxu1  ;;  %v1825_v20 = vld [vmem:[#allocation2 + $0xe8] sm:$0xff] }
 0x262   :  { %v2157_v12 = vadd.f32 %v2095_v58, %v1819_v31 }
 0x263   :  { %v2376_v63 = vmax.f32 %v2154_v3, %v2156_v60  ;;  %v2372_v55 = vld [vmem:[#allocation2 + $0xa8] sm:$0xff]  ;;  %v5999_v3 = vld [vmem:[#allocation34_spill] sm:$0xff]  ;;  %v6001_v60 = vld [vmem:[#allocation25_spill] sm:$0xff] }
 0x264   :  { %2205 = vst.msk [vmem:[#allocation2 + $0xb8] sm:$0xff] %vm446_vm2, %v2157_v12  ;;  %v1294_v56 = vadd.f32 %v5999_v3, %v860_v27  ;;  %v862_v31 = vadd.f32 %v6001_v60, %v427_v53  ;;  %v6007_v27 = vld [vmem:[#allocation27_spill] sm:$0xff]  ;;  %v3093_v53 = vld [vmem:[#allocation6 + $0x210] sm:$0xff] }
 0x265   :  { %v5496_v23 = vmax.f32 %v2376_v63, 0.0  ;;  %v6002_v63 = vld [vmem:[#allocation35_spill] sm:$0xff] }
 0x266   :  { %v1728_v11 = vadd.f32 %v1581_v22, %v1294_v56  ;;  %v1590_v22 = vpop.f32.mrf.mxu2  ;;  %v1296_v39 = vadd.f32 %v6002_v63, %v862_v31  ;;  %v3092_v31 = vld [vmem:[#allocation6 + $0x208] sm:$0xff] }
 0x267   :  { %2389 = vrot.lane.b32.xlu2 %v5496_v23, %s4235_s25  ;;  %2382 = vrot.lane.b32.xlu0 %v5496_v23, %s4236_s26 }
 0x268   :  { %v2009_v40 = vpop.f32.mrf.mxu0 }
 0x269   :  { %v2158_v36 = vadd.f32 %v2009_v40, %v1724_v47  ;;  %v2098_v26 = vpop.f32.mrf.mxu1  ;;  %v1730_v47 = vadd.f32 %v1584_v24, %v1296_v39  ;;  %v6010_v39 = vld [vmem:[#allocation28_spill] sm:$0xff] }
 0x26a   :  { %v2159_v2 = vadd.f32 %v2098_v26, %v1821_v45  ;;  %v1827_v26 = vld [vmem:[#allocation2 + $0xf8] sm:$0xff] }
 0x26b   :  { %v2375_v49 = vld [vmem:[#allocation2 + $0xb8] sm:$0xff] }
 0x26c   :  { %2207 = vst.msk [vmem:[#allocation2 + $0xc8] sm:$0xff] %vm446_vm2, %v2159_v2  ;;  %v2377_v30 = vmax.f32 %v2372_v55, %v2375_v49 }
 0x26e   :  { %v5507_v10 = vmax.f32 %v2377_v30, 0.0  ;;  %v6005_v30 = vld [vmem:[#allocation36_spill] sm:$0xff]  ;;  %v1593_v24 = vpop.f32.mrf.mxu2 }
 0x270   :  { %2384 = vrot.lane.b32.xlu1 %v5507_v10, %s4236_s26  ;;  %v2012_v19 = vpop.f32.mrf.mxu0 }
 0x271   :  { %v2160_v29 = vadd.f32 %v2012_v19, %v1726_v18  ;;  %v2101_v13 = vpop.f32.mrf.mxu1 }
 0x272   :  { %v2161_v15 = vadd.f32 %v2101_v13, %v1823_v46  ;;  %v1829_v46 = vld [vmem:[#allocation2 + $0x108] sm:$0xff] }
 0x273   :  { %v2404_v14 = vmax.f32 %v2158_v36, %v2160_v29  ;;  %v2400_v58 = vld [vmem:[#allocation2 + $0xc8] sm:$0xff]  ;;  %v429_v36 = vadd.f32 %v4626_v50, %v6003_v35 }
 0x274   :  { %2209 = vst.msk [vmem:[#allocation2 + $0xd8] sm:$0xff] %vm446_vm2, %v2161_v15 }
 0x275   :  { %v5516_v21 = vmax.f32 %v2404_v14, 0.0  ;;  %v864_v55 = vadd.f32 %v6004_v38, %v429_v36  ;;  %v866_v14 = vadd.f32 %v6007_v27, %v431_v42  ;;  %v3091_v36 = vld [vmem:[#allocation6 + $0x200] sm:$0xff]  ;;  %v6013_v27 = vld [vmem:[#allocation29_spill] sm:$0xff] }
 0x277   :  { %2417 = vrot.lane.b32.xlu2 %v5516_v21, %s4235_s25  ;;  %2410 = vrot.lane.b32.xlu0 %v5516_v21, %s4236_s26  ;;  %v1298_v7 = vadd.f32 %v6005_v30, %v864_v55  ;;  %v3090_v30 = vld [vmem:[#allocation6 + $0x1f8] sm:$0xff] }
 0x278   :  { %v2015_v33 = vpop.f32.mrf.mxu0 }
 0x279   :  { %v2162_v8 = vadd.f32 %v2015_v33, %v1728_v11  ;;  %v2104_v62 = vpop.f32.mrf.mxu1  ;;  %v1732_v18 = vadd.f32 %v1587_v1, %v1298_v7  ;;  %v3095_v1 = vld [vmem:[#allocation6 + $0x220] sm:$0xff]  ;;  %v6008_v11 = vld [vmem:[#allocation37_spill] sm:$0xff] }
 0x27a   :  { %v2163_v28 = vadd.f32 %v2104_v62, %v1825_v20  ;;  %3124 = vmatpush.msrb.mxu0 %v3095_v1  ;;  %v1300_v33 = vadd.f32 %v6008_v11, %v866_v14  ;;  %v6009_v20 = vld [vmem:[#allocation20_spill] sm:$0xff]  ;;  %v6011_v7 = vld [vmem:[#allocation38_spill] sm:$0xff] }
 0x27b   :  { %v2403_v12 = vld [vmem:[#allocation2 + $0xd8] sm:$0xff]  ;;  %v433_v62 = vadd.f32 %v4626_v50, %v6009_v20  ;;  %v3087_v1 = vld [vmem:[#allocation6 + $0x1e0] sm:$0xff] }
 0x27c   :  { %2211 = vst.msk [vmem:[#allocation2 + $0xe8] sm:$0xff] %vm446_vm2, %v2163_v28  ;;  %v2405_v57 = vmax.f32 %v2400_v58, %v2403_v12  ;;  %3125 = vmatpush.msrb.mxu0 %v3094_v0  ;;  %v1596_v28 = vpop.f32.mrf.mxu2  ;;  %v1831_v12 = vld [vmem:[#allocation2 + $0x118] sm:$0xff] }
 0x27e   :  { %v5527_v59 = vmax.f32 %v2405_v57, 0.0  ;;  %3126 = vmatpush.msrb.mxu0 %v3093_v53  ;;  %v6014_v53 = vld [vmem:[#allocation39_spill] sm:$0xff] }
 0x280   :  { %2412 = vrot.lane.b32.xlu1 %v5527_v59, %s4236_s26  ;;  %v2018_v40 = vpop.f32.mrf.mxu0  ;;  %3127 = vmatpush.msrb.mxu0 %v3092_v31  ;;  %v3084_v31 = vld [vmem:[#allocation6 + $0x1c8] sm:$0xff] }
 0x281   :  { %v2164_v45 = vadd.f32 %v2018_v40, %v1730_v47  ;;  %v2107_v2 = vpop.f32.mrf.mxu1  ;;  %v868_v47 = vadd.f32 %v6010_v39, %v433_v62 }
 0x282   :  { %v2165_v9 = vadd.f32 %v2107_v2, %v1827_v26  ;;  %3128 = vmatpush.msrb.mxu0 %v3091_v36  ;;  %v6017_v36 = vld [vmem:[#allocation40_spill] sm:$0xff] }
 0x283   :  { %v2432_v49 = vmax.f32 %v2162_v8, %v2164_v45  ;;  %v2428_v32 = vld [vmem:[#allocation2 + $0xe8] sm:$0xff]  ;;  %v1734_v8 = vadd.f32 %v1590_v22, %v1300_v33  ;;  %v3086_v33 = vld [vmem:[#allocation6 + $0x1d8] sm:$0xff] }
 0x284   :  { %2213 = vst.msk [vmem:[#allocation2 + $0xf8] sm:$0xff] %vm446_vm2, %v2165_v9  ;;  %3129 = vmatpush.msrb.mxu0 %v3090_v30  ;;  %v1599_v0 = vpop.f32.mrf.mxu2  ;;  %v3081_v30 = vld [vmem:[#allocation6 + $0x1b0] sm:$0xff] }
 0x285   :  { %v5536_v25 = vmax.f32 %v2432_v49, 0.0 }
 0x286   :  { %3130 = vmatpush.msrb.mxu0 %v3089_v44  ;;  %v6018_v44 = vld [vmem:[#allocation23_spill] sm:$0xff] }
 0x287   :  { %2445 = vrot.lane.b32.xlu2 %v5536_v25, %s4235_s25  ;;  %2438 = vrot.lane.b32.xlu0 %v5536_v25, %s4236_s26 }
 0x288   :  { %v2021_v19 = vpop.f32.mrf.mxu0 }
 0x289   :  { %v2166_v29 = vadd.f32 %v2021_v19, %v1732_v18  ;;  %v2110_v13 = vpop.f32.mrf.mxu1  ;;  %v2242_v17 = vpop.permute.xlu0 %2241  ;;  %v1302_v18 = vadd.f32 %v6011_v7, %v868_v47 }
 0x28a   :  { %v2167_v15 = vadd.f32 %v2110_v13, %v1829_v46  ;;  %v5544_v52 = vpop.permute.xlu2 %2272  ;;  %v2250_v63 = vpop.permute.xlu1 %2249  ;;  %v1833_v46 = vld [vmem:[#allocation2 + $0x128] sm:$0xff] }
 0x28b   :  { %v2431_v3 = vld [vmem:[#allocation2 + $0xf8] sm:$0xff]  ;;  %v1736_v61 = vadd.f32 %v1593_v24, %v1302_v18  ;;  %v3097_v18 = vld [vmem:[#allocation6 + $0x230] sm:$0xff] }
 0x28c   :  { %2215 = vst.msk [vmem:[#allocation2 + $0x108] sm:$0xff] %vm446_vm2, %v2167_v15  ;;  %v2433_v56 = vmax.f32 %v2428_v32, %v2431_v3 }
 0x28e   :  { %v5549_v43 = vmax.f32 %v2433_v56, 0.0 }
 0x290   :  { %2440 = vrot.lane.b32.xlu1 %v5549_v43, %s4236_s26  ;;  %v2024_v60 = vpop.f32.mrf.mxu0 }
 0x291   :  { %v2168_v58 = vadd.f32 %v2024_v60, %v1734_v8  ;;  %v2113_v57 = vpop.f32.mrf.mxu1 }
 0x292   :  { %v2169_v22 = vadd.f32 %v2113_v57, %v1831_v12  ;;  %v2278_v40 = vpop.permute.xlu2 %2277  ;;  %v2244_v35 = vpop.permute.xlu0 %2243 }
 0x293   :  { %v2280_v45 = vsel %vm2252_vm3, %v5544_v52, %v2278_v40  ;;  %v2246_v26 = vsel %vm2245_vm4, %v2242_v17, %v2244_v35  ;;  %v2253_v2 = vsel %vm2252_vm3, %v2244_v35, %v2250_v63  ;;  %v2460_v9 = vmax.f32 %v2166_v29, %v2168_v58  ;;  %v2456_v32 = vld [vmem:[#allocation2 + $0x108] sm:$0xff]  ;;  %v6015_v58 = vld [vmem:[#allocation22_spill] sm:$0xff]  ;;  %v1835_v63 = vld [vmem:[#allocation2 + $0x138] sm:$0xff] }
 0x294   :  { %2217 = vst.msk [vmem:[#allocation2 + $0x118] sm:$0xff] %vm446_vm2, %v2169_v22  ;;  %v2282_v38 = vmax.f32 %v5401_v54, %v2280_v45  ;;  %v2254_v55 = vmax.f32 %v5347_v41, %v2246_v26  ;;  %v2255_v49 = vmax.f32 %v5366_v34, %v2253_v2  ;;  %v3088_v34 = vld [vmem:[#allocation6 + $0x1e8] sm:$0xff]  ;;  %v6012_v54 = vld [vmem:[#allocation21_spill] sm:$0xff]  ;;  %v437_v12 = vadd.f32 %v4626_v50, %v6015_v58  ;;  %v3083_v22 = vld [vmem:[#allocation6 + $0x1c0] sm:$0xff] }
 0x295   :  { %v5565_v19 = vmax.f32 %v2460_v9, 0.0  ;;  %v435_v42 = vadd.f32 %v4626_v50, %v6012_v54  ;;  %3131 = vmatpush.msrb.mxu0 %v3088_v34  ;;  %v6016_v40 = vld [vmem:[#allocation30_spill] sm:$0xff]  ;;  %v3082_v2 = vld [vmem:[#allocation6 + $0x1b8] sm:$0xff]  ;;  %v1602_v9 = vpop.f32.mrf.mxu2  ;;  %v1837_v34 = vld [vmem:[#allocation2 + $0x148] sm:$0xff] }
 0x296   :  { %2285 = vst.msk [vmem:[#allocation3 + $0x18] sm:$0xff] %vm446_vm2, %v2282_v38  ;;  %2640 = vmatmul.f32.vlgmr.msrb.gmra.mxu2 %v2254_v55  ;;  %v872_v35 = vadd.f32 %v6016_v40, %v437_v12 }
 0x297   :  { %2473 = vrot.lane.b32.xlu2 %v5565_v19, %s4235_s25  ;;  %2466 = vrot.lane.b32.xlu0 %v5565_v19, %s4236_s26  ;;  %2257 = vst.msk [vmem:[#allocation3 + $0x8] sm:$0xff] %vm446_vm2, %v2255_v49  ;;  %v870_v14 = vadd.f32 %v6013_v27, %v435_v42  ;;  %v3098_v49 = vld [vmem:[#allocation6 + $0x238] sm:$0xff] }
 0x298   :  { %v2027_v41 = vpop.f32.mrf.mxu0  ;;  %3132 = vmatpush.msrb.mxu0 %v3087_v1  ;;  %v1306_v45 = vadd.f32 %v6017_v36, %v872_v35  ;;  %3178 = vmatpush.msrb.mxu1 %v3098_v49  ;;  %v2766_v35 = vld [vmem:[#allocation6 + $0x108] sm:$0xff]  ;;  %v6023_v49 = vld [vmem:[#allocation33_spill] sm:$0xff] }
 0x299   :  { %v2170_v29 = vadd.f32 %v2027_v41, %v1736_v61  ;;  %v2116_v13 = vpop.f32.mrf.mxu1  ;;  %v2271_v15 = vpop.permute.xlu1 %2270  ;;  %v1304_v8 = vadd.f32 %v6014_v53, %v870_v14  ;;  %v439_v61 = vadd.f32 %v4626_v50, %v6018_v44  ;;  %v538_v53 = vld [vmem:[#allocation2 + $0x160] sm:$0xff]  ;;  %2793 = vmatpush.msra.mxu2 %v2766_v35 }
 0x29a   :  { %v2171_v17 = vadd.f32 %v2116_v13, %v1833_v46  ;;  %v2274_v24 = vsel %vm2245_vm4, %v2271_v15, %v5544_v52  ;;  %3133 = vmatpush.msrb.mxu0 %v3086_v33  ;;  %v3085_v52 = vld [vmem:[#allocation6 + $0x1d0] sm:$0xff]  ;;  %v1740_v38 = vadd.f32 %v1599_v0, %v1306_v45  ;;  %3179 = vmatpush.msrb.mxu1 %v3097_v18  ;;  %v1841_v45 = vld [vmem:[#allocation2 + $0x168] sm:$0xff] }
 0x29b   :  { %v2459_v3 = vld [vmem:[#allocation2 + $0x118] sm:$0xff]  ;;  %v5579_v56 = vmax.f32 %v5383_v6, %v2274_v24  ;;  %v1738_v62 = vadd.f32 %v1596_v28, %v1304_v8 }
 0x29c   :  { %2219 = vst.msk [vmem:[#allocation2 + $0x128] sm:$0xff] %vm446_vm2, %v2171_v17  ;;  %v2461_v11 = vmax.f32 %v2456_v32, %v2459_v3  ;;  %3134 = vmatpush.msrb.mxu0 %v3085_v52  ;;  %v6020_v24 = vld [vmem:[#allocation41_spill] sm:$0xff]  ;;  %v2306_v3 = vpop.permute.xlu2 %2305 }
 0x29d   :  { %v5596_v55 = vld [vmem:[#allocation3 + $0x18] sm:$0xff]  ;;  %v1605_v50 = vpop.f32.mrf.mxu2 }
 0x29e   :  { %v5583_v20 = vmax.f32 %v2461_v11, 0.0  ;;  %2643 = vmatmul.f32.gmra.mxu2 %v5579_v56  ;;  %v2567_v60 = vld [vmem:[#allocation3 + $0x8] sm:$0xff]  ;;  %3135 = vmatpush.msrb.mxu0 %v3084_v31  ;;  %v1839_v11 = vld [vmem:[#allocation2 + $0x158] sm:$0xff] }
 0x29f   :  { %4056 = vmatmul.msk.f32.vlgmr.msrb.gmra.mxu3 %vm446_vm2, %v2567_v60  ;;  %v6021_v60 = vld [vmem:[#allocation32_spill] sm:$0xff] }
 0x2a0   :  { %2468 = vrot.lane.b32.xlu1 %v5583_v20, %s4236_s26  ;;  %v2030_v6 = vpop.f32.mrf.mxu0  ;;  %3136 = vmatpush.msrb.mxu0 %v3083_v22 }
 0x2a1   :  { %v2172_v57 = vadd.f32 %v2030_v6, %v1738_v62  ;;  %v2119_v39 = vpop.f32.mrf.mxu1  ;;  %v876_v6 = vadd.f32 %v6021_v60, %v538_v53  ;;  %v2761_v60 = vld [vmem:[#allocation6 + $0xe0] sm:$0xff] }
 0x2a2   :  { %v2173_v47 = vadd.f32 %v2119_v39, %v1835_v63  ;;  %3137 = vmatpush.msrb.mxu0 %v3082_v2  ;;  %v6022_v39 = vld [vmem:[#allocation42_spill] sm:$0xff] }
 0x2a3   :  { %v2488_v28 = vmax.f32 %v2170_v29, %v2172_v57  ;;  %v6019_v29 = vld [vmem:[#allocation31_spill] sm:$0xff] }
 0x2a4   :  { %2221 = vst.msk [vmem:[#allocation2 + $0x138] sm:$0xff] %vm446_vm2, %v2173_v47  ;;  %3138 = vmatpush.msrb.mxu0 %v3081_v30  ;;  %v874_v46 = vadd.f32 %v6019_v29, %v439_v61  ;;  %v2484_v13 = vld [vmem:[#allocation2 + $0x128] sm:$0xff]  ;;  %v1310_v47 = vadd.f32 %v6022_v39, %v876_v6  ;;  %v2764_v29 = vld [vmem:[#allocation6 + $0xf8] sm:$0xff] }
 0x2a5   :  { %v5594_v26 = vmax.f32 %v2488_v28, 0.0  ;;  %v2765_v28 = vld [vmem:[#allocation6 + $0x100] sm:$0xff]  ;;  %v1608_v44 = vpop.f32.mrf.mxu2 }
 0x2a6   :  { %v1308_v1 = vadd.f32 %v6020_v24, %v874_v46  ;;  %v1744_v40 = vadd.f32 %v1605_v50, %v1310_v47  ;;  %2794 = vmatpush.msra.mxu2 %v2765_v28  ;;  %v2763_v46 = vld [vmem:[#allocation6 + $0xf0] sm:$0xff] }
 0x2a7   :  { %2501 = vrot.lane.b32.xlu2 %v5594_v26, %s4235_s25  ;;  %2494 = vrot.lane.b32.xlu0 %v5594_v26, %s4236_s26 }
 0x2a8   :  { %v2033_v7 = vpop.f32.mrf.mxu0  ;;  %4057 = vmatmul.msk.f32.gmra.mxu3 %vm446_vm2, %v5596_v55  ;;  %v1742_v14 = vadd.f32 %v1602_v9, %v1308_v1  ;;  %v540_v9 = vld [vmem:[#allocation2 + $0x170] sm:$0xff]  ;;  %2795 = vmatpush.msra.mxu2 %v2764_v29  ;;  %v1843_v1 = vld [vmem:[#allocation2 + $0x178] sm:$0xff] }
 0x2a9   :  { %v2174_v41 = vadd.f32 %v2033_v7, %v1740_v38  ;;  %v2122_v54 = vpop.f32.mrf.mxu1  ;;  %v2299_v62 = vpop.permute.xlu0 %2298  ;;  %v878_v30 = vadd.f32 %v6023_v49, %v540_v9  ;;  %v2752_v29 = vld [vmem:[#allocation6 + $0x98] sm:$0xff] }
 0x2aa   :  { %v2175_v42 = vadd.f32 %v2122_v54, %v1837_v34  ;;  %2796 = vmatpush.msra.mxu2 %v2763_v46 }
 0x2ab   :  { %v2487_v15 = vld [vmem:[#allocation2 + $0x138] sm:$0xff] }
 0x2ac   :  { %2223 = vst.msk [vmem:[#allocation2 + $0x148] sm:$0xff] %vm446_vm2, %v2175_v42  ;;  %v2489_v17 = vmax.f32 %v2484_v13, %v2487_v15 }
 0x2ae   :  { %v5609_v27 = vmax.f32 %v2489_v17, 0.0  ;;  %v2334_v17 = vpop.permute.xlu2 %2333 }
 0x2b0   :  { %2496 = vrot.lane.b32.xlu1 %v5609_v27, %s4236_s26  ;;  %v2036_v32 = vpop.f32.mrf.mxu0 }
 0x2b1   :  { %v2176_v0 = vadd.f32 %v2036_v32, %v1742_v14  ;;  %v2125_v33 = vpop.f32.mrf.mxu1 }
 0x2b2   :  { %v2177_v8 = vadd.f32 %v2125_v33, %v1839_v11  ;;  %v2301_v52 = vpop.permute.xlu1 %2300 }
 0x2b3   :  { %v2308_v31 = vsel %vm2252_vm3, %v2301_v52, %v2306_v3  ;;  %v2302_v58 = vsel %vm2245_vm4, %v2299_v62, %v2301_v52  ;;  %v2516_v12 = vmax.f32 %v2174_v41, %v2176_v0  ;;  %v2512_v7 = vld [vmem:[#allocation2 + $0x148] sm:$0xff] }
 0x2b4   :  { %2225 = vst.msk [vmem:[#allocation2 + $0x158] sm:$0xff] %vm446_vm2, %v2177_v8  ;;  %v2310_v57 = vmax.f32 %v5433_v51, %v2308_v31  ;;  %v5619_v63 = vmax.f32 %v5415_v16, %v2302_v58  ;;  %v2768_v51 = vld [vmem:[#allocation6 + $0x118] sm:$0xff]  ;;  %v6024_v41 = vld [vmem:[#allocation43_spill] sm:$0xff] }
 0x2b5   :  { %v5622_v22 = vmax.f32 %v2516_v12, 0.0  ;;  %2848 = vmatpush.msra.mxu3 %v2768_v51  ;;  %v1312_v34 = vadd.f32 %v6024_v41, %v878_v30  ;;  %v2762_v62 = vld [vmem:[#allocation6 + $0xe8] sm:$0xff]  ;;  %v2760_v12 = vld [vmem:[#allocation6 + $0xd8] sm:$0xff] }
 0x2b6   :  { %2313 = vst.msk [vmem:[#allocation3 + $0x28] sm:$0xff] %vm446_vm2, %v2310_v57  ;;  %2646 = vmatmul.f32.gmra.mxu2 %v5619_v63  ;;  %v2759_v57 = vld [vmem:[#allocation6 + $0xd0] sm:$0xff]  ;;  %v2362_v39 = vpop.permute.xlu2 %2361  ;;  %v2754_v41 = vld [vmem:[#allocation6 + $0xa8] sm:$0xff] }
 0x2b7   :  { %2529 = vrot.lane.b32.xlu2 %v5622_v22, %s4235_s25  ;;  %2522 = vrot.lane.b32.xlu0 %v5622_v22, %s4236_s26  ;;  %v1746_v13 = vadd.f32 %v1608_v44, %v1312_v34  ;;  %v2753_v34 = vld [vmem:[#allocation6 + $0xa0] sm:$0xff] }
 0x2b8   :  { %v2039_v16 = vpop.f32.mrf.mxu0  ;;  %2797 = vmatpush.msra.mxu2 %v2762_v62 }
 0x2b9   :  { %v2178_v36 = vadd.f32 %v2039_v16, %v1744_v40  ;;  %v2128_v2 = vpop.f32.mrf.mxu1  ;;  %v2327_v3 = vpop.permute.xlu0 %2326 }
 0x2ba   :  { %v2179_v38 = vadd.f32 %v2128_v2, %v1841_v45  ;;  %2798 = vmatpush.msra.mxu2 %v2761_v60  ;;  %v2767_v45 = vld [vmem:[#allocation6 + $0x110] sm:$0xff]  ;;  %v2757_v2 = vld [vmem:[#allocation6 + $0xc0] sm:$0xff] }
 0x2bb   :  { %2226 = vst [vmem:[#allocation2 + $0x160] sm:$0xff] %v2178_v36  ;;  %v2515_v18 = vld [vmem:[#allocation2 + $0x158] sm:$0xff]  ;;  %2849 = vmatpush.msra.mxu3 %v2767_v45  ;;  %v2932_v45 = vld [vmem:[#allocation6 + $0x1a0] sm:$0xff] }
 0x2bc   :  { %2227 = vst.msk [vmem:[#allocation2 + $0x168] sm:$0xff] %vm446_vm2, %v2179_v38  ;;  %v2517_v61 = vmax.f32 %v2512_v7, %v2515_v18  ;;  %2799 = vmatpush.msra.mxu2 %v2760_v12  ;;  %v2926_v12 = vld [vmem:[#allocation6 + $0x170] sm:$0xff] }
 0x2bd   :  { %v5633_v54 = vld [vmem:[#allocation3 + $0x28] sm:$0xff] }
 0x2be   :  { %4058 = vmatmul.msk.f32.gmra.mxu3 %vm446_vm2, %v5633_v54  ;;  %v5637_v42 = vmax.f32 %v2517_v61, 0.0  ;;  %2800 = vmatpush.msra.mxu2 %v2759_v57 }
 0x2c0   :  { %2524 = vrot.lane.b32.xlu1 %v5637_v42, %s4236_s26  ;;  %v2042_v15 = vpop.f32.mrf.mxu0 }
 0x2c1   :  { %v2180_v24 = vadd.f32 %v2042_v15, %v1746_v13  ;;  %v2131_v14 = vpop.f32.mrf.mxu1  ;;  %v2390_v38 = vpop.permute.xlu2 %2389 }
 0x2c2   :  { %v2181_v50 = vadd.f32 %v2131_v14, %v1843_v1  ;;  %v2329_v32 = vpop.permute.xlu1 %2328 }
 0x2c3   :  { %2228 = vst [vmem:[#allocation2 + $0x170] sm:$0xff] %v2180_v24  ;;  %v2336_v0 = vsel %vm2252_vm3, %v2329_v32, %v2334_v17  ;;  %v2330_v11 = vsel %vm2245_vm4, %v2327_v3, %v2329_v32  ;;  %v2544_v33 = vmax.f32 %v2178_v36, %v2180_v24  ;;  %v2758_v36 = vld [vmem:[#allocation6 + $0xc8] sm:$0xff]  ;;  %v2930_v3 = vld [vmem:[#allocation6 + $0x190] sm:$0xff] }
 0x2c4   :  { %2229 = vst.msk [vmem:[#allocation2 + $0x178] sm:$0xff] %vm446_vm2, %v2181_v50  ;;  %v2338_v53 = vmax.f32 %v5464_v37, %v2336_v0  ;;  %v5646_v8 = vmax.f32 %v5452_v5, %v2330_v11  ;;  %v2540_v5 = vld [vmem:[#allocation2 + $0x168] sm:$0xff]  ;;  %2801 = vmatpush.msra.mxu2 %v2758_v36  ;;  %v2931_v50 = vld [vmem:[#allocation6 + $0x198] sm:$0xff] }
 0x2c5   :  { %v5648_v52 = vmax.f32 %v2544_v33, 0.0  ;;  %v2933_v32 = vld [vmem:[#allocation6 + $0x1a8] sm:$0xff] }
 0x2c6   :  { %2341 = vst.msk [vmem:[#allocation3 + $0x38] sm:$0xff] %vm446_vm2, %v2338_v53  ;;  %2649 = vmatmul.f32.gmra.mxu2 %v5646_v8  ;;  %3139 = vmatmul.f32.vlgmr.msrb.gmra.mxu0 %v5646_v8 }
 0x2c7   :  { %2557 = vrot.lane.b32.xlu2 %v5648_v52, %s4235_s25  ;;  %2550 = vrot.lane.b32.xlu0 %v5648_v52, %s4236_s26 }
 0x2c8   :  { %2802 = vmatpush.msra.mxu2 %v2757_v2  ;;  %3013 = vmatpush.msrb.mxu3 %v2933_v32  ;;  %v2922_v2 = vld [vmem:[#allocation6 + $0x150] sm:$0xff] }
 0x2c9   :  { %v2355_v40 = vpop.permute.xlu0 %2354  ;;  %v3260_v32 = vld [vmem:[#allocation6 + $0x2b0] sm:$0xff] }
 0x2ca   :  { %3014 = vmatpush.msrb.mxu3 %v2932_v45 }
 0x2cb   :  { %v2543_v37 = vld [vmem:[#allocation2 + $0x178] sm:$0xff] }
 0x2cc   :  { %v2545_v6 = vmax.f32 %v2540_v5, %v2543_v37 }
 0x2cd   :  { %v5657_v31 = vld [vmem:[#allocation3 + $0x38] sm:$0xff] }
 0x2ce   :  { %4059 = vmatmul.msk.f32.gmra.mxu3 %vm446_vm2, %v5657_v31  ;;  %4080 = vmatmul.msk.f32.vlgmr.msrb.gmra.mxu1 %vm446_vm2, %v5657_v31  ;;  %v5663_v58 = vmax.f32 %v2545_v6, 0.0  ;;  %v2927_v6 = vld [vmem:[#allocation6 + $0x178] sm:$0xff] }
 0x2d0   :  { %2552 = vrot.lane.b32.xlu1 %v5663_v58, %s4236_s26 }
 0x2d2   :  { %v2357_v47 = vpop.permute.xlu1 %2356 }
 0x2d3   :  { %v2364_v35 = vsel %vm2252_vm3, %v2357_v47, %v2362_v39  ;;  %v2358_v51 = vsel %vm2245_vm4, %v2355_v40, %v2357_v47 }
 0x2d4   :  { %v2366_v28 = vmax.f32 %v5486_v4, %v2364_v35  ;;  %v5671_v16 = vmax.f32 %v5474_v48, %v2358_v51  ;;  %v2756_v48 = vld [vmem:[#allocation6 + $0xb8] sm:$0xff]  ;;  %v2755_v4 = vld [vmem:[#allocation6 + $0xb0] sm:$0xff] }
 0x2d5   :  { %2803 = vmatpush.msra.mxu2 %v2756_v48 }
 0x2d6   :  { %2369 = vst.msk [vmem:[#allocation3 + $0x48] sm:$0xff] %vm446_vm2, %v2366_v28  ;;  %2652 = vmatmul.f32.gmra.mxu2 %v5671_v16  ;;  %3142 = vmatmul.f32.gmra.mxu0 %v5671_v16 }
 0x2d7   :  { %2804 = vmatpush.msra.mxu2 %v2755_v4 }
 0x2d9   :  { %v2383_v30 = vpop.permute.xlu0 %2382  ;;  %2805 = vmatpush.msra.mxu2 %v2754_v41  ;;  %v2918_v41 = vld [vmem:[#allocation6 + $0x130] sm:$0xff] }
 0x2db   :  { %2806 = vmatpush.msra.mxu2 %v2753_v34  ;;  %v2917_v34 = vld [vmem:[#allocation6 + $0x128] sm:$0xff] }
 0x2dd   :  { %v5676_v9 = vld [vmem:[#allocation3 + $0x48] sm:$0xff]  ;;  %2807 = vmatpush.msra.mxu2 %v2752_v29 }
 0x2de   :  { %4060 = vmatmul.msk.f32.gmra.mxu3 %vm446_vm2, %v5676_v9  ;;  %4081 = vmatmul.msk.f32.gmra.mxu1 %vm446_vm2, %v5676_v9 }
 0x2e2   :  { %v2385_v49 = vpop.permute.xlu1 %2384 }
 0x2e3   :  { %v2392_v7 = vsel %vm2252_vm3, %v2385_v49, %v2390_v38  ;;  %v2386_v18 = vsel %vm2245_vm4, %v2383_v30, %v2385_v49 }
 0x2e4   :  { %v2394_v44 = vmax.f32 %v5507_v10, %v2392_v7  ;;  %v5686_v61 = vmax.f32 %v5496_v23, %v2386_v18  ;;  %v2751_v23 = vld [vmem:[#allocation6 + $0x90] sm:$0xff]  ;;  %v2418_v10 = vpop.permute.xlu2 %2417  ;;  %v2920_v18 = vld [vmem:[#allocation6 + $0x140] sm:$0xff] }
 0x2e5   :  { %2808 = vmatpush.msra.mxu2 %v2751_v23 }
 0x2e6   :  { %2397 = vst.msk [vmem:[#allocation3 + $0x58] sm:$0xff] %vm446_vm2, %v2394_v44  ;;  %2655 = vmatmul.f32.gmra.mxu2 %v5686_v61  ;;  %3145 = vmatmul.f32.gmra.mxu0 %v5686_v61  ;;  %v2919_v44 = vld [vmem:[#allocation6 + $0x138] sm:$0xff] }
 0x2e7   :  { %2958 = vmatpush.msrb.mxu2 %v2931_v50  ;;  %v3263_v50 = vld [vmem:[#allocation6 + $0x2c8] sm:$0xff] }
 0x2e9   :  { %v2411_v15 = vpop.permute.xlu0 %2410  ;;  %2959 = vmatpush.msrb.mxu2 %v2930_v3 }
 0x2ec   :  { %v2446_v11 = vpop.permute.xlu2 %2445 }
 0x2ed   :  { %v5691_v46 = vld [vmem:[#allocation3 + $0x58] sm:$0xff] }
 0x2ee   :  { %4061 = vmatmul.msk.f32.gmra.mxu3 %vm446_vm2, %v5691_v46  ;;  %4082 = vmatmul.msk.f32.gmra.mxu1 %vm446_vm2, %v5691_v46 }
 0x2f2   :  { %v2413_v13 = vpop.permute.xlu1 %2412 }
 0x2f3   :  { %v2420_v17 = vsel %vm2252_vm3, %v2413_v13, %v2418_v10  ;;  %v2414_v24 = vsel %vm2245_vm4, %v2411_v15, %v2413_v13 }
 0x2f4   :  { %v2422_v1 = vmax.f32 %v5527_v59, %v2420_v17  ;;  %v5701_v14 = vmax.f32 %v5516_v21, %v2414_v24  ;;  %v2929_v21 = vld [vmem:[#allocation6 + $0x188] sm:$0xff]  ;;  %v2928_v59 = vld [vmem:[#allocation6 + $0x180] sm:$0xff]  ;;  %v2474_v39 = vpop.permute.xlu2 %2473 }
 0x2f5   :  { %2960 = vmatpush.msrb.mxu2 %v2929_v21 }
 0x2f6   :  { %2425 = vst.msk [vmem:[#allocation3 + $0x68] sm:$0xff] %vm446_vm2, %v2422_v1  ;;  %2658 = vmatmul.f32.gmra.mxu2 %v5701_v14  ;;  %3148 = vmatmul.f32.gmra.mxu0 %v5701_v14  ;;  %v3261_v1 = vld [vmem:[#allocation6 + $0x2b8] sm:$0xff] }
 0x2f7   :  { %2961 = vmatpush.msrb.mxu2 %v2928_v59 }
 0x2f9   :  { %v2439_v53 = vpop.permute.xlu0 %2438  ;;  %2962 = vmatpush.msrb.mxu2 %v2927_v6  ;;  %v3256_v6 = vld [vmem:[#allocation6 + $0x290] sm:$0xff] }
 0x2fb   :  { %2963 = vmatpush.msrb.mxu2 %v2926_v12 }
 0x2fd   :  { %v5706_v0 = vld [vmem:[#allocation3 + $0x68] sm:$0xff] }
 0x2fe   :  { %4062 = vmatmul.msk.f32.gmra.mxu3 %vm446_vm2, %v5706_v0  ;;  %4083 = vmatmul.msk.f32.gmra.mxu1 %vm446_vm2, %v5706_v0 }
 0x302   :  { %v2441_v33 = vpop.permute.xlu1 %2440 }
 0x303   :  { %v2448_v62 = vsel %vm2252_vm3, %v2441_v33, %v2446_v11  ;;  %v2442_v60 = vsel %vm2245_vm4, %v2439_v53, %v2441_v33 }
 0x304   :  { %v2450_v5 = vmax.f32 %v5549_v43, %v2448_v62  ;;  %v5716_v37 = vmax.f32 %v5536_v25, %v2442_v60  ;;  %v2925_v25 = vld [vmem:[#allocation6 + $0x168] sm:$0xff]  ;;  %v2924_v43 = vld [vmem:[#allocation6 + $0x160] sm:$0xff] }
 0x305   :  { %2964 = vmatpush.msrb.mxu2 %v2925_v25  ;;  %v3258_v60 = vld [vmem:[#allocation6 + $0x2a0] sm:$0xff] }
 0x306   :  { %2453 = vst.msk [vmem:[#allocation3 + $0x78] sm:$0xff] %vm446_vm2, %v2450_v5  ;;  %2661 = vmatmul.f32.gmra.mxu2 %v5716_v37  ;;  %3151 = vmatmul.f32.gmra.mxu0 %v5716_v37  ;;  %v3257_v5 = vld [vmem:[#allocation6 + $0x298] sm:$0xff]  ;;  %v3254_v25 = vld [vmem:[#allocation6 + $0x280] sm:$0xff] }
 0x307   :  { %2965 = vmatpush.msrb.mxu2 %v2924_v43  ;;  %v3253_v43 = vld [vmem:[#allocation6 + $0x278] sm:$0xff] }
 0x309   :  { %v2467_v40 = vpop.permute.xlu0 %2466 }
 0x30d   :  { %v5721_v57 = vld [vmem:[#allocation3 + $0x78] sm:$0xff] }
 0x30e   :  { %4063 = vmatmul.msk.f32.gmra.mxu3 %vm446_vm2, %v5721_v57  ;;  %4084 = vmatmul.msk.f32.gmra.mxu1 %vm446_vm2, %v5721_v57 }
 0x30f   :  { %2809 = vmatmul.f32.vlgmr.msra.gmra.mxu2 %v5579_v56  ;;  %v2923_v56 = vld [vmem:[#allocation6 + $0x158] sm:$0xff] }
 0x310   :  { %2966 = vmatpush.msrb.mxu2 %v2923_v56  ;;  %v3248_v56 = vld [vmem:[#allocation6 + $0x250] sm:$0xff] }
 0x312   :  { %v2469_v47 = vpop.permute.xlu1 %2468  ;;  %2967 = vmatpush.msrb.mxu2 %v2922_v2  ;;  %v3247_v2 = vld [vmem:[#allocation6 + $0x248] sm:$0xff] }
 0x313   :  { %v2476_v35 = vsel %vm2252_vm3, %v2469_v47, %v2474_v39  ;;  %v2470_v51 = vsel %vm2245_vm4, %v2467_v40, %v2469_v47  ;;  %v3262_v39 = vld [vmem:[#allocation6 + $0x2c0] sm:$0xff]  ;;  %v3252_v40 = vld [vmem:[#allocation6 + $0x270] sm:$0xff] }
 0x314   :  { %v2478_v28 = vmax.f32 %v5583_v20, %v2476_v35  ;;  %v5732_v36 = vmax.f32 %v5565_v19, %v2470_v51  ;;  %v2921_v19 = vld [vmem:[#allocation6 + $0x148] sm:$0xff]  ;;  %v2502_v20 = vpop.permute.xlu2 %2501 }
 0x315   :  { %2968 = vmatpush.msrb.mxu2 %v2921_v19  ;;  %v3246_v19 = vld [vmem:[#allocation6 + $0x240] sm:$0xff] }
 0x316   :  { %2481 = vst.msk [vmem:[#allocation3 + $0x88] sm:$0xff] %vm446_vm2, %v2478_v28  ;;  %4064 = vmatmul.msk.f32.vlgmr.msra.gmra.mxu3 %vm446_vm2, %v5596_v55  ;;  %3154 = vmatmul.f32.gmra.mxu0 %v5732_v36  ;;  %v3250_v28 = vld [vmem:[#allocation6 + $0x260] sm:$0xff] }
 0x317   :  { %2812 = vmatmul.f32.gmra.mxu2 %v5619_v63  ;;  %3343 = vmatpush.msra.mxu3 %v3263_v50 }
 0x318   :  { %2969 = vmatpush.msrb.mxu2 %v2920_v18 }
 0x319   :  { %v2495_v4 = vpop.permute.xlu0 %2494  ;;  %v5795_v12 = vpop.f32.mrf.mxu2  ;;  %3344 = vmatpush.msra.mxu3 %v3262_v39 }
 0x31a   :  { %2970 = vmatpush.msrb.mxu2 %v2919_v44 }
 0x31c   :  { %2971 = vmatpush.msrb.mxu2 %v2918_v41  ;;  %v2530_v29 = vpop.permute.xlu2 %2529 }
 0x31d   :  { %v5739_v48 = vld [vmem:[#allocation3 + $0x88] sm:$0xff] }
 0x31e   :  { %4065 = vmatmul.msk.f32.gmra.mxu3 %vm446_vm2, %v5633_v54  ;;  %4085 = vmatmul.msk.f32.gmra.mxu1 %vm446_vm2, %v5739_v48 }
 0x31f   :  { %2815 = vmatmul.f32.gmra.mxu2 %v5646_v8 }
 0x320   :  { %2972 = vmatpush.msrb.mxu2 %v2917_v34 }
 0x321   :  { %v5803_v35 = vpop.f32.mrf.mxu2 }
 0x322   :  { %v2497_v55 = vpop.permute.xlu1 %2496  ;;  %v5800_v47 = vpop.f32.mrf.mxu3 }
 0x323   :  { %v2504_v38 = vsel %vm2252_vm3, %v2497_v55, %v2502_v20  ;;  %v2498_v49 = vsel %vm2245_vm4, %v2495_v4, %v2497_v55 }
 0x324   :  { %v2506_v30 = vmax.f32 %v5609_v27, %v2504_v38  ;;  %v5750_v7 = vmax.f32 %v5594_v26, %v2498_v49  ;;  %v2916_v26 = vld [vmem:[#allocation6 + $0x120] sm:$0xff] }
 0x325   :  { %2973 = vmatpush.msrb.mxu2 %v2916_v26 }
 0x326   :  { %2509 = vst.msk [vmem:[#allocation3 + $0x98] sm:$0xff] %vm446_vm2, %v2506_v30  ;;  %4066 = vmatmul.msk.f32.gmra.mxu3 %vm446_vm2, %v5657_v31  ;;  %3157 = vmatmul.f32.gmra.mxu0 %v5750_v7 }
 0x327   :  { %2818 = vmatmul.f32.gmra.mxu2 %v5671_v16 }
 0x328   :  { %3288 = vmatpush.msra.mxu2 %v3261_v1 }
 0x329   :  { %v2523_v10 = vpop.permute.xlu0 %2522 }
 0x32a   :  { %3289 = vmatpush.msra.mxu2 %v3260_v32 }
 0x32d   :  { %v5757_v27 = vld [vmem:[#allocation3 + $0x98] sm:$0xff] }
 0x32e   :  { %4067 = vmatmul.msk.f32.gmra.mxu3 %vm446_vm2, %v5676_v9  ;;  %4086 = vmatmul.msk.f32.gmra.mxu1 %vm446_vm2, %v5757_v27 }
 0x32f   :  { %2821 = vmatmul.f32.gmra.mxu2 %v5686_v61 }
 0x332   :  { %v2525_v23 = vpop.permute.xlu1 %2524 }
 0x333   :  { %v2532_v13 = vsel %vm2252_vm3, %v2525_v23, %v2530_v29  ;;  %v2526_v15 = vsel %vm2245_vm4, %v2523_v10, %v2525_v23 }
 0x334   :  { %v2534_v17 = vmax.f32 %v5637_v42, %v2532_v13  ;;  %v5768_v24 = vmax.f32 %v5622_v22, %v2526_v15  ;;  %v3259_v22 = vld [vmem:[#allocation6 + $0x2a8] sm:$0xff]  ;;  %v2558_v42 = vpop.permute.xlu2 %2557 }
 0x335   :  { %3290 = vmatpush.msra.mxu2 %v3259_v22 }
 0x336   :  { %2537 = vst.msk [vmem:[#allocation3 + $0xa8] sm:$0xff] %vm446_vm2, %v2534_v17  ;;  %4068 = vmatmul.msk.f32.gmra.mxu3 %vm446_vm2, %v5691_v46  ;;  %3160 = vmatmul.f32.gmra.mxu0 %v5768_v24 }
 0x337   :  { %2824 = vmatmul.f32.gmra.mxu2 %v5701_v14 }
 0x338   :  { %3291 = vmatpush.msra.mxu2 %v3258_v60 }
 0x339   :  { %v2551_v59 = vpop.permute.xlu0 %2550  ;;  %v5810_v51 = vpop.f32.mrf.mxu2 }
 0x33a   :  { %3292 = vmatpush.msra.mxu2 %v3257_v5 }
 0x33c   :  { %3293 = vmatpush.msra.mxu2 %v3256_v6 }
 0x33d   :  { %v5775_v3 = vld [vmem:[#allocation3 + $0xa8] sm:$0xff] }
 0x33e   :  { %4069 = vmatmul.msk.f32.gmra.mxu3 %vm446_vm2, %v5706_v0  ;;  %4087 = vmatmul.msk.f32.gmra.mxu1 %vm446_vm2, %v5775_v3 }
 0x33f   :  { %2827 = vmatmul.f32.gmra.mxu2 %v5716_v37 }
 0x342   :  { %v2553_v21 = vpop.permute.xlu1 %2552 }
 0x343   :  { %v2560_v11 = vsel %vm2252_vm3, %v2553_v21, %v2558_v42  ;;  %v5784_v33 = vsel %vm2245_vm4, %v2551_v59, %v2553_v21 }
 0x344   :  { %v2562_v53 = vmax.f32 %v5663_v58, %v2560_v11  ;;  %v2561_v62 = vmax.f32 %v5648_v52, %v5784_v33  ;;  %v3255_v58 = vld [vmem:[#allocation6 + $0x288] sm:$0xff] }
 0x345   :  { %3294 = vmatpush.msra.mxu2 %v3255_v58 }
 0x346   :  { %2565 = vst.msk [vmem:[#allocation3 + $0xb8] sm:$0xff] %vm446_vm2, %v2562_v53  ;;  %4070 = vmatmul.msk.f32.gmra.mxu3 %vm446_vm2, %v5721_v57 }
 0x347   :  { %2830 = vmatmul.f32.gmra.mxu2 %v5732_v36 }
 0x348   :  { %3295 = vmatpush.msra.mxu2 %v3254_v25 }
 0x34a   :  { %3296 = vmatpush.msra.mxu2 %v3253_v43 }
 0x34c   :  { %3297 = vmatpush.msra.mxu2 %v3252_v40 }
 0x34d   :  { %v3244_v21 = vld [vmem:[#allocation3 + $0xb8] sm:$0xff] }
 0x34e   :  { %4071 = vmatmul.msk.f32.gmra.mxu3 %vm446_vm2, %v5739_v48 }
 0x34f   :  { %2974 = vmatmul.f32.vlgmr.msrb.gmra.mxu2 %v5619_v63  ;;  %v3251_v63 = vld [vmem:[#allocation6 + $0x268] sm:$0xff] }
 0x350   :  { %3298 = vmatpush.msra.mxu2 %v3251_v63 }
 0x352   :  { %3299 = vmatpush.msra.mxu2 %v3250_v28 }
 0x356   :  { %4072 = vmatmul.msk.f32.vlgmr.msrb.gmra.mxu3 %vm446_vm2, %v5633_v54  ;;  %v5808_v54 = vpop.f32.mrf.mxu3 }
 0x357   :  { %2977 = vmatmul.f32.gmra.mxu2 %v5646_v8  ;;  %v3249_v8 = vld [vmem:[#allocation6 + $0x258] sm:$0xff]  ;;  %v2686_v5 = vadd.f32 %v5808_v54, %v5803_v35 }
 0x358   :  { %3300 = vmatpush.msra.mxu2 %v3249_v8 }
 0x35a   :  { %3301 = vmatpush.msra.mxu2 %v3248_v56 }
 0x35c   :  { %3302 = vmatpush.msra.mxu2 %v3247_v2 }
 0x35e   :  { %4073 = vmatmul.msk.f32.gmra.mxu3 %vm446_vm2, %v5657_v31  ;;  %v5815_v45 = vpop.f32.mrf.mxu3  ;;  %v5817_v31 = vpop.f32.mrf.mxu2  ;;  %3303 = vmatpush.msra.mxu2 %v3246_v19 }
 0x35f   :  { %2980 = vmatmul.f32.gmra.mxu2 %v5671_v16  ;;  %v2689_v40 = vadd.f32 %v5815_v45, %v5810_v51 }
 0x366   :  { %4074 = vmatmul.msk.f32.gmra.mxu3 %vm446_vm2, %v5676_v9  ;;  %v5822_v20 = vpop.f32.mrf.mxu3  ;;  %v5824_v55 = vpop.f32.mrf.mxu2 }
 0x367   :  { %2983 = vmatmul.f32.gmra.mxu2 %v5686_v61 }
 0x36e   :  { %4075 = vmatmul.msk.f32.gmra.mxu3 %vm446_vm2, %v5691_v46  ;;  %v5829_v4 = vpop.f32.mrf.mxu3  ;;  %v5831_v38 = vpop.f32.mrf.mxu2 }
 0x36f   :  { %2986 = vmatmul.f32.gmra.mxu2 %v5701_v14  ;;  %v2695_v51 = vadd.f32 %v5829_v4, %v5824_v55  ;;  %v3181_v4 = vpop.f32.mrf.mxu1 }
 0x376   :  { %4076 = vmatmul.msk.f32.gmra.mxu3 %vm446_vm2, %v5706_v0  ;;  %v5836_v49 = vpop.f32.mrf.mxu3 }
 0x377   :  { %2989 = vmatmul.f32.gmra.mxu2 %v5716_v37 }
 0x379   :  { %v2659_v30 = vpop.f32.mrf.mxu2 }
 0x37e   :  { %4077 = vmatmul.msk.f32.gmra.mxu3 %vm446_vm2, %v5721_v57 }
 0x37f   :  { %2992 = vmatmul.f32.gmra.mxu2 %v5732_v36 }
 0x381   :  { %v2700_v18 = vpop.f32.mrf.mxu3 }
 0x382   :  { %v2701_v32 = vadd.f32 %v2700_v18, %v2659_v30  ;;  %v2692_v30 = vadd.f32 %v5822_v20, %v5817_v31 }
 0x386   :  { %4078 = vmatmul.msk.f32.gmra.mxu3 %vm446_vm2, %v5739_v48 }
 0x387   :  { %2995 = vmatmul.f32.gmra.mxu2 %v5750_v7 }
 0x389   :  { %v2662_v44 = vpop.f32.mrf.mxu2 }
 0x38e   :  { %4079 = vmatmul.msk.f32.gmra.mxu3 %vm446_vm2, %v5757_v27 }
 0x38f   :  { %3304 = vmatmul.f32.vlgmr.msra.gmra.mxu2 %v5671_v16 }
 0x391   :  { %v2703_v41 = vpop.f32.mrf.mxu3 }
 0x392   :  { %v2704_v34 = vadd.f32 %v2703_v41, %v2662_v44  ;;  %v5844_v26 = vpop.f32.mrf.mxu2 }
 0x396   :  { %4088 = vmatmul.msk.f32.vlgmr.msra.gmra.mxu3 %vm446_vm2, %v5676_v9 }
 0x397   :  { %3307 = vmatmul.f32.gmra.mxu2 %v5686_v61 }
 0x399   :  { %v5849_v29 = vpop.f32.mrf.mxu3 }
 0x39a   :  { %v2813_v23 = vpop.f32.mrf.mxu2 }
 0x39e   :  { %4089 = vmatmul.msk.f32.gmra.mxu3 %vm446_vm2, %v5691_v46 }
 0x39f   :  { %3310 = vmatmul.f32.gmra.mxu2 %v5701_v14 }
 0x3a1   :  { %v2854_v10 = vpop.f32.mrf.mxu3 }
 0x3a2   :  { %v2855_v13 = vadd.f32 %v2854_v10, %v2813_v23  ;;  %v2816_v16 = vpop.f32.mrf.mxu2 }
 0x3a6   :  { %4090 = vmatmul.msk.f32.gmra.mxu3 %vm446_vm2, %v5706_v0 }
 0x3a7   :  { %3313 = vmatmul.f32.gmra.mxu2 %v5716_v37 }
 0x3a9   :  { %v2857_v15 = vpop.f32.mrf.mxu3 }
 0x3aa   :  { %v2858_v9 = vadd.f32 %v2857_v15, %v2816_v16  ;;  %v2819_v17 = vpop.f32.mrf.mxu2 }
 0x3ae   :  { %4091 = vmatmul.msk.f32.gmra.mxu3 %vm446_vm2, %v5721_v57 }
 0x3af   :  { %3316 = vmatmul.f32.gmra.mxu2 %v5732_v36 }
 0x3b1   :  { %v2860_v61 = vpop.f32.mrf.mxu3 }
 0x3b2   :  { %v2861_v46 = vadd.f32 %v2860_v61, %v2819_v17  ;;  %v2822_v1 = vpop.f32.mrf.mxu2 }
 0x3b6   :  { %4092 = vmatmul.msk.f32.gmra.mxu3 %vm446_vm2, %v5739_v48  ;;  %v5876_v48 = vld [vmem:[%s5961_s4] ss:$0 sm:$0xff]  ;;  %s4237_s4 = smov 112  }
 0x3b7   :  { %3319 = vmatmul.f32.gmra.mxu2 %v5750_v7  ;;  %v2711_v6 = vadd.f32 %v5876_v48, %v2686_v5  ;;  %v2712_v28 = vadd.f32 %v5876_v48, %v2689_v40  ;;  %v2713_v54 = vadd.f32 %v5876_v48, %v2692_v30  ;;  %v2714_v23 = vadd.f32 %v5876_v48, %v2695_v51 }
 0x3b9   :  { %v2863_v14 = vpop.f32.mrf.mxu3  ;;  %v2876_v25 = vadd.f32 %v2855_v13, %v2711_v6  ;;  %v2877_v56 = vadd.f32 %v2858_v9, %v2712_v28  ;;  %v2878_v44 = vadd.f32 %v2861_v46, %v2713_v54 }
 0x3ba   :  { %v2864_v0 = vadd.f32 %v2863_v14, %v2822_v1  ;;  %v2825_v50 = vpop.f32.mrf.mxu2 }
 0x3bc   :  { %v2879_v13 = vadd.f32 %v2864_v0, %v2714_v23  ;;  %v3140_v0 = vpop.f32.mrf.mxu0 }
 0x3be   :  { %4093 = vmatmul.msk.f32.gmra.mxu3 %vm446_vm2, %v5757_v27  ;;  %v2716_v27 = vadd.f32 %v5876_v48, %v2701_v32 }
 0x3bf   :  { %3322 = vmatmul.f32.gmra.mxu2 %v5768_v24 }
 0x3c1   :  { %v2866_v37 = vpop.f32.mrf.mxu3 }
 0x3c2   :  { %v5866_v57 = vadd.f32 %v2866_v37, %v2825_v50  ;;  %v2828_v36 = vpop.f32.mrf.mxu2  ;;  %v2683_v50 = vadd.f32 %v5800_v47, %v5795_v12  ;;  %v2852_v37 = vadd.f32 %v5849_v29, %v5844_v26 }
 0x3c4   :  { %v2710_v32 = vadd.f32 %v5876_v48, %v2683_v50  ;;  %v3470_v50 = vld [vmem:[#allocation8 + $0xf0] sm:$0xff] }
 0x3c6   :  { %4094 = vmatmul.msk.f32.gmra.mxu3 %vm446_vm2, %v5775_v3  ;;  %v2717_v3 = vadd.f32 %v5876_v48, %v2704_v34 }
 0x3c7   :  { %3325 = vmatmul.f32.gmra.mxu2 %v2561_v62 }
 0x3c9   :  { %v2869_v7 = vpop.f32.mrf.mxu3 }
 0x3ca   :  { %v2870_v24 = vadd.f32 %v2869_v7, %v2828_v36  ;;  %v2831_v22 = vpop.f32.mrf.mxu2 }
 0x3cc   :  { %v2881_v42 = vadd.f32 %v2870_v24, %v2716_v27  ;;  %v2875_v27 = vadd.f32 %v2852_v37, %v2710_v32  ;;  %v3184_v24 = vpop.f32.mrf.mxu1 }
 0x3ce   :  { %4095 = vmatmul.msk.f32.gmra.mxu3 %vm446_vm2, %v3244_v21  ;;  %v3182_v21 = vadd.f32 %v3181_v4, %v3140_v0  ;;  %v3502_v4 = vld [vmem:[#allocation8 + $0x1f0] sm:$0xff]  ;;  %v3485_v0 = vld [vmem:[#allocation8 + $0x168] sm:$0xff] }
 0x3d1   :  { %v2872_v59 = vpop.f32.mrf.mxu3 }
 0x3d2   :  { %v2873_v11 = vadd.f32 %v2872_v59, %v2831_v22  ;;  %v2975_v52 = vpop.f32.mrf.mxu2 }
 0x3d4   :  { %v5881_v33 = vadd.f32 %v2873_v11, %v2717_v3  ;;  %v3187_v26 = vpop.f32.mrf.mxu1 }
 0x3d9   :  { %v3016_v53 = vpop.f32.mrf.mxu3 }
 0x3da   :  { %v3017_v62 = vadd.f32 %v3016_v53, %v2975_v52  ;;  %v2978_v60 = vpop.f32.mrf.mxu2 }
 0x3dc   :  { %v3040_v22 = vadd.f32 %v3017_v62, %v2875_v27  ;;  %v3452_v27 = vld [vmem:[#allocation8 + $0x60] sm:$0xff] }
 0x3de   :  { %v3205_v52 = vadd.f32 %v3182_v21, %v3040_v22  ;;  %v3500_v22 = vld [vmem:[#allocation8 + $0x1e0] sm:$0xff] }
 0x3e1   :  { %v3019_v58 = vpop.f32.mrf.mxu3 }
 0x3e2   :  { %v3020_v43 = vadd.f32 %v3019_v58, %v2978_v60  ;;  %v2981_v39 = vpop.f32.mrf.mxu2 }
 0x3e4   :  { %v3041_v63 = vadd.f32 %v3020_v43, %v2876_v25  ;;  %v3190_v25 = vpop.f32.mrf.mxu1 }
 0x3e9   :  { %v3022_v8 = vpop.f32.mrf.mxu3 }
 0x3ea   :  { %v3023_v2 = vadd.f32 %v3022_v8, %v2981_v39  ;;  %v2984_v19 = vpop.f32.mrf.mxu2 }
 0x3ec   :  { %v3042_v35 = vadd.f32 %v3023_v2, %v2877_v56 }
 0x3f1   :  { %v3025_v18 = vpop.f32.mrf.mxu3 }
 0x3f2   :  { %v3026_v41 = vadd.f32 %v3025_v18, %v2984_v19  ;;  %v2987_v34 = vpop.f32.mrf.mxu2  ;;  %v3193_v18 = vpop.f32.mrf.mxu1 }
 0x3f4   :  { %v3043_v45 = vadd.f32 %v3026_v41, %v2878_v44  ;;  %v2698_v44 = vadd.f32 %v5836_v49, %v5831_v38  ;;  %v3454_v38 = vld [vmem:[#allocation8 + $0x70] sm:$0xff] }
 0x3f6   :  { %v2715_v23 = vadd.f32 %v5876_v48, %v2698_v44  ;;  %v3448_v44 = vld [vmem:[#allocation8 + $0x40] sm:$0xff] }
 0x3f9   :  { %v3028_v10 = vpop.f32.mrf.mxu3 }
 0x3fa   :  { %v3029_v16 = vadd.f32 %v3028_v10, %v2987_v34  ;;  %v2990_v15 = vpop.f32.mrf.mxu2 }
 0x3fc   :  { %v5895_v9 = vadd.f32 %v3029_v16, %v2879_v13  ;;  %v3455_v13 = vld [vmem:[#allocation8 + $0x78] sm:$0xff] }
 0x3fd   :  { %v3503_v16 = vld [vmem:[#allocation8 + $0x1f8] sm:$0xff]  ;;  %3508 = vmatpush.msra.mxu0 %v3455_v13  ;;  %v3478_v13 = vld [vmem:[#allocation8 + $0x130] sm:$0xff] }
 0x3fe   :  { %3568 = vmatpush.msrb.mxu3 %v3503_v16 }
 0x3ff   :  { %3509 = vmatpush.msra.mxu0 %v3454_v38  ;;  %v3445_v38 = vld [vmem:[#allocation8 + $0x28] sm:$0xff] }
 0x400   :  { %3569 = vmatpush.msrb.mxu3 %v3502_v4 }
 0x401   :  { %v3031_v31 = vpop.f32.mrf.mxu3 }
 0x402   :  { %v2993_v20 = vpop.f32.mrf.mxu2  ;;  %v3032_v10 = vadd.f32 %v3031_v31, %v2990_v15  ;;  %v3501_v15 = vld [vmem:[#allocation8 + $0x1e8] sm:$0xff] }
 0x403   :  { %v3469_v31 = vld [vmem:[#allocation8 + $0xe8] sm:$0xff]  ;;  %3570 = vmatpush.msrb.mxu3 %v3501_v15 }
 0x405   :  { %3571 = vmatpush.msrb.mxu3 %v3500_v22 }
 0x409   :  { %v3034_v17 = vpop.f32.mrf.mxu3 }
 0x40a   :  { %v3035_v61 = vadd.f32 %v3034_v17, %v2993_v20  ;;  %v5897_v1 = vpop.f32.mrf.mxu2  ;;  %v3196_v20 = vpop.f32.mrf.mxu1 }
 0x40c   :  { %v5899_v46 = vadd.f32 %v3035_v61, %v2881_v42  ;;  %v3143_v42 = vpop.f32.mrf.mxu0  ;;  %v3471_v61 = vld [vmem:[#allocation8 + $0xf8] sm:$0xff] }
 0x40d   :  { %v3185_v59 = vadd.f32 %v3184_v24, %v3143_v42  ;;  %3528 = vmatpush.msra.mxu1 %v3471_v61  ;;  %v3468_v42 = vld [vmem:[#allocation8 + $0xe0] sm:$0xff]  ;;  %v3462_v61 = vld [vmem:[#allocation8 + $0xb0] sm:$0xff] }
 0x40f   :  { %v3206_v53 = vadd.f32 %v3185_v59, %v3041_v63  ;;  %3529 = vmatpush.msra.mxu1 %v3470_v50 }
 0x411   :  { %v5901_v14 = vpop.f32.mrf.mxu3  ;;  %3530 = vmatpush.msra.mxu1 %v3469_v31 }
 0x412   :  { %v3305_v55 = vpop.f32.mrf.mxu2 }
 0x413   :  { %3531 = vmatpush.msra.mxu1 %v3468_v42  ;;  %v3474_v42 = vld [vmem:[#allocation8 + $0x110] sm:$0xff] }
 0x414   :  { %v3146_v6 = vpop.f32.mrf.mxu0 }
 0x415   :  { %v3188_v39 = vadd.f32 %v3187_v26, %v3146_v6  ;;  %v3482_v6 = vld [vmem:[#allocation8 + $0x150] sm:$0xff] }
 0x417   :  { %v3207_v63 = vadd.f32 %v3188_v39, %v3042_v35  ;;  %v2880_v35 = vadd.f32 %v5866_v57, %v2715_v23  ;;  %v3453_v57 = vld [vmem:[#allocation8 + $0x68] sm:$0xff]  ;;  %v3038_v23 = vadd.f32 %v5901_v14, %v5897_v1  ;;  %v3446_v1 = vld [vmem:[#allocation8 + $0x30] sm:$0xff] }
 0x418   :  { %3510 = vmatpush.msra.mxu0 %v3453_v57  ;;  %v3481_v39 = vld [vmem:[#allocation8 + $0x148] sm:$0xff]  ;;  %v3494_v14 = vld [vmem:[#allocation8 + $0x1b0] sm:$0xff] }
 0x419   :  { %v3346_v36 = vpop.f32.mrf.mxu3  ;;  %v3045_v49 = vadd.f32 %v3032_v10, %v2880_v35  ;;  %v3495_v35 = vld [vmem:[#allocation8 + $0x1b8] sm:$0xff]  ;;  %v3461_v57 = vld [vmem:[#allocation8 + $0xa8] sm:$0xff] }
 0x41a   :  { %v3308_v7 = vpop.f32.mrf.mxu2  ;;  %v3347_v3 = vadd.f32 %v3346_v36, %v3305_v55  ;;  %v3486_v55 = vld [vmem:[#allocation8 + $0x170] sm:$0xff]  ;;  %3511 = vmatpush.msra.mxu0 %v3452_v27  ;;  %v3443_v27 = vld [vmem:[#allocation8 + $0x18] sm:$0xff] }
 0x41c   :  { %v5908_v47 = vadd.f32 %v3347_v3, %v3205_v52  ;;  %v3149_v43 = vpop.f32.mrf.mxu0  ;;  %v3451_v52 = vld [vmem:[#allocation8 + $0x58] sm:$0xff] }
 0x41d   :  { %v3191_v40 = vadd.f32 %v3190_v25, %v3149_v43  ;;  %3512 = vmatpush.msra.mxu0 %v3451_v52  ;;  %v3466_v25 = vld [vmem:[#allocation8 + $0xd0] sm:$0xff]  ;;  %v3492_v52 = vld [vmem:[#allocation8 + $0x1a0] sm:$0xff] }
 0x41f   :  { %v3208_v56 = vadd.f32 %v3191_v40, %v3043_v45  ;;  %v3487_v45 = vld [vmem:[#allocation8 + $0x178] sm:$0xff]  ;;  %v3449_v40 = vld [vmem:[#allocation8 + $0x48] sm:$0xff] }
 0x420   :  { %3548 = vmatpush.msrb.mxu2 %v3487_v45  ;;  %v3463_v45 = vld [vmem:[#allocation8 + $0xb8] sm:$0xff] }
 0x421   :  { %v3349_v11 = vpop.f32.mrf.mxu3 }
 0x422   :  { %v3350_v60 = vadd.f32 %v3349_v11, %v3308_v7  ;;  %v3311_v12 = vpop.f32.mrf.mxu2  ;;  %3549 = vmatpush.msrb.mxu2 %v3486_v55  ;;  %v3484_v7 = vld [vmem:[#allocation8 + $0x160] sm:$0xff]  ;;  %v3483_v11 = vld [vmem:[#allocation8 + $0x158] sm:$0xff] }
 0x424   :  { %v5910_v5 = vadd.f32 %v3350_v60, %v3206_v53  ;;  %v3152_v34 = vpop.f32.mrf.mxu0  ;;  %3550 = vmatpush.msrb.mxu2 %v3485_v0  ;;  %v3499_v53 = vld [vmem:[#allocation8 + $0x1d8] sm:$0xff] }
 0x425   :  { %v3194_v37 = vadd.f32 %v3193_v18, %v3152_v34  ;;  %v3467_v60 = vld [vmem:[#allocation8 + $0xd8] sm:$0xff]  ;;  %3572 = vmatpush.msrb.mxu3 %v3499_v53  ;;  %v3480_v18 = vld [vmem:[#allocation8 + $0x140] sm:$0xff]  ;;  %v3441_v53 = vld [vmem:[#allocation8 + $0x8] sm:$0xff] }
 0x426   :  { %v3389_v29 = vmax.f32 %v5908_v47, %v5910_v5  ;;  %3551 = vmatpush.msrb.mxu2 %v3484_v7  ;;  %3532 = vmatpush.msra.mxu1 %v3467_v60  ;;  %v3464_v47 = vld [vmem:[#allocation8 + $0xc0] sm:$0xff]  ;;  %v3479_v5 = vld [vmem:[#allocation8 + $0x138] sm:$0xff]  ;;  %v3473_v60 = vld [vmem:[#allocation8 + $0x108] sm:$0xff] }
 0x427   :  { %v3209_v21 = vadd.f32 %v3194_v37, %v5895_v9  ;;  %v3498_v9 = vld [vmem:[#allocation8 + $0x1d0] sm:$0xff]  ;;  %v3475_v7 = vld [vmem:[#allocation8 + $0x118] sm:$0xff] }
 0x428   :  { %3552 = vmatpush.msrb.mxu2 %v3483_v11  ;;  %3573 = vmatpush.msrb.mxu3 %v3498_v9  ;;  %v3490_v9 = vld [vmem:[#allocation8 + $0x190] sm:$0xff] }
 0x429   :  { %v3352_v58 = vpop.f32.mrf.mxu3  ;;  %3533 = vmatpush.msra.mxu1 %v3466_v25  ;;  %v3488_v25 = vld [vmem:[#allocation8 + $0x180] sm:$0xff] }
 0x42a   :  { %v3314_v62 = vpop.f32.mrf.mxu2  ;;  %v3353_v28 = vadd.f32 %v3352_v58, %v3311_v12  ;;  %v3450_v58 = vld [vmem:[#allocation8 + $0x50] sm:$0xff]  ;;  %3553 = vmatpush.msrb.mxu2 %v3482_v6  ;;  %v3472_v6 = vld [vmem:[#allocation8 + $0x100] sm:$0xff] }
 0x42b   :  { %3513 = vmatpush.msra.mxu0 %v3450_v58  ;;  %v3491_v58 = vld [vmem:[#allocation8 + $0x198] sm:$0xff] }
 0x42c   :  { %v5914_v30 = vadd.f32 %v3353_v28, %v3207_v63  ;;  %v3155_v48 = vpop.f32.mrf.mxu0  ;;  %v3497_v63 = vld [vmem:[#allocation8 + $0x1c8] sm:$0xff]  ;;  %3554 = vmatpush.msrb.mxu2 %v3481_v39  ;;  %v3604_v39 = vld [vmem:[#allocation10 + $0x78] sm:$0xff] }
 0x42d   :  { %v3197_v36 = vadd.f32 %v3196_v20, %v3155_v48  ;;  %3514 = vmatpush.msra.mxu0 %v3449_v40  ;;  %3574 = vmatpush.msrb.mxu3 %v3497_v63  ;;  %v3047_v20 = vadd.f32 %v3038_v23, %v5881_v33  ;;  %v3476_v48 = vld [vmem:[#allocation8 + $0x120] sm:$0xff]  ;;  %v3603_v40 = vld [vmem:[#allocation10 + $0x70] sm:$0xff] }
 0x42e   :  { %3555 = vmatpush.msrb.mxu2 %v3480_v18  ;;  %v3444_v33 = vld [vmem:[#allocation8 + $0x20] sm:$0xff] }
 0x42f   :  { %v3210_v59 = vadd.f32 %v3197_v36, %v3045_v49  ;;  %3515 = vmatpush.msra.mxu0 %v3448_v44  ;;  %v3493_v49 = vld [vmem:[#allocation8 + $0x1a8] sm:$0xff] }
 0x430   :  { %3556 = vmatpush.msrb.mxu2 %v3479_v5  ;;  %v3601_v5 = vld [vmem:[#allocation10 + $0x60] sm:$0xff] }
 0x431   :  { %v3355_v8 = vpop.f32.mrf.mxu3 }
 0x432   :  { %v3356_v2 = vadd.f32 %v3355_v8, %v3314_v62  ;;  %v3317_v19 = vpop.f32.mrf.mxu2  ;;  %v3199_v62 = vpop.f32.mrf.mxu1  ;;  %3557 = vmatpush.msrb.mxu2 %v3478_v13  ;;  %v3595_v13 = vld [vmem:[#allocation10 + $0x30] sm:$0xff] }
 0x434   :  { %v5916_v54 = vadd.f32 %v3356_v2, %v3208_v56  ;;  %v3158_v28 = vpop.f32.mrf.mxu0  ;;  %v3465_v56 = vld [vmem:[#allocation8 + $0xc8] sm:$0xff]  ;;  %v5928_v2 = vmax.f32 %v3389_v29, 0.0  ;;  %v3447_v29 = vld [vmem:[#allocation8 + $0x38] sm:$0xff] }
 0x435   :  { %3534 = vmatpush.msra.mxu1 %v3465_v56  ;;  %3516 = vmatpush.msra.mxu0 %v3447_v29  ;;  %v3200_v4 = vadd.f32 %v3199_v62, %v3158_v28  ;;  %v3459_v62 = vld [vmem:[#allocation8 + $0x98] sm:$0xff] }
 0x436   :  { %v3401_v41 = vmax.f32 %v5914_v30, %v5916_v54  ;;  %v3458_v30 = vld [vmem:[#allocation8 + $0x90] sm:$0xff]  ;;  %v3489_v54 = vld [vmem:[#allocation8 + $0x188] sm:$0xff]  ;;  %v3600_v29 = vld [vmem:[#allocation10 + $0x58] sm:$0xff] }
 0x437   :  { %3535 = vmatpush.msra.mxu1 %v3464_v47  ;;  %3517 = vmatpush.msra.mxu0 %v3446_v1  ;;  %v3211_v37 = vadd.f32 %v3200_v4, %v5899_v46  ;;  %v3602_v47 = vld [vmem:[#allocation10 + $0x68] sm:$0xff]  ;;  %v3593_v1 = vld [vmem:[#allocation10 + $0x20] sm:$0xff] }
 0x438   :  { %v3402_v46 = vmax.f32 %v3401_v41, 0.0  ;;  %v3457_v41 = vld [vmem:[#allocation8 + $0x88] sm:$0xff]  ;;  %v3642_v4 = vld [vmem:[#allocation11 + $0x60] sm:$0xff] }
 0x439   :  { %v3358_v51 = vpop.f32.mrf.mxu3  ;;  %3536 = vmatpush.msra.mxu1 %v3463_v45  ;;  %3518 = vmatpush.msra.mxu0 %v3445_v38  ;;  %v3598_v45 = vld [vmem:[#allocation10 + $0x48] sm:$0xff]  ;;  %v3644_v38 = vld [vmem:[#allocation11 + $0x70] sm:$0xff] }
 0x43a   :  { %v3320_v17 = vpop.f32.mrf.mxu2  ;;  %v3359_v32 = vadd.f32 %v3358_v51, %v3317_v19  ;;  %v3496_v51 = vld [vmem:[#allocation8 + $0x1c0] sm:$0xff]  ;;  %v3202_v16 = vpop.f32.mrf.mxu1 }
 0x43b   :  { %3575 = vmatpush.msrb.mxu3 %v3496_v51  ;;  %3537 = vmatpush.msra.mxu1 %v3462_v61  ;;  %v3589_v61 = vld [vmem:[#allocation10] sm:$0xff] }
 0x43c   :  { %v3374_v12 = vadd.f32 %v3359_v32, %v3209_v21  ;;  %v3161_v55 = vpop.f32.mrf.mxu0  ;;  %3519 = vmatpush.msra.mxu0 %v3444_v33  ;;  %v3442_v21 = vld [vmem:[#allocation8 + $0x10] sm:$0xff] }
 0x43d   :  { %3576 = vmatpush.msrb.mxu3 %v3495_v35  ;;  %v3203_v50 = vadd.f32 %v3202_v16, %v3161_v55  ;;  %3538 = vmatpush.msra.mxu1 %v3461_v57  ;;  %v3599_v35 = vld [vmem:[#allocation10 + $0x50] sm:$0xff]  ;;  %v3594_v16 = vld [vmem:[#allocation10 + $0x28] sm:$0xff]  ;;  %v3645_v55 = vld [vmem:[#allocation11 + $0x78] sm:$0xff] }
 0x43e   :  { %3520 = vmatpush.msra.mxu0 %v3443_v27  ;;  %v3638_v57 = vld [vmem:[#allocation11 + $0x40] sm:$0xff]  ;;  %v3636_v33 = vld [vmem:[#allocation11 + $0x30] sm:$0xff] }
 0x43f   :  { %3577 = vmatpush.msrb.mxu3 %v3494_v14  ;;  %v3212_v36 = vadd.f32 %v3203_v50, %v3047_v20  ;;  %v3592_v14 = vld [vmem:[#allocation10 + $0x18] sm:$0xff]  ;;  %v3591_v20 = vld [vmem:[#allocation10 + $0x10] sm:$0xff] }
 0x440   :  { %3521 = vmatpush.msra.mxu0 %v3442_v21  ;;  %v3641_v50 = vld [vmem:[#allocation11 + $0x58] sm:$0xff] }
 0x441   :  { %v3361_v24 = vpop.f32.mrf.mxu3  ;;  %3578 = vmatpush.msrb.mxu3 %v3493_v49  ;;  %v3643_v49 = vld [vmem:[#allocation11 + $0x68] sm:$0xff] }
 0x442   :  { %v3362_v3 = vadd.f32 %v3361_v24, %v3320_v17  ;;  %v3323_v8 = vpop.f32.mrf.mxu2  ;;  %v3477_v17 = vld [vmem:[#allocation8 + $0x128] sm:$0xff]  ;;  %3522 = vmatpush.msra.mxu0 %v3441_v53  ;;  %v3630_v53 = vld [vmem:[#allocation11] sm:$0xff] }
 0x443   :  { %3558 = vmatpush.msrb.mxu2 %v3477_v17  ;;  %3579 = vmatpush.msrb.mxu3 %v3492_v52  ;;  %v3590_v17 = vld [vmem:[#allocation10 + $0x8] sm:$0xff] }
 0x444   :  { %v3375_v26 = vadd.f32 %v3362_v3, %v3210_v59  ;;  %v3631_v52 = vld [vmem:[#allocation11 + $0x8] sm:$0xff] }
 0x445   :  { %3559 = vmatpush.msrb.mxu2 %v3476_v48  ;;  %3580 = vmatpush.msrb.mxu3 %v3491_v58  ;;  %v3639_v48 = vld [vmem:[#allocation11 + $0x48] sm:$0xff]  ;;  %v4126_v58 = vld [vmem:[%s5967_s10] ss:$0 sm:$0xff] }
 0x446   :  { %v3414_v43 = vmax.f32 %v3374_v12, %v3375_v26  ;;  %v3460_v12 = vld [vmem:[#allocation8 + $0xa0] sm:$0xff] }
 0x447   :  { %3560 = vmatpush.msrb.mxu2 %v3475_v7  ;;  %v3440_v26 = vld [vmem:[#allocation8] sm:$0xff]  ;;  %3539 = vmatpush.msra.mxu1 %v3460_v12 }
 0x448   :  { %v5930_v19 = vmax.f32 %v3414_v43, 0.0  ;;  %3523 = vmatpush.msra.mxu0 %v3440_v26  ;;  %3581 = vmatpush.msrb.mxu3 %v3490_v9  ;;  %v3456_v43 = vld [vmem:[#allocation8 + $0x80] sm:$0xff] }
 0x449   :  { %v3364_v34 = vpop.f32.mrf.mxu3  ;;  %3561 = vmatpush.msrb.mxu2 %v3474_v42  ;;  %3540 = vmatpush.msra.mxu1 %v3459_v62  ;;  %v3634_v7 = vld [vmem:[#allocation11 + $0x20] sm:$0xff] }
 0x44a   :  { %v4113_v10 = vpack.i.bf16 %v5928_v2, %v5930_v19  ;;  %v3365_v0 = vadd.f32 %v3364_v34, %v3323_v8  ;;  %v3326_v15 = vpop.f32.mrf.mxu2  ;;  %3582 = vmatpush.msrb.mxu3 %v3489_v54  ;;  %3609 = vmatpush.msrb.mxu0 %v3604_v39 }
 0x44b   :  { %3562 = vmatpush.msrb.mxu2 %v3473_v60  ;;  %3541 = vmatpush.msra.mxu1 %v3458_v30  ;;  %v4125_v60 = vld [vmem:[%s5965_s8] ss:$0 sm:$0xff] }
 0x44c   :  { %4114 = vrot.lane.b32.xlu0 %v4113_v10, %s4237_s4  ;;  %v3376_v24 = vadd.f32 %v3365_v0, %v3211_v37  ;;  %3583 = vmatpush.msrb.mxu3 %v3488_v25  ;;  %v3640_v0 = vld [vmem:[#allocation11 + $0x50] sm:$0xff] }
 0x44d   :  { %3563 = vmatpush.msrb.mxu2 %v3472_v6  ;;  %3542 = vmatpush.msra.mxu1 %v3457_v41 }
 0x44e   :  { %3610 = vmatpush.msrb.mxu0 %v3603_v40 }
 0x44f   :  { %3543 = vmatpush.msra.mxu1 %v3456_v43 }
 0x450   :  { %3611 = vmatpush.msrb.mxu0 %v3602_v47 }
 0x451   :  { %v3367_v31 = vpop.f32.mrf.mxu3  ;;  %3650 = vmatpush.msrb.mxu1 %v3645_v55 }
 0x452   :  { %v3368_v32 = vadd.f32 %v3367_v31, %v3326_v15  ;;  %3612 = vmatpush.msrb.mxu0 %v3601_v5  ;;  %v3637_v15 = vld [vmem:[#allocation11 + $0x38] sm:$0xff]  ;;  %v4124_v31 = vld [vmem:[%s5963_s6] ss:$0 sm:$0xff] }
 0x453   :  { %3651 = vmatpush.msrb.mxu1 %v3644_v38 }
 0x454   :  { %v3377_v22 = vadd.f32 %v3368_v32, %v3212_v36  ;;  %3613 = vmatpush.msrb.mxu0 %v3600_v29  ;;  %v3635_v36 = vld [vmem:[#allocation11 + $0x28] sm:$0xff] }
 0x455   :  { %3652 = vmatpush.msrb.mxu1 %v3643_v49 }
 0x456   :  { %v3427_v59 = vmax.f32 %v3376_v24, %v3377_v22  ;;  %3614 = vmatpush.msrb.mxu0 %v3599_v35  ;;  %v3633_v22 = vld [vmem:[#allocation11 + $0x18] sm:$0xff] }
 0x457   :  { %3653 = vmatpush.msrb.mxu1 %v3642_v4 }
 0x458   :  { %v3428_v3 = vmax.f32 %v3427_v59, 0.0  ;;  %3615 = vmatpush.msrb.mxu0 %v3598_v45 }
 0x459   :  { %3654 = vmatpush.msrb.mxu1 %v3641_v50 }
 0x45a   :  { %v4118_v11 = vpack.i.bf16 %v3402_v46, %v3428_v3 }
 0x45b   :  { %3655 = vmatpush.msrb.mxu1 %v3640_v0 }
 0x45c   :  { %4119 = vrot.lane.b32.xlu1 %v4118_v11, %s4237_s4  ;;  %v3632_v11 = vld [vmem:[#allocation11 + $0x10] sm:$0xff] }
 0x45d   :  { %3656 = vmatpush.msrb.mxu1 %v3639_v48 }
 0x45f   :  { %3657 = vmatpush.msrb.mxu1 %v3638_v57 }
 0x461   :  { %3658 = vmatpush.msrb.mxu1 %v3637_v15 }
 0x463   :  { %3659 = vmatpush.msrb.mxu1 %v3636_v33 }
 0x465   :  { %3660 = vmatpush.msrb.mxu1 %v3635_v36 }
 0x467   :  { %3661 = vmatpush.msrb.mxu1 %v3634_v7 }
 0x469   :  { %3662 = vmatpush.msrb.mxu1 %v3633_v22 }
 0x46b   :  { %3663 = vmatpush.msrb.mxu1 %v3632_v11 }
 0x46d   :  { %3664 = vmatpush.msrb.mxu1 %v3631_v52 }
 0x46f   :  { %3665 = vmatpush.msrb.mxu1 %v3630_v53 }
 0x4be   :  { %v4115_v28 = vpop.permute.xlu0 %4114 }
 0x4bf   :  { %v4117_v8 = vunpack.i.h.bf16 %v4115_v28  ;;  %v4116_v63 = vunpack.i.l.bf16 %v4115_v28 }
 0x4c1   :  { %v3395_v56 = vmax.f32 %v5928_v2, %v4117_v8  ;;  %v3420_v18 = vmax.f32 %v5930_v19, %v4116_v63  ;;  %v3597_v2 = vld [vmem:[#allocation10 + $0x40] sm:$0xff]  ;;  %v3596_v19 = vld [vmem:[#allocation10 + $0x38] sm:$0xff] }
 0x4c2   :  { %3616 = vmatpush.msrb.mxu0 %v3597_v2 }
 0x4c3   :  { %3524 = vmatmul.f32.vlgmr.msra.gmra.mxu0 %v3395_v56  ;;  %3564 = vmatmul.f32.vlgmr.msrb.gmra.mxu2 %v3420_v18 }
 0x4c4   :  { %3617 = vmatpush.msrb.mxu0 %v3596_v19 }
 0x4c6   :  { %3618 = vmatpush.msrb.mxu0 %v3595_v13 }
 0x4c8   :  { %3619 = vmatpush.msrb.mxu0 %v3594_v16 }
 0x4ca   :  { %3620 = vmatpush.msrb.mxu0 %v3593_v1 }
 0x4cc   :  { %3621 = vmatpush.msrb.mxu0 %v3592_v14 }
 0x4ce   :  { %v4120_v44 = vpop.permute.xlu1 %4119  ;;  %3622 = vmatpush.msrb.mxu0 %v3591_v20 }
 0x4cf   :  { %v4122_v34 = vunpack.i.h.bf16 %v4120_v44  ;;  %v4121_v51 = vunpack.i.l.bf16 %v4120_v44 }
 0x4d0   :  { %3623 = vmatpush.msrb.mxu0 %v3590_v17 }
 0x4d1   :  { %v3407_v23 = vmax.f32 %v3402_v46, %v4122_v34  ;;  %v3433_v10 = vmax.f32 %v3428_v3, %v4121_v51 }
 0x4d2   :  { %3624 = vmatpush.msrb.mxu0 %v3589_v61 }
 0x4d3   :  { %3544 = vmatmul.f32.vlgmr.msra.gmra.mxu1 %v3407_v23  ;;  %3584 = vmatmul.f32.vlgmr.msrb.gmra.mxu3 %v3433_v10 }
 0x540   :  { %v3525_v37 = vpop.f32.mrf.mxu0 }
 0x541   :  { %v3526_v32 = vadd.f32 %v4124_v31, %v3525_v37 }
 0x546   :  { %v3565_v42 = vpop.f32.mrf.mxu2 }
 0x550   :  { %v3545_v27 = vpop.f32.mrf.mxu1 }
 0x551   :  { %v3546_v24 = vadd.f32 %v3545_v27, %v3526_v32 }
 0x553   :  { %v3566_v21 = vadd.f32 %v3565_v42, %v3546_v24 }
 0x556   :  { %v3585_v59 = vpop.f32.mrf.mxu3 }
 0x557   :  { %v3586_v46 = vadd.f32 %v3585_v59, %v3566_v21 }
 0x559   :  { %v3588_v3 = vmax.f32 %v3586_v46, 0.0 }
 0x55b   :  { %3625 = vmatmul.f32.vlgmr.msrb.gmra.mxu0 %v3588_v3 }
 0x5d8   :  { %v3626_v12 = vpop.f32.mrf.mxu0 }
 0x5d9   :  { %v3627_v26 = vadd.f32 %v4125_v60, %v3626_v12 }
 0x5db   :  { %v3629_v6 = vmax.f32 %v3627_v26, 0.0 }
 0x5dd   :  { %3666 = vmatmul.f32.vlgmr.msrb.gmra.mxu1 %v3629_v6 }
 0x65a   :  { %v3667_v62 = vpop.f32.mrf.mxu1 }
 0x65b   :  { %v3668_v9 = vadd.f32 %v4126_v58, %v3667_v62 }
 0x65d   :  { %3670 = vst [vmem:[%s5968_s11] sm:$0xff] %v3668_v9 }
 0x65e   :  { %3675 = vsyncpa [#allocation7], 1 }
 0x65f   :  { %3676 = vsyncpa [#allocation9], 1 }
 0x660   :  { %3677 = vsyncpa [#allocation12], 1 }

</bundles_post_ra>
